<compile_context>
chip_gen: v7x
topology: tpu7x:2x2x1
jax: 0.10.0
libtpu: 0.0.40
codegen_flags: <defaults>
</compile_context>

<pallas_src>
import math
from functools import partial

import numpy as np
import jax
import jax.numpy as jnp
from jax.experimental import pallas as pl
from jax.experimental.pallas import tpu as pltpu


def _round_up(v: int, m: int) -> int:
    return ((v + m - 1) // m) * m


def _newton_reciprocal(x):
    # EUP approx reciprocal + two Newton steps (rel. error ~< 1e-7).
    r = pl.reciprocal(x, approx=True)
    r = r * (2.0 - x * r)
    r = r * (2.0 - x * r)
    return r


def _rbf_general_kernel(x_ref, theta_mat_ref, rep01_ref, o_ref, *, prefactor: float):
    """General path: arbitrary (e.g. trained) bessel weights.

    x_ref:         (tile_rows, pack)           f32 distances
    theta_mat_ref: (pack, pack*num_basis)      theta_mat[c, c*nb+b] = w_b / r_max
    rep01_ref:     (pack, pack*num_basis)      0/1,  rep01[c, c*nb+b] = 1
    o_ref:         (tile_rows, pack*num_basis) packed output block
    """
    x = x_ref[...]
    inv = prefactor * _newton_reciprocal(x)                      # ~ prefactor / x, narrow
    hp = jax.lax.Precision.HIGHEST
    # MXU (idle otherwise) performs the distance->lane repeat.  The 0/1 (and
    # per-column weight) matrices keep this exact at HIGHEST precision.
    theta = jnp.dot(x, theta_mat_ref[...], precision=hp,
                    preferred_element_type=jnp.float32)          # w_b * x_i / r_max
    inv_rep = jnp.dot(inv, rep01_ref[...], precision=hp,
                      preferred_element_type=jnp.float32)
    o_ref[...] = (jnp.sin(theta) * inv_rep).astype(o_ref.dtype)


def _rbf_npi_kernel(x_ref, perm_ref, o_ref, *, prefactor: float,
                    theta_scale: float, num_basis: int):
    """Fast path: bessel weights assumed to be exactly (1..num_basis) * pi.

    One sin + one cos per distance, then the Chebyshev/angle-addition
    recurrence on narrow (tile_rows, pack) tiles; a single permutation matmul
    assembles the packed distance-major output layout.
    """
    x = x_ref[...]                                               # (tr, pack)
    inv = prefactor * _newton_reciprocal(x)
    theta = theta_scale * x                                      # pi * x / r_max
    s1 = jnp.sin(theta)
    c1 = jnp.cos(theta)
    two_c1 = 2.0 * c1
    ys = []
    s_prev = jnp.zeros_like(s1)                                  # sin(0 * theta)
    s_cur = s1                                                   # sin(1 * theta)
    for _ in range(num_basis):
        ys.append(s_cur * inv)
        s_prev, s_cur = s_cur, two_c1 * s_cur - s_prev
    y = jnp.concatenate(ys, axis=-1)                             # (tr, nb*pack), basis-major
    out = jnp.dot(y, perm_ref[...], precision=jax.lax.Precision.HIGHEST,
                  preferred_element_type=jnp.float32)            # -> distance-major packed
    o_ref[...] = out.astype(o_ref.dtype)


def rbf_emb_forward(x: jax.Array,
                    bessel_weights: jax.Array,
                    r_max: float = 5.0,
                    *,
                    weights_are_n_pi: bool = False,
                    out_dtype=jnp.float32,
                    max_tile_rows: int = 4096,
                    vmem_budget_bytes: int = 48 * 1024 * 1024,
                    min_grid_steps: int = 2) -> jax.Array:
    """Pallas implementation of rbf_emb.forward.

    x: (...,) distances.  bessel_weights: (num_basis,).
    Returns (..., num_basis) in `out_dtype` (float32 by default).
    `weights_are_n_pi=True` enables the recurrence fast path and is only
    correct while the weights equal their (1..num_basis)*pi initialization.
    """
    orig_shape = x.shape
    x = x.reshape(-1)
    n = int(x.shape[0])
    nb = int(bessel_weights.shape[0])
    prefactor = 2.0 / float(r_max)

    # Packed layout: `pack` distances per output row so that pack*nb is a
    # multiple of 128 lanes; (rows, pack*nb) row-major == (N, nb) row-major.
    pack = 128 // math.gcd(nb, 128)
    lane_w = pack * nb
    out_sz = int(np.dtype(out_dtype).itemsize)

    rows = -(-n // pack)

    # VMEM accounting: double-buffered x/out blocks + f32 temporaries.
    bytes_per_row = 2 * (pack * 4 + lane_w * out_sz) + 6 * lane_w * 4
    const_bytes = (2 * pack * lane_w + lane_w * lane_w) * 4
    usable = max(vmem_budget_bytes - const_bytes - (2 << 20), 1 << 20)
    cap_rows = max(8, min(max_tile_rows, usable // bytes_per_row) // 8 * 8)

    # >= min_grid_steps grid steps whenever possible (v7x megacore sharding).
    want_rows = -(-rows // max(1, min_grid_steps)) if rows > 8 else rows
    tile_rows = min(cap_rows, _round_up(max(want_rows, 8), 8))
    rows_pad = _round_up(max(rows, 1), tile_rows)
    n_pad = rows_pad * pack
    grid = (rows_pad // tile_rows,)

    x_f32 = x.astype(jnp.float32)
    if n_pad != n:
        # Nonzero pad keeps 1/x finite in the (discarded) tail.
        x_f32 = jnp.pad(x_f32, (0, n_pad - n), constant_values=1.0)
    x2 = x_f32.reshape(rows_pad, pack)                      # free reshape

    vmem_limit = int(2 * tile_rows * (pack * 4 + lane_w * out_sz)
                     + 6 * tile_rows * lane_w * 4
                     + 2 * const_bytes + (8 << 20))

    x_spec = pl.BlockSpec((tile_rows, pack), lambda i: (i, 0))
    out_spec = pl.BlockSpec((tile_rows, lane_w), lambda i: (i, 0))

    if weights_are_n_pi:
        # Permutation mapping basis-major lanes (b*pack + c) to packed
        # distance-major lanes (c*nb + b).
        pm = np.zeros((lane_w, lane_w), dtype=np.float32)
        b_idx = np.arange(nb)[:, None]
        c_idx = np.arange(pack)[None, :]
        pm[(b_idx * pack + c_idx).ravel(), (c_idx * nb + b_idx).ravel()] = 1.0
        perm = jnp.asarray(pm)
        kernel = partial(_rbf_npi_kernel, prefactor=prefactor,
                         theta_scale=math.pi / float(r_max), num_basis=nb)
        operands = (x2, perm)
        const_specs = [pl.BlockSpec((lane_w, lane_w), lambda i: (0, 0))]
        transcendentals = 3 * n_pad                         # sin + cos + rcp per distance
    else:
        eye = jnp.eye(pack, dtype=jnp.float32)
        w_scaled = bessel_weights.astype(jnp.float32) / r_max          # (nb,)
        theta_mat = jnp.kron(eye, w_scaled[None, :])                    # (pack, lane_w)
        rep01 = jnp.kron(eye, jnp.ones((1, nb), jnp.float32))           # (pack, lane_w)
        kernel = partial(_rbf_general_kernel, prefactor=prefactor)
        operands = (x2, theta_mat, rep01)
        const_specs = [pl.BlockSpec((pack, lane_w), lambda i: (0, 0)),
                       pl.BlockSpec((pack, lane_w), lambda i: (0, 0))]
        transcendentals = n_pad * nb + n_pad

    cost = pl.CostEstimate(
        flops=int(12 * n_pad * nb),
        transcendentals=int(transcendentals),
        bytes_accessed=int(4 * n_pad + out_sz * n_pad * nb + const_bytes),
    )

    out_packed = pl.pallas_call(
        kernel,
        out_shape=jax.ShapeDtypeStruct((rows_pad, lane_w), out_dtype),
        grid_spec=pltpu.PrefetchScalarGridSpec(
            num_scalar_prefetch=0,
            grid=grid,
            in_specs=[x_spec] + const_specs,
            out_specs=out_spec,
        ),
        compiler_params=pltpu.CompilerParams(
            dimension_semantics=("parallel",),
            vmem_limit_bytes=vmem_limit,
        ),
        cost_estimate=cost,
    )(*operands)

    out = out_packed.reshape(n_pad, nb)                     # free reshape
    if n_pad != n:
        out = out[:n]
    return out.reshape(*orig_shape, nb)


def rbf_emb_reference(x, bessel_weights, r_max=5.0):
    prefactor = 2.0 / r_max
    numerator = jnp.sin(bessel_weights * x[..., None] / r_max)
    return prefactor * (numerator / x[..., None])


if __name__ == "__main__":
    # TODO(synk): parameter storage / trainability of bessel_weights stays on the host
    # (nn.Parameter equivalent); the kernel just consumes the current weight values.
    num_basis = 8
    r_max = 5.0
    N = 4096  # number of edges / distances

    # bessel_weights = linspace(1, num_basis, num_basis) * pi (module init)
    bessel_weights = jnp.linspace(1.0, float(num_basis), num_basis,
                                  dtype=jnp.float32) * math.pi

    key = jax.random.PRNGKey(0)
    x = jax.random.uniform(key, (N,), dtype=jnp.float32,
                           minval=0.1, maxval=r_max)

    ref = rbf_emb_reference(x, bessel_weights, r_max=r_max)

    # General path (works for arbitrary / trained weights).
    out = jax.block_until_ready(rbf_emb_forward(x, bessel_weights, r_max=r_max))
    assert out.shape == (N, num_basis) and out.dtype == jnp.float32
    assert jnp.allclose(out, ref, atol=2e-5, rtol=2e-5), "general path mismatch"

    # n*pi recurrence fast path (weights at their init values).
    out_fast = jax.block_until_ready(
        rbf_emb_forward(x, bessel_weights, r_max=r_max, weights_are_n_pi=True))
    assert out_fast.shape == (N, num_basis)
    assert jnp.allclose(out_fast, ref, atol=1e-4, rtol=1e-4), "n*pi path mismatch"

    # Optional bf16 output path.
    out_bf16 = jax.block_until_ready(
        rbf_emb_forward(x, bessel_weights, r_max=r_max, out_dtype=jnp.bfloat16))
    assert out_bf16.dtype == jnp.bfloat16
    assert jnp.allclose(out_bf16.astype(jnp.float32), ref, atol=2e-2, rtol=2e-2), \
        "bf16 path mismatch"

    print("KERNEL_OK")
</pallas_src>

<mosaic_0001>
module attributes {stable_mosaic.version = 11 : i64} {
  func.func @_rbf_general_kernel(%arg0: i32, %arg1: memref<128x16xf32, #tpu.memory_space<vmem>>, %arg2: memref<16x128xf32, #tpu.memory_space<vmem>>, %arg3: memref<16x128xf32, #tpu.memory_space<vmem>>, %arg4: memref<128x128xf32, #tpu.memory_space<vmem>>) attributes {dimension_semantics = [#tpu.dimension_semantics<parallel>], iteration_bounds = array<i64: 2>, scalar_prefetch = 0 : i64, scratch_operands = 0 : i64, tpu.core_type = #tpu.core_type<tc>, window_params = [{transform_indices = @transform_0, window_bounds = array<i64: 128, 16>}, {pipeline_mode = #tpu.pipeline_mode<synchronous>, transform_indices = @transform_1, window_bounds = array<i64: 16, 128>}, {pipeline_mode = #tpu.pipeline_mode<synchronous>, transform_indices = @transform_2, window_bounds = array<i64: 16, 128>}, {transform_indices = @transform_3, window_bounds = array<i64: 128, 128>}]} {
    %c0 = arith.constant 0 : index
    %c0_0 = arith.constant 0 : index
    %0 = vector.load %arg1[%c0, %c0_0] : memref<128x16xf32, #tpu.memory_space<vmem>>, vector<128x16xf32>
    %1 = tpu.reciprocal %0 {approx = true} : vector<128x16xf32> -> vector<128x16xf32>
    %2 = arith.mulf %0, %1 : vector<128x16xf32>
    %cst = arith.constant 2.000000e+00 : f32
    %3 = vector.broadcast %cst : f32 to vector<128x16xf32>
    %4 = arith.subf %3, %2 : vector<128x16xf32>
    %5 = arith.mulf %1, %4 : vector<128x16xf32>
    %6 = arith.mulf %0, %5 : vector<128x16xf32>
    %cst_1 = arith.constant 2.000000e+00 : f32
    %7 = vector.broadcast %cst_1 : f32 to vector<128x16xf32>
    %8 = arith.subf %7, %6 : vector<128x16xf32>
    %9 = arith.mulf %5, %8 : vector<128x16xf32>
    %cst_2 = arith.constant 4.000000e-01 : f32
    %10 = vector.broadcast %cst_2 : f32 to vector<128x16xf32>
    %11 = arith.mulf %10, %9 : vector<128x16xf32>
    %c0_3 = arith.constant 0 : index
    %c0_4 = arith.constant 0 : index
    %12 = vector.load %arg2[%c0_3, %c0_4] : memref<16x128xf32, #tpu.memory_space<vmem>>, vector<16x128xf32>
    %cst_5 = arith.constant dense<0.000000e+00> : vector<128x128xf32>
    %13 = tpu.matmul %0, %12, %cst_5 {dimension_numbers = #tpu.dot_dimension_numbers<[1], [0], [0], [1], [0, 0, 1, 1], [], []>, precision = #tpu.contract_precision<fp32>} : vector<128x16xf32>, vector<16x128xf32>, vector<128x128xf32> -> vector<128x128xf32>
    %c0_6 = arith.constant 0 : index
    %c0_7 = arith.constant 0 : index
    %14 = vector.load %arg3[%c0_6, %c0_7] : memref<16x128xf32, #tpu.memory_space<vmem>>, vector<16x128xf32>
    %cst_8 = arith.constant dense<0.000000e+00> : vector<128x128xf32>
    %15 = tpu.matmul %11, %14, %cst_8 {dimension_numbers = #tpu.dot_dimension_numbers<[1], [0], [0], [1], [0, 0, 1, 1], [], []>, precision = #tpu.contract_precision<fp32>} : vector<128x16xf32>, vector<16x128xf32>, vector<128x128xf32> -> vector<128x128xf32>
    %16 = math.sin %13 : vector<128x128xf32>
    %17 = arith.mulf %16, %15 : vector<128x128xf32>
    %c0_9 = arith.constant 0 : index
    %c0_10 = arith.constant 0 : index
    %18 = vector.load %arg4[%c0_9, %c0_10] : memref<128x128xf32, #tpu.memory_space<vmem>>, vector<128x128xf32>
    tpu.vector_store %arg4[%c0_9, %c0_10], %17 {strides = array<i32>} : memref<128x128xf32, #tpu.memory_space<vmem>>, vector<128x128xf32>,
    return
  }
  func.func @transform_0(%arg0: i32) -> (i32, i32) {
    %c0_i32 = arith.constant 0 : i32
    %c0_i32_0 = arith.constant 0 : i32
    return %arg0, %c0_i32 : i32, i32
  }
  func.func @transform_1(%arg0: i32) -> (i32, i32) {
    %c0_i32 = arith.constant 0 : i32
    %c0_i32_0 = arith.constant 0 : i32
    %c0_i32_1 = arith.constant 0 : i32
    return %c0_i32, %c0_i32_0 : i32, i32
  }
  func.func @transform_2(%arg0: i32) -> (i32, i32) {
    %c0_i32 = arith.constant 0 : i32
    %c0_i32_0 = arith.constant 0 : i32
    %c0_i32_1 = arith.constant 0 : i32
    return %c0_i32, %c0_i32_0 : i32, i32
  }
  func.func @transform_3(%arg0: i32) -> (i32, i32) {
    %c0_i32 = arith.constant 0 : i32
    %c0_i32_0 = arith.constant 0 : i32
    return %arg0, %c0_i32 : i32, i32
  }
}

</mosaic_0001>

<bundles_post_ra>
// kernel: tpu_custom_call.1
= control target key start
LH: loop header
LB: loop body
LE: loop exit
PB: predicated region body
PF: predicated region fallthrough
CT: control target
= control target key end

     0   :  { %8 = vsyncpa [#allocation3], 0  ;;  %s7890_s0 = inlined_call_operand.vmem [shape: f32[256,16], index: 0, kind: input, shape index: {}]   ;;  %s7891_s1 = inlined_call_operand.vmem [shape: f32[16,128], index: 1, kind: input, shape index: {}]   ;;  %s7892_s2 = inlined_call_operand.vmem [shape: f32[16,128], index: 2, kind: input, shape index: {}]   ;;  %s7893_s3 = inlined_call_operand.hbm [shape: f32[256,128], index: 3, kind: output, shape index: {}]  }
   0x1   :  { %10 = vsyncpa [#allocation3 + $0x1], 0  ;;  %s5534_s12 = smov 0   ;;  %s5536_s13 = smov 0  }
   0x2   :  { %s5538_s14 = smov 0   ;;  %s5540_s15 = smov 0  }
   0x3 LB: > { %s5555_s16 = sadd.s32 4294967295, %s5503_s15   ;;  %s4397_s17 = sadd.s32 4294967294, %s5503_s15   ;;  %s5503_s15 = sphi %s5540_s15, %s8314_s15   ;;  %s5499_s14 = sphi %s5538_s14, %s8313_s14   ;;  %s5495_s13 = sphi %s5536_s13, %s8312_s13   ;;  %s5491_s12 = sphi %s5534_s12, %s8311_s12  }
   0x4   : > { %s5559_s18 = sadd.s32 1, %s5503_s15   ;;  %s91_s19 = sadd.s32 1, %s5499_s14 }
   0x5   : > { %s88_s20 = ssub.s32 %s5503_s15, %s5559_s18  ;;  %p101_p0 = scmp.ne.s32.totalorder %s5499_s14, %s5495_s13 }
   0x6   : > { %p89_p1 = scmp.eq.s32.totalorder %s88_s20, 0  ;;  %p102_p2 = scmp.eq.s32.totalorder %s5555_s16, 1 }
   0x7   : > { %p107_p3 = scmp.ne.s32.totalorder %s5495_s13, %s5491_s12  ;;  %p108_p4 = scmp.eq.s32.totalorder %s4397_s17, 1 }
   0x8   : > { %s5570_s21 = scalar_select %p89_p1, %s5499_s14, %s91_s19  }
   0x9   : > { %p5572_p5 = por %p102_p2, %p101_p0  ;;  %p5576_p6 = por %p108_p4, %p107_p3 }
   0xa   : > { %p4400_p7 = scmp.ge.s32.totalorder %s5503_s15, 1  ;;  %p141_p8 = scmp.lt.s32.totalorder %s5503_s15, 3 }
   0xc   : > { %p142_p9 = pnand %p4400_p7, %p141_p8 }
   0xe   : > { %145 = sbr.rel (%p142_p9) target bundleno = 841 (0x349), region = 32 }
  0x15   : > { %v316_v0 = vld [vmem:[%s7891_s1] sm:$0xff]  ;;  %v317_v1 = vld [vmem:[%s7891_s1 + $0x8] sm:$0xff]  ;;  %s4402_s28 = sshll.u32 %s5555_s16, 4  ;;  %vm318_vm0 = vcmask 130048   ;;  %s162_s10 = sand.u32 1, %s5495_s13  }
  0x16   : > { %v1471_v2 = vld [vmem:[%s7892_s2] sm:$0xff]  ;;  %v368_v3 = vand.u32 4294901760, %v316_v0  ;;  %v371_v4 = vand.u32 4294901760, %v317_v1  ;;  %p166_p10 = scmp.lt.s32.totalorder %s4402_s28, 31  ;;  %v1472_v5 = vld [vmem:[%s7892_s2 + $0x8] sm:$0xff]  ;;  %s4401_s11 = sshll.u32 %s162_s10, 7 }
  0x17   : > { %v1522_v6 = vand.u32 4294901760, %v1471_v2  ;;  %v1525_v7 = vand.u32 4294901760, %v1472_v5  ;;  %s7445_s17 = scalar_lea.vmem [#allocation2], %s4401_s11  ;;  %s4473_s19 = sshll.u32 %s5555_s16, 11 }
  0x18   : > { %v5595_v8 = vpack.c.bf16 %v371_v4, %v368_v3  ;;  %s8316_s28 = smov (!%p166_p10, %s4402_s28), 31  ;;  %v5597_v9 = vsub.f32 %v316_v0, %v368_v3  ;;  %v5599_v10 = vsub.f32 %v317_v1, %v371_v4  ;;  %s4335_s20 = sshll.u32 %s7445_s17, 4  ;;  %s7843_s20 = int_to_ptr.vmem [resolvable:$true] %s4335_s20 }
  0x19   : > { %v5601_v11 = vsub.f32 %v1471_v2, %v1522_v6  ;;  %v5603_v12 = vpack.c.bf16 %v1525_v7, %v1522_v6  ;;  %v5605_v13 = vsub.f32 %v1472_v5, %v1525_v7  ;;  %s4403_s6 = sshll.u32 %s8316_s28, 3  ;;  %s7841_s26 = scalar_lea.hbm %s7893_s3, %s4473_s19 }
  0x1a   : > { %8040 = vst [vmem:[#allocation5_spill] sm:$0xff] %v5597_v9  ;;  %8041 = vst [vmem:[#allocation6_spill] sm:$0xff] %v5599_v10  ;;  %5027 = vmatprep.subr.bf16.mxu0 %v5595_v8  ;;  %v7903_v14 = vand.u32 4294901760, %v5597_v9  ;;  %v7902_v15 = vand.u32 4294901760, %v5599_v10  ;;  %s5615_s9 = scalar_lea.vmem %s7890_s0, %s4403_s6  ;;  %v5620_v17 = vpack.c.bf16 %v5599_v10, %v5597_v9  ;;  %s7849_s16 = scalar_lea.sflag [#allocation3], %s162_s10 }
  0x1b   : > { %8042 = vst [vmem:[#allocation7_spill] sm:$0xff] %v5601_v11  ;;  %8043 = vst [vmem:[#allocation8_spill] sm:$0xff] %v5603_v12  ;;  %v7900_v16 = vand.u32 4294901760, %v5601_v11  ;;  %5029 = vmatpush3.bf16.msra.mxu0 %v5595_v8  ;;  %5051 = vmatprep.subr.bf16.mxu1 %v5603_v12  ;;  %v5624_v18 = vpack.c.bf16 %v5605_v13, %v5601_v11  ;;  %v5627_v19 = vld [vmem:[%s5615_s9] sm:$0xff]  ;;  %v5636_v22 = vld [vmem:[%s5615_s9 + $0x8] sm:$0xff]  ;;  %s5441_s27 = scalar_lea.vmem %s7843_s20, 2048 }
  0x1c   : > { %8044 = vst [vmem:[#allocation9_spill] sm:$0xff] %v5605_v13  ;;  %v598_v20 = vsub.f32 %v5597_v9, %v7903_v14  ;;  %v605_v21 = vsub.f32 %v5599_v10, %v7902_v15  ;;  %v5639_v23 = vld [vmem:[%s5615_s9 + $0x10] sm:$0xff]  ;;  %5053 = vmatpush3.bf16.msra.mxu1 %v5603_v12  ;;  %5345 = vrcp.f32 %v5627_v19  ;;  %v320_v26 = vsel %vm318_vm0, %v5627_v19, 0  ;;  %v5656_v29 = vld [vmem:[%s5615_s9 + $0x18] sm:$0xff]  ;;  %v5662_v33 = vld [vmem:[%s5615_s9 + $0x20] sm:$0xff]  ;;  %p5442_p11 = scmp.ne.s32.totalorder %s7843_s20, %s5441_s27  ;;  %s5511_s28 = smov [#allocation2]  }
  0x1d   : > { %8045 = vst [vmem:[#allocation10_spill] sm:$0xff] %v5624_v18  ;;  %v5645_v24 = vsub.f32 %v5601_v11, %v7900_v16  ;;  %v323_v27 = vsel %vm318_vm0, %v5636_v22, 0  ;;  %v326_v28 = vsel %vm318_vm0, %v5639_v23, 0  ;;  %v5658_v30 = vand.u32 4294901760, %v320_v26  ;;  %v5672_v37 = vld [vmem:[%s5615_s9 + $0x28] sm:$0xff]  ;;  %v5681_v41 = vld [vmem:[%s5615_s9 + $0x30] sm:$0xff] }
  0x1e   : > { %v599_v31 = vand.u32 4294901760, %v598_v20  ;;  %v606_v32 = vand.u32 4294901760, %v605_v21  ;;  %5347 = vrcp.f32 %v5636_v22  ;;  %v5664_v34 = vand.u32 4294901760, %v323_v27  ;;  %v5700_v48 = vld [vmem:[%s5615_s9 + $0x38] sm:$0xff]  ;;  %v5733_v63 = vld [vmem:[%s5615_s9 + $0x40] sm:$0xff]  ;;  %v5736_v0 = vld [vmem:[%s5615_s9 + $0x48] sm:$0xff]  ;;  %p5443_p12 = pnand %p5442_p11, %p5572_p5 }
  0x1f   : > { %8046 = vst [vmem:[#allocation11_spill] sm:$0xff] %v5645_v24  ;;  %5349 = vrcp.f32 %v5639_v23  ;;  %v5667_v35 = vand.u32 4294901760, %v326_v28  ;;  %v329_v36 = vsel %vm318_vm0, %v5656_v29, 0  ;;  %v5675_v38 = vsub.f32 %v320_v26, %v5658_v30  ;;  %v5863_v11 = vld [vmem:[%s5615_s9 + $0x78] sm:$0xff]  ;;  %s5445_s29 = sshll.u32 %s5511_s28, 4  ;;  %s5446_s29 = int_to_ptr.vmem [resolvable:$false] %s5445_s29 }
  0x20   : > { %v5030_v39 = vpack.c.bf16 %v606_v32, %v599_v31  ;;  %5351 = vrcp.f32 %v5656_v29  ;;  %v5678_v40 = vand.u32 4294901760, %v329_v36  ;;  %v5684_v42 = vsub.f32 %v323_v27, %v5664_v34  ;;  %v5753_v27 = vld [vmem:[%s5615_s9 + $0x50] sm:$0xff]  ;;  %8065 = vst [vmem:[#allocation29_spill] sm:$0xff] %v5863_v11  ;;  %p5444_p13 = pneg %p5443_p12  ;;  %s5447_s30 = scalar_lea.vmem %s5446_s29, 4096 }
  0x21   : > { %8047 = vst [vmem:[#allocation12_spill] sm:$0xff] %v5675_v38  ;;  %v5687_v43 = vsub.f32 %v326_v28, %v5667_v35  ;;  %5353 = vrcp.f32 %v5662_v33  ;;  %v332_v44 = vsel %vm318_vm0, %v5662_v33, 0  ;;  %v7899_v45 = vand.u32 4294901760, %v5675_v38  ;;  %p5448_p0 = scmp.lt.s32.totalorder %s7843_s20, %s5446_s29  ;;  %p5449_p1 = scmp.lt.s32.totalorder %s5447_s30, %s5441_s27 }
  0x22   : > { %8048 = vst [vmem:[#allocation13_spill] sm:$0xff] %v5684_v42  ;;  %5031 = vmatprep.subr.bf16.mxu0 %v5030_v39  ;;  %v5694_v46 = vsub.f32 %v329_v36, %v5678_v40  ;;  %v5696_v47 = vand.u32 4294901760, %v332_v44  ;;  %5355 = vrcp.f32 %v5672_v37  ;;  %v7898_v49 = vand.u32 4294901760, %v5684_v42 }
  0x23   : > { %8049 = vst [vmem:[#allocation14_spill] sm:$0xff] %v5687_v43  ;;  %v7897_v50 = vand.u32 4294901760, %v5687_v43  ;;  %v335_v51 = vsel %vm318_vm0, %v5672_v37, 0  ;;  %5357 = vrcp.f32 %v5681_v41  ;;  %v437_v52 = vsub.f32 %v5675_v38, %v7899_v45  ;;  %p5450_p2 = por %p5449_p1, %p5448_p0 }
  0x24   : > { %8050 = vst [vmem:[#allocation15_spill] sm:$0xff] %v5694_v46  ;;  %v7896_v53 = vand.u32 4294901760, %v5694_v46  ;;  %v5712_v54 = vsub.f32 %v332_v44, %v5696_v47  ;;  %v5714_v55 = vand.u32 4294901760, %v335_v51  ;;  %v447_v56 = vsub.f32 %v5684_v42, %v7898_v49 }
  0x25   : > { %v457_v57 = vsub.f32 %v5687_v43, %v7897_v50  ;;  %v338_v58 = vsel %vm318_vm0, %v5681_v41, 0  ;;  %5359 = vrcp.f32 %v5700_v48  ;;  %v438_v59 = vand.u32 4294901760, %v437_v52  ;;  %p5451_p3 = pnand %p5450_p2, %p5444_p13 }
  0x26   : > { %8051 = vst [vmem:[#allocation16_spill] sm:$0xff] %v5712_v54  ;;  %v467_v60 = vsub.f32 %v5694_v46, %v7896_v53  ;;  %v7895_v61 = vand.u32 4294901760, %v5712_v54  ;;  %v5730_v62 = vsub.f32 %v335_v51, %v5714_v55  ;;  %v5738_v1 = vpop.eup %5345  ;;  %v448_v2 = vand.u32 4294901760, %v447_v56 }
  0x27   : > { %v458_v3 = vand.u32 4294901760, %v457_v57  ;;  %v5740_v4 = vand.u32 4294901760, %v338_v58  ;;  %v341_v5 = vsel %vm318_vm0, %v5700_v48, 0  ;;  %4694 = vmatprep.mubr.f32.mxu0 %v438_v59  ;;  %5361 = vrcp.f32 %v5733_v63 }
  0x28   : > { %8052 = vst [vmem:[#allocation17_spill] sm:$0xff] %v5730_v62  ;;  %v5744_v6 = vpop.eup %5347  ;;  %v468_v7 = vand.u32 4294901760, %v467_v60  ;;  %v477_v20 = vsub.f32 %v5712_v54, %v7895_v61  ;;  %v7894_v21 = vand.u32 4294901760, %v5730_v62  ;;  %v5750_v26 = vand.u32 4294901760, %v341_v5  ;;  %4695 = vmatmul.mubr.f32.vlgmr.msra.gmra.mrb[0].mxu0 %v448_v2 }
  0x29   : > { %v5755_v28 = vpop.eup %5349  ;;  %v5758_v31 = vsub.f32 %v338_v58, %v5740_v4  ;;  %v344_v32 = vsel %vm318_vm0, %v5733_v63, 0  ;;  %v347_v36 = vsel %vm318_vm0, %v5736_v0, 0  ;;  %5033 = vmatpush3.bf16.msra.mxu0 %v5030_v39  ;;  %4697 = vmatprep.mubr.f32.mxu0 %v458_v3  ;;  %v5776_v58 = vld [vmem:[%s5615_s9 + $0x58] sm:$0xff]  ;;  %5363 = vrcp.f32 %v5736_v0  ;;  %v5787_v3 = vld [vmem:[%s5615_s9 + $0x60] sm:$0xff] }
  0x2a   : > { %v5765_v44 = vpop.eup %5351  ;;  %v478_v51 = vand.u32 4294901760, %v477_v20  ;;  %v487_v52 = vsub.f32 %v5730_v62, %v7894_v21  ;;  %v5771_v56 = vsub.f32 %v341_v5, %v5750_v26  ;;  %v5773_v57 = vand.u32 4294901760, %v344_v32  ;;  %5035 = vmatprep.subr.bf16.mxu0 %v5620_v17 }
  0x2b   : > { %8053 = vst [vmem:[#allocation18_spill] sm:$0xff] %v5758_v31  ;;  %v5778_v59 = vpop.eup %5353  ;;  %v7901_v60 = vand.u32 4294901760, %v5758_v31  ;;  %v5782_v39 = vand.u32 4294901760, %v347_v36  ;;  %v350_v2 = vsel %vm318_vm0, %v5753_v27, 0  ;;  %5365 = vrcp.f32 %v5753_v27 }
  0x2c   : > { %8054 = vst [vmem:[#allocation19_spill] sm:$0xff] %v5771_v56  ;;  %v5790_v5 = vpop.eup %5355  ;;  %v488_v20 = vand.u32 4294901760, %v487_v52  ;;  %v7904_v21 = vand.u32 4294901760, %v5771_v56  ;;  %v5794_v61 = vsub.f32 %v344_v32, %v5773_v57  ;;  %4698 = vmatmul.mubr.f32.gmra.mrb[2].mxu0 %v468_v7  ;;  %v5805_v45 = vand.u32 4294901760, %v350_v2  ;;  %v5809_v52 = vld [vmem:[%s5615_s9 + $0x68] sm:$0xff] }
  0x2d   : > { %v5797_v53 = vpop.eup %5357  ;;  %v497_v50 = vsub.f32 %v5758_v31, %v7901_v60  ;;  %v5803_v49 = vsub.f32 %v347_v36, %v5782_v39  ;;  %5367 = vrcp.f32 %v5776_v58  ;;  %4700 = vmatprep.mubr.f32.mxu0 %v478_v51  ;;  %v353_v16 = vsel %vm318_vm0, %v5776_v58, 0  ;;  %v5842_v31 = vld [vmem:[%s5615_s9 + $0x70] sm:$0xff] }
  0x2e   : > { %8055 = vst [vmem:[#allocation20_spill] sm:$0xff] %v5794_v61  ;;  %8057 = vst [vmem:[#allocation22_spill] sm:$0xff] %v5805_v45  ;;  %v507_v32 = vsub.f32 %v5771_v56, %v7904_v21  ;;  %v7911_v7 = vand.u32 4294901760, %v5794_v61  ;;  %5369 = vrcp.f32 %v5787_v3  ;;  %v5822_v14 = vsub.f32 %v350_v2, %v5805_v45 }
  0x2f   : > { %8056 = vst [vmem:[#allocation21_spill] sm:$0xff] %v5803_v49  ;;  %v5818_v36 = vpop.eup %5359  ;;  %v498_v60 = vand.u32 4294901760, %v497_v50  ;;  %v7914_v15 = vand.u32 4294901760, %v5803_v49  ;;  %v5824_v51 = vand.u32 4294901760, %v353_v16  ;;  %v356_v12 = vsel %vm318_vm0, %v5787_v3, 0 }
  0x30   : > { %8058 = vst [vmem:[#allocation23_spill] sm:$0xff] %v5822_v14  ;;  %v508_v25 = vand.u32 4294901760, %v507_v32  ;;  %v517_v21 = vsub.f32 %v5794_v61, %v7911_v7  ;;  %5371 = vrcp.f32 %v5809_v52  ;;  %4701 = vmatmul.mubr.f32.gmra.mrb[4].mxu0 %v488_v20  ;;  %v5839_v32 = vand.u32 4294901760, %v356_v12 }
  0x31   : > { %8059 = vst [vmem:[#allocation24_spill] sm:$0xff] %v5824_v51  ;;  %v527_v50 = vsub.f32 %v5803_v49, %v7914_v15  ;;  %v5837_v56 = vsub.f32 %v353_v16, %v5824_v51  ;;  %4703 = vmatprep.mubr.f32.mxu0 %v498_v60  ;;  %v359_v61 = vsel %vm318_vm0, %v5809_v52, 0  ;;  %v204_v20 = vmul.f32 %v5738_v1, %v5627_v19  ;;  %v5850_v2 = vpop.eup %5361 }
  0x32   : > { %8061 = vst [vmem:[#allocation26_spill] sm:$0xff] %v5839_v32  ;;  %v518_v7 = vand.u32 4294901760, %v517_v21  ;;  %v205_v15 = vmul.f32 %v5744_v6, %v5636_v22  ;;  %v8062_v49 = vand.u32 4294901760, %v5822_v14  ;;  %v5857_v21 = vsub.f32 %v356_v12, %v5839_v32 }
  0x33   : > { %8060 = vst [vmem:[#allocation25_spill] sm:$0xff] %v5837_v56  ;;  %v528_v16 = vand.u32 4294901760, %v527_v50  ;;  %v7932_v18 = vand.u32 4294901760, %v5837_v56  ;;  %v5859_v60 = vand.u32 4294901760, %v359_v61  ;;  %v220_v54 = vsub.f32 2.0, %v204_v20  ;;  %v5865_v43 = vpop.eup %5363 }
  0x34   : > { %v537_v62 = vsub.f32 %v5822_v14, %v8062_v49  ;;  %8063 = vst [vmem:[#allocation27_spill] sm:$0xff] %v5857_v21  ;;  %v221_v46 = vsub.f32 2.0, %v205_v15  ;;  %5373 = vrcp.f32 %v5842_v31  ;;  %4704 = vmatmul.mubr.f32.gmra.mrb[6].mxu0 %v508_v25  ;;  %v7936_v14 = vand.u32 4294901760, %v5857_v21 }
  0x35   : > { %8064 = vst [vmem:[#allocation28_spill] sm:$0xff] %v5859_v60  ;;  %v547_v49 = vsub.f32 %v5837_v56, %v7932_v18  ;;  %v362_v12 = vsel %vm318_vm0, %v5842_v31, 0  ;;  %v5873_v42 = vpop.eup %5365  ;;  %4706 = vmatprep.mubr.f32.mxu0 %v518_v7  ;;  %v5876_v15 = vsub.f32 %v359_v61, %v5859_v60  ;;  %v236_v20 = vmul.f32 %v5738_v1, %v220_v54 }
  0x36   : > { %v538_v50 = vand.u32 4294901760, %v537_v62  ;;  %v237_v25 = vmul.f32 %v5744_v6, %v221_v46  ;;  %v5880_v62 = vand.u32 4294901760, %v362_v12  ;;  %v557_v56 = vsub.f32 %v5857_v21, %v7936_v14 }
  0x37   : > { %8066 = vst [vmem:[#allocation30_spill] sm:$0xff] %v5876_v15  ;;  %v5882_v10 = vpop.eup %5367  ;;  %v548_v18 = vand.u32 4294901760, %v547_v49  ;;  %5375 = vrcp.f32 %v5863_v11  ;;  %v365_v7 = vsel %vm318_vm0, %v5863_v11, 0  ;;  %v7951_v54 = vand.u32 4294901760, %v5876_v15 }
  0x38   : > { %8067 = vst [vmem:[#allocation31_spill] sm:$0xff] %v5880_v62  ;;  %v5890_v61 = vpop.eup %5369  ;;  %v252_v46 = vmul.f32 %v236_v20, %v5627_v19  ;;  %v253_v1 = vmul.f32 %v237_v25, %v5636_v22  ;;  %v5896_v6 = vsub.f32 %v362_v12, %v5880_v62  ;;  %4707 = vmatmul.mubr.f32.gmra.mrb[8].mxu0 %v528_v16  ;;  %v558_v49 = vand.u32 4294901760, %v557_v56 }
  0x39   : > { %v5898_v9 = vand.u32 4294901760, %v365_v7  ;;  %v206_v14 = vmul.f32 %v5755_v28, %v5639_v23  ;;  %v207_v21 = vmul.f32 %v5765_v44, %v5656_v29  ;;  %4709 = vmatprep.mubr.f32.mxu0 %v538_v50  ;;  %v567_v19 = vsub.f32 %v5876_v15, %v7951_v54 }
  0x3a   : > { %v5904_v38 = vpop.eup %5371  ;;  %v268_v22 = vsub.f32 2.0, %v252_v46  ;;  %v269_v12 = vsub.f32 2.0, %v253_v1  ;;  %v7965_v16 = vand.u32 4294901760, %v5896_v6  ;;  %v208_v62 = vmul.f32 %v5778_v59, %v5662_v33 }
  0x3b   : > { %8068 = vst [vmem:[#allocation32_spill] sm:$0xff] %v5898_v9  ;;  %v5911_v56 = vsub.f32 %v365_v7, %v5898_v9  ;;  %v222_v13 = vsub.f32 2.0, %v206_v14  ;;  %v223_v24 = vsub.f32 2.0, %v207_v21  ;;  %v568_v60 = vand.u32 4294901760, %v567_v19 }
  0x3c   : > { %v284_v32 = vmul.f32 %v268_v22, %v236_v20  ;;  %v285_v11 = vmul.f32 %v269_v12, %v237_v25  ;;  %v577_v50 = vsub.f32 %v5896_v6, %v7965_v16  ;;  %4710 = vmatmul.mubr.f32.gmra.mrb[10].mxu0 %v548_v18  ;;  %v224_v54 = vsub.f32 2.0, %v208_v62 }
  0x3d   : > { %v7954_v46 = vand.u32 4294901760, %v5911_v56  ;;  %v238_v1 = vmul.f32 %v5755_v28, %v222_v13  ;;  %v239_v7 = vmul.f32 %v5765_v44, %v223_v24  ;;  %4712 = vmatprep.mubr.f32.mxu0 %v558_v49  ;;  %v209_v20 = vmul.f32 %v5790_v5, %v5672_v37 }
  0x3e   : > { %v5921_v14 = vpop.eup %5373  ;;  %v300_v21 = vmul.f32 0.4, %v284_v32  ;;  %v301_v15 = vmul.f32 0.4, %v285_v11  ;;  %v578_v19 = vand.u32 4294901760, %v577_v50  ;;  %v240_v24 = vmul.f32 %v5778_v59, %v224_v54 }
  0x3f   : > { %v587_v18 = vsub.f32 %v5911_v56, %v7954_v46  ;;  %v254_v25 = vmul.f32 %v238_v1, %v5639_v23  ;;  %v255_v13 = vmul.f32 %v239_v7, %v5656_v29  ;;  %v225_v32 = vsub.f32 2.0, %v209_v20 }
  0x40   : > { %v1474_v28 = vsel %vm318_vm0, %v300_v21, 0  ;;  %v1477_v44 = vsel %vm318_vm0, %v301_v15, 0  ;;  %v210_v11 = vmul.f32 %v5797_v53, %v5681_v41  ;;  %4713 = vmatmul.mubr.f32.gmra.mrb[12].mxu0 %v568_v60  ;;  %v256_v59 = vmul.f32 %v240_v24, %v5662_v33 }
  0x41   : > { %v5935_v62 = vpop.eup %5375  ;;  %v5937_v49 = vand.u32 4294901760, %v1474_v28  ;;  %v5939_v22 = vand.u32 4294901760, %v1477_v44  ;;  %v588_v23 = vand.u32 4294901760, %v587_v18  ;;  %v270_v12 = vsub.f32 2.0, %v254_v25  ;;  %4715 = vmatprep.mubr.f32.mxu0 %v578_v19 }
  0x42   : > { %v271_v29 = vsub.f32 2.0, %v255_v13  ;;  %v241_v54 = vmul.f32 %v5790_v5, %v225_v32  ;;  %v226_v15 = vsub.f32 2.0, %v210_v11  ;;  %v211_v20 = vmul.f32 %v5818_v36, %v5700_v48 }
  0x43   : > { %v5944_v50 = vsub.f32 %v1474_v28, %v5937_v49  ;;  %v5947_v21 = vsub.f32 %v1477_v44, %v5939_v22  ;;  %v286_v60 = vmul.f32 %v270_v12, %v238_v1  ;;  %v272_v18 = vsub.f32 2.0, %v256_v59 }
  0x44   : > { %v287_v46 = vmul.f32 %v271_v29, %v239_v7  ;;  %v257_v19 = vmul.f32 %v241_v54, %v5672_v37  ;;  %v242_v25 = vmul.f32 %v5797_v53, %v226_v15  ;;  %4716 = vmatmul.mubr.f32.gmra.mrb[14].mxu0 %v588_v23  ;;  %v227_v28 = vsub.f32 2.0, %v211_v20 }
  0x45   : > { %v7960_v33 = vand.u32 4294901760, %v5944_v50  ;;  %v7959_v5 = vand.u32 4294901760, %v5947_v21  ;;  %v302_v13 = vmul.f32 0.4, %v286_v60  ;;  %4722 = vmatprep.mubr.f32.mxu0 %v5658_v30  ;;  %v288_v1 = vmul.f32 %v272_v18, %v240_v24 }
  0x46   : > { %v303_v32 = vmul.f32 0.4, %v287_v46  ;;  %v273_v44 = vsub.f32 2.0, %v257_v19  ;;  %v258_v11 = vmul.f32 %v242_v25, %v5681_v41  ;;  %v243_v23 = vmul.f32 %v5818_v36, %v227_v28 }
  0x47   : > { %v1591_v37 = vsub.f32 %v5944_v50, %v7960_v33  ;;  %v1601_v53 = vsub.f32 %v5947_v21, %v7959_v5  ;;  %v1480_v7 = vsel %vm318_vm0, %v302_v13, 0  ;;  %v304_v24 = vmul.f32 0.4, %v288_v1 }
  0x48   : > { %v5965_v12 = vand.u32 4294901760, %v1480_v7  ;;  %v1483_v46 = vsel %vm318_vm0, %v303_v32, 0  ;;  %v289_v29 = vmul.f32 %v273_v44, %v241_v54  ;;  %4723 = vmatmul.mubr.f32.vlgmr.msra.gmra.mrb[0].mxu0 %v5664_v34  ;;  %v274_v60 = vsub.f32 2.0, %v258_v11 }
  0x49   : > { %v1592_v59 = vand.u32 4294901760, %v1591_v37  ;;  %v1602_v41 = vand.u32 4294901760, %v1601_v53  ;;  %v5968_v15 = vand.u32 4294901760, %v1483_v46  ;;  %5037 = vmatpush3.bf16.msra.mxu0 %v5620_v17  ;;  %v1486_v36 = vsel %vm318_vm0, %v304_v24, 0  ;;  %4725 = vmatprep.mubr.f32.mxu0 %v5667_v35 }
  0x4a   : > { %v5972_v20 = vsub.f32 %v1480_v7, %v5965_v12  ;;  %v305_v18 = vmul.f32 0.4, %v289_v29  ;;  %v259_v19 = vmul.f32 %v243_v23, %v5700_v48  ;;  %v5981_v13 = vand.u32 4294901760, %v1486_v36  ;;  %5039 = vmatprep.subr.bf16.mxu0 %v5595_v8 }
  0x4b   : > { %4862 = vmatprep.mubr.f32.mxu1 %v1592_v59  ;;  %v5979_v54 = vsub.f32 %v1483_v46, %v5968_v15  ;;  %v290_v28 = vmul.f32 %v274_v60, %v242_v25  ;;  %v212_v32 = vmul.f32 %v5850_v2, %v5733_v63  ;;  %v213_v48 = vmul.f32 %v5865_v43, %v5736_v0 }
  0x4c   : > { %8069 = vst [vmem:[#allocation33_spill] sm:$0xff] %v5981_v13  ;;  %4863 = vmatmul.mubr.f32.vlgmr.msra.gmra.mrb[0].mxu1 %v1602_v41  ;;  %v7958_v17 = vand.u32 4294901760, %v5972_v20  ;;  %v1489_v1 = vsel %vm318_vm0, %v305_v18, 0  ;;  %v275_v44 = vsub.f32 2.0, %v259_v19  ;;  %v5992_v37 = vsub.f32 %v1486_v36, %v5981_v13  ;;  %4726 = vmatmul.mubr.f32.gmra.mrb[2].mxu0 %v5678_v40 }
  0x4d   : > { %v7957_v11 = vand.u32 4294901760, %v5979_v54  ;;  %v5994_v25 = vand.u32 4294901760, %v1489_v1  ;;  %v306_v53 = vmul.f32 0.4, %v290_v28  ;;  %4728 = vmatprep.mubr.f32.mxu0 %v5696_v47  ;;  %v228_v24 = vsub.f32 2.0, %v212_v32 }
  0x4e   : > { %v1611_v7 = vsub.f32 %v5972_v20, %v7958_v17  ;;  %v291_v46 = vmul.f32 %v275_v44, %v243_v23  ;;  %v229_v29 = vsub.f32 2.0, %v213_v48  ;;  %v7955_v41 = vand.u32 4294901760, %v5992_v37 }
  0x4f   : > { %v1621_v59 = vsub.f32 %v5979_v54, %v7957_v11  ;;  %v6006_v60 = vsub.f32 %v1489_v1, %v5994_v25  ;;  %v1492_v36 = vsel %vm318_vm0, %v306_v53, 0  ;;  %v244_v23 = vmul.f32 %v5850_v2, %v228_v24 }
  0x50   : > { %v1612_v18 = vand.u32 4294901760, %v1611_v7  ;;  %v6009_v19 = vand.u32 4294901760, %v1492_v36  ;;  %v307_v28 = vmul.f32 0.4, %v291_v46  ;;  %v1631_v32 = vsub.f32 %v5992_v37, %v7955_v41  ;;  %4729 = vmatmul.mubr.f32.gmra.mrb[4].mxu0 %v5714_v55 }
  0x51   : > { %v1622_v44 = vand.u32 4294901760, %v1621_v59  ;;  %v7956_v48 = vand.u32 4294901760, %v6006_v60  ;;  %v245_v1 = vmul.f32 %v5865_v43, %v229_v29  ;;  %v260_v46 = vmul.f32 %v244_v23, %v5733_v63  ;;  %4731 = vmatprep.mubr.f32.mxu0 %v5740_v4 }
  0x52   : > { %4865 = vmatprep.mubr.f32.mxu1 %v1612_v18  ;;  %v6019_v53 = vsub.f32 %v1492_v36, %v6009_v19  ;;  %v1495_v7 = vsel %vm318_vm0, %v307_v28, 0  ;;  %v214_v2 = vmul.f32 %v5873_v42, %v5753_v27  ;;  %v1632_v24 = vand.u32 4294901760, %v1631_v32 }
  0x53   : > { %4866 = vmatmul.mubr.f32.gmra.mrb[2].mxu1 %v1622_v44  ;;  %v1641_v59 = vsub.f32 %v6006_v60, %v7956_v48  ;;  %v6029_v43 = vand.u32 4294901760, %v1495_v7  ;;  %v261_v29 = vmul.f32 %v245_v1, %v5736_v0  ;;  %v276_v18 = vsub.f32 2.0, %v260_v46 }
  0x54   : > { %v7961_v36 = vand.u32 4294901760, %v6019_v53  ;;  %v230_v28 = vsub.f32 2.0, %v214_v2  ;;  %v215_v63 = vmul.f32 %v5882_v10, %v5776_v58  ;;  %4868 = vmatprep.mubr.f32.mxu1 %v1632_v24  ;;  %4732 = vmatmul.mubr.f32.gmra.mrb[6].mxu0 %v5750_v26  ;;  %v216_v48 = vmul.f32 %v5890_v61, %v5787_v3 }
  0x55   : > { %v1642_v41 = vand.u32 4294901760, %v1641_v59  ;;  %v6036_v44 = vsub.f32 %v1495_v7, %v6029_v43  ;;  %v277_v32 = vsub.f32 2.0, %v261_v29  ;;  %v292_v46 = vmul.f32 %v276_v18, %v244_v23  ;;  %4734 = vmatprep.mubr.f32.mxu0 %v5773_v57 }
  0x56   : > { %v1651_v0 = vsub.f32 %v6019_v53, %v7961_v36  ;;  %v246_v2 = vmul.f32 %v5873_v42, %v230_v28  ;;  %v231_v11 = vsub.f32 2.0, %v215_v63  ;;  %v232_v59 = vsub.f32 2.0, %v216_v48 }
  0x57   : > { %4869 = vmatmul.mubr.f32.gmra.mrb[4].mxu1 %v1642_v41  ;;  %v7963_v7 = vand.u32 4294901760, %v6036_v44  ;;  %v293_v24 = vmul.f32 %v277_v32, %v245_v1  ;;  %v217_v29 = vmul.f32 %v5904_v38, %v5809_v52  ;;  %v308_v5 = vmul.f32 0.4, %v292_v46 }
  0x58   : > { %v1652_v17 = vand.u32 4294901760, %v1651_v0  ;;  %v262_v33 = vmul.f32 %v246_v2, %v5753_v27  ;;  %v247_v36 = vmul.f32 %v5882_v10, %v231_v11  ;;  %4735 = vmatmul.mubr.f32.gmra.mrb[8].mxu0 %v5782_v39  ;;  %v248_v41 = vmul.f32 %v5890_v61, %v232_v59 }
  0x59   : > { %v1661_v42 = vsub.f32 %v6036_v44, %v7963_v7  ;;  %v309_v23 = vmul.f32 0.4, %v293_v24  ;;  %v233_v1 = vsub.f32 2.0, %v217_v29  ;;  %v1498_v48 = vsel %vm318_vm0, %v308_v5, 0  ;;  %4737 = vmatprep.mubr.f32.mxu0 %v5805_v45  ;;  %v8070_v24 = vld [vmem:[#allocation29_spill] sm:$0xff]  ;;  %v8095_v45 = vld [vmem:[#allocation23_spill] sm:$0xff] }
  0x5a   : > { %4871 = vmatprep.mubr.f32.mxu1 %v1652_v17  ;;  %v278_v18 = vsub.f32 2.0, %v262_v33  ;;  %v263_v28 = vmul.f32 %v247_v36, %v5776_v58  ;;  %v218_v10 = vmul.f32 %v5921_v14, %v5842_v31  ;;  %v6061_v11 = vand.u32 4294901760, %v1498_v48 }
  0x5b   : > { %v1662_v27 = vand.u32 4294901760, %v1661_v42  ;;  %v1501_v63 = vsel %vm318_vm0, %v309_v23, 0  ;;  %v264_v32 = vmul.f32 %v248_v41, %v5787_v3  ;;  %v249_v33 = vmul.f32 %v5904_v38, %v233_v1  ;;  %v8071_v23 = vld [vmem:[#allocation26_spill] sm:$0xff] }
  0x5c   : > { %v6065_v61 = vand.u32 4294901760, %v1501_v63  ;;  %v294_v17 = vmul.f32 %v278_v18, %v246_v2  ;;  %v279_v0 = vsub.f32 2.0, %v263_v28  ;;  %v6069_v58 = vsub.f32 %v1498_v48, %v6061_v11  ;;  %4738 = vmatmul.mubr.f32.gmra.mrb[10].mxu0 %v5824_v51 }
  0x5d   : > { %4872 = vmatmul.mubr.f32.gmra.mrb[6].mxu1 %v1662_v27  ;;  %v280_v5 = vsub.f32 2.0, %v264_v32  ;;  %v234_v46 = vsub.f32 2.0, %v218_v10  ;;  %v219_v59 = vmul.f32 %v5935_v62, %v8070_v24  ;;  %v265_v2 = vmul.f32 %v249_v33, %v5809_v52  ;;  %4740 = vmatprep.mubr.f32.mxu0 %v8071_v23 }
  0x5e   : > { %v6075_v29 = vsub.f32 %v1501_v63, %v6065_v61  ;;  %v310_v3 = vmul.f32 0.4, %v294_v17  ;;  %v295_v42 = vmul.f32 %v279_v0, %v247_v36  ;;  %v7962_v38 = vand.u32 4294901760, %v6069_v58  ;;  %v8072_v0 = vld [vmem:[#allocation28_spill] sm:$0xff] }
  0x5f   : > { %v296_v1 = vmul.f32 %v280_v5, %v248_v41  ;;  %v250_v48 = vmul.f32 %v5921_v14, %v234_v46  ;;  %v235_v18 = vsub.f32 2.0, %v219_v59  ;;  %v281_v32 = vsub.f32 2.0, %v265_v2  ;;  %v8073_v59 = vld [vmem:[#allocation31_spill] sm:$0xff] }
  0x60   : > { %v7964_v28 = vand.u32 4294901760, %v6075_v29  ;;  %v1504_v10 = vsel %vm318_vm0, %v310_v3, 0  ;;  %v311_v27 = vmul.f32 0.4, %v295_v42  ;;  %v1671_v36 = vsub.f32 %v6069_v58, %v7962_v38  ;;  %4741 = vmatmul.mubr.f32.gmra.mrb[12].mxu0 %v8072_v0 }
  0x61   : > { %v6086_v63 = vand.u32 4294901760, %v1504_v10  ;;  %v312_v52 = vmul.f32 0.4, %v296_v1  ;;  %v266_v17 = vmul.f32 %v250_v48, %v5842_v31  ;;  %v297_v5 = vmul.f32 %v281_v32, %v249_v33  ;;  %4743 = vmatprep.mubr.f32.mxu0 %v8073_v59 }
  0x62   : > { %v1681_v14 = vsub.f32 %v6075_v29, %v7964_v28  ;;  %v1507_v41 = vsel %vm318_vm0, %v311_v27, 0  ;;  %v251_v46 = vmul.f32 %v5935_v62, %v235_v18  ;;  %v1672_v3 = vand.u32 4294901760, %v1671_v36  ;;  %v8074_v27 = vld [vmem:[#allocation11_spill] sm:$0xff] }
  0x63   : > { %v6097_v42 = vsub.f32 %v1504_v10, %v6086_v63  ;;  %v6099_v2 = vand.u32 4294901760, %v1507_v41  ;;  %v1510_v31 = vsel %vm318_vm0, %v312_v52, 0  ;;  %v313_v7 = vmul.f32 0.4, %v297_v5 }
  0x64   : > { %v1682_v1 = vand.u32 4294901760, %v1681_v14  ;;  %v6102_v38 = vand.u32 4294901760, %v1510_v31  ;;  %v282_v28 = vsub.f32 2.0, %v266_v17  ;;  %4874 = vmatprep.mubr.f32.mxu1 %v1672_v3  ;;  %v267_v18 = vmul.f32 %v251_v46, %v8070_v24  ;;  %4744 = vmatmul.mubr.f32.gmra.mrb[14].mxu0 %v5898_v9  ;;  %v8075_v17 = vld [vmem:[#allocation9_spill] sm:$0xff]  ;;  %v8077_v3 = vld [vmem:[#allocation12_spill] sm:$0xff]  ;;  %v8080_v9 = vld [vmem:[#allocation6_spill] sm:$0xff] }
  0x65   : > { %v7968_v33 = vand.u32 4294901760, %v6097_v42  ;;  %v6106_v62 = vsub.f32 %v1507_v41, %v6099_v2  ;;  %v1753_v10 = vand.u32 4294901760, %v8074_v27  ;;  %v1513_v36 = vsel %vm318_vm0, %v313_v7, 0  ;;  %4750 = vmatprep.mubr.f32.mxu0 %v8077_v3 }
  0x66   : > { %4875 = vmatmul.mubr.f32.gmra.mrb[8].mxu1 %v1682_v1  ;;  %v6112_v32 = vsub.f32 %v1510_v31, %v6102_v38  ;;  %v298_v52 = vmul.f32 %v282_v28, %v250_v48  ;;  %v8076_v14 = vand.u32 4294901760, %v8075_v17  ;;  %v6123_v27 = vand.u32 4294901760, %v1513_v36  ;;  %v8078_v48 = vld [vmem:[#allocation5_spill] sm:$0xff] }
  0x67   : > { %v1691_v24 = vsub.f32 %v6097_v42, %v7968_v33  ;;  %v7971_v41 = vand.u32 4294901760, %v6106_v62  ;;  %v283_v1 = vsub.f32 2.0, %v267_v18  ;;  %v8079_v28 = vand.u32 4294901760, %v8078_v48  ;;  %v8082_v18 = vld [vmem:[#allocation13_spill] sm:$0xff] }
  0x68   : > { %v1759_v5 = vsub.f32 %v8075_v17, %v8076_v14  ;;  %v7972_v31 = vand.u32 4294901760, %v6112_v32  ;;  %v314_v16 = vmul.f32 0.4, %v298_v52  ;;  %v8081_v59 = vand.u32 4294901760, %v8080_v9  ;;  %4751 = vmatmul.mubr.f32.vlgmr.msra.gmra.mrb[0].mxu0 %v8082_v18 }
  0x69   : > { %v1692_v0 = vand.u32 4294901760, %v1691_v24  ;;  %v1701_v33 = vsub.f32 %v6106_v62, %v7971_v41  ;;  %v6136_v23 = vsub.f32 %v1513_v36, %v6123_v27  ;;  %v299_v51 = vmul.f32 %v283_v1, %v251_v46  ;;  %5041 = vmatpush3.bf16.msra.mxu0 %v5595_v8  ;;  %v8084_v24 = vld [vmem:[#allocation7_spill] sm:$0xff] }
  0x6a   : > { %v1760_v7 = vand.u32 4294901760, %v1759_v5  ;;  %v6130_v14 = vpack.c.bf16 %v8081_v59, %v8079_v28  ;;  %v1711_v52 = vsub.f32 %v6112_v32, %v7972_v31  ;;  %v1516_v5 = vsel %vm318_vm0, %v314_v16, 0  ;;  %v8083_v59 = vld [vmem:[#allocation14_spill] sm:$0xff] }
  0x6b   : > { %4753 = vmatprep.mubr.f32.mxu0 %v8083_v59  ;;  %v8085_v48 = vand.u32 4294901760, %v8084_v24  ;;  %v8086_v28 = vand.u32 4294901760, %v8075_v17  ;;  %4877 = vmatprep.mubr.f32.mxu1 %v1692_v0  ;;  %v1702_v46 = vand.u32 4294901760, %v1701_v33  ;;  %v7973_v1 = vand.u32 4294901760, %v6136_v23  ;;  %v8087_v33 = vld [vmem:[#allocation15_spill] sm:$0xff]  ;;  %v8088_v24 = vld [vmem:[#allocation16_spill] sm:$0xff] }
  0x6c   : > { %v5054_v9 = vpack.c.bf16 %v1760_v7, %v1753_v10  ;;  %v6152_v41 = vand.u32 4294901760, %v1516_v5  ;;  %v315_v31 = vmul.f32 0.4, %v299_v51  ;;  %5043 = vmatprep.subr.bf16.mxu0 %v6130_v14  ;;  %v1712_v16 = vand.u32 4294901760, %v1711_v52  ;;  %4754 = vmatmul.mubr.f32.gmra.mrb[2].mxu0 %v8087_v33 }
  0x6d   : > { %v6149_v36 = vpack.c.bf16 %v8086_v28, %v8085_v48  ;;  %4878 = vmatmul.mubr.f32.gmra.mrb[10].mxu1 %v1702_v46  ;;  %v1721_v10 = vsub.f32 %v6136_v23, %v7973_v1  ;;  %4756 = vmatprep.mubr.f32.mxu0 %v8088_v24  ;;  %v8089_v48 = vld [vmem:[#allocation10_spill] sm:$0xff]  ;;  %v8092_v1 = vld [vmem:[#allocation19_spill] sm:$0xff] }
  0x6e   : > { %5055 = vmatprep.subr.bf16.mxu1 %v5054_v9  ;;  %v6159_v17 = vsub.f32 %v1516_v5, %v6152_v41  ;;  %v1519_v0 = vsel %vm318_vm0, %v315_v31, 0  ;;  %4880 = vmatprep.mubr.f32.mxu1 %v1712_v16  ;;  %v8090_v5 = vld [vmem:[#allocation17_spill] sm:$0xff] }
  0x6f   : > { %v6163_v7 = vand.u32 4294901760, %v1519_v0  ;;  %5057 = vmatpush3.bf16.msra.mxu1 %v5054_v9  ;;  %v1722_v51 = vand.u32 4294901760, %v1721_v10  ;;  %v8091_v9 = vld [vmem:[#allocation18_spill] sm:$0xff] }
  0x70   : > { %v7974_v52 = vand.u32 4294901760, %v6159_v17  ;;  %5059 = vmatprep.subr.bf16.mxu1 %v8089_v48  ;;  %4757 = vmatmul.mubr.f32.gmra.mrb[4].mxu0 %v8090_v5 }
  0x71   : > { %v6169_v28 = vsub.f32 %v1519_v0, %v6163_v7  ;;  %4881 = vmatmul.mubr.f32.gmra.mrb[12].mxu1 %v1722_v51  ;;  %4759 = vmatprep.mubr.f32.mxu0 %v8091_v9  ;;  %v8093_v51 = vld [vmem:[#allocation20_spill] sm:$0xff] }
  0x72   : > { %v1731_v31 = vsub.f32 %v6159_v17, %v7974_v52  ;;  %v8094_v52 = vld [vmem:[#allocation21_spill] sm:$0xff] }
  0x73   : > { %v7977_v46 = vand.u32 4294901760, %v6169_v28 }
  0x74   : > { %v1732_v16 = vand.u32 4294901760, %v1731_v31  ;;  %4760 = vmatmul.mubr.f32.gmra.mrb[6].mxu0 %v8092_v1  ;;  %v8096_v31 = vld [vmem:[#allocation25_spill] sm:$0xff] }
  0x75   : > { %v1741_v10 = vsub.f32 %v6169_v28, %v7977_v46  ;;  %4762 = vmatprep.mubr.f32.mxu0 %v8093_v51  ;;  %v8101_v46 = vand.u32 4294901760, %v8082_v18  ;;  %v8107_v18 = vand.u32 4294901760, %v8092_v1  ;;  %v8111_v1 = vand.u32 4294901760, %v8096_v31 }
  0x76   : > { %4883 = vmatprep.mubr.f32.mxu1 %v1732_v16  ;;  %v8097_v16 = vld [vmem:[#allocation27_spill] sm:$0xff] }
  0x77   : > { %v1742_v0 = vand.u32 4294901760, %v1741_v10  ;;  %v8098_v10 = vld [vmem:[#allocation8_spill] sm:$0xff] }
  0x78   : > { %4763 = vmatmul.mubr.f32.gmra.mrb[8].mxu0 %v8094_v52 }
  0x79   : > { %4884 = vmatmul.mubr.f32.gmra.mrb[14].mxu1 %v1742_v0  ;;  %4765 = vmatprep.mubr.f32.mxu0 %v8095_v45  ;;  %v8099_v0 = vld [vmem:[#allocation30_spill] sm:$0xff] }
  0x7a   : > { %4890 = vmatprep.mubr.f32.mxu1 %v5937_v49 }
  0x7c   : > { %4766 = vmatmul.mubr.f32.gmra.mrb[10].mxu0 %v8096_v31  ;;  %v8121_v31 = vld [vmem:[#allocation26_spill] sm:$0xff] }
  0x7d   : > { %4891 = vmatmul.mubr.f32.vlgmr.msra.gmra.mrb[0].mxu1 %v5939_v22  ;;  %4768 = vmatprep.mubr.f32.mxu0 %v8097_v16 }
  0x7e   : > { %4893 = vmatprep.mubr.f32.mxu1 %v5965_v12  ;;  %5061 = vmatpush3.bf16.msra.mxu1 %v8089_v48  ;;  %v8100_v48 = vand.u32 4294901760, %v8077_v3  ;;  %v8103_v3 = vand.u32 4294901760, %v8087_v33  ;;  %v8109_v33 = vand.u32 4294901760, %v8094_v52  ;;  %v8114_v52 = vand.u32 4294901760, %v5896_v6 }
  0x7f   : > { %5063 = vmatprep.subr.bf16.mxu1 %v8098_v10 }
  0x80   : > { %4769 = vmatmul.mubr.f32.gmra.mrb[12].mxu0 %v8099_v0 }
  0x81   : > { %4894 = vmatmul.mubr.f32.gmra.mrb[2].mxu1 %v5968_v15  ;;  %4771 = vmatprep.mubr.f32.mxu0 %v5896_v6  ;;  %v8117_v6 = vld [vmem:[#allocation22_spill] sm:$0xff] }
  0x82   : > { %4896 = vmatprep.mubr.f32.mxu1 %v5981_v13  ;;  %v8102_v13 = vand.u32 4294901760, %v8083_v59  ;;  %v8108_v59 = vand.u32 4294901760, %v8093_v51  ;;  %v8120_v51 = vld [vmem:[#allocation24_spill] sm:$0xff] }
  0x84   : > { %4772 = vmatmul.mubr.f32.gmra.mrb[14].mxu0 %v5911_v56 }
  0x85   : > { %4897 = vmatmul.mubr.f32.gmra.mrb[4].mxu1 %v5994_v25  ;;  %4778 = vmatprep.mubr.f32.mxu0 %v8100_v48  ;;  %v8104_v48 = vand.u32 4294901760, %v8088_v24  ;;  %v8110_v24 = vand.u32 4294901760, %v8095_v45  ;;  %v8113_v45 = vand.u32 4294901760, %v8099_v0  ;;  %v8124_v0 = vld [vmem:[#allocation28_spill] sm:$0xff] }
  0x86   : > { %4899 = vmatprep.mubr.f32.mxu1 %v6009_v19 }
  0x88   : > { %4779 = vmatmul.mubr.f32.vlgmr.msra.gmra.mrb[0].mxu0 %v8101_v46  ;;  %v8115_v46 = vand.u32 4294901760, %v5911_v56  ;;  %v8118_v56 = vand.u32 4294901760, %v5947_v21 }
  0x89   : > { %4900 = vmatmul.mubr.f32.gmra.mrb[6].mxu1 %v6029_v43  ;;  %5045 = vmatpush3.bf16.msra.mxu0 %v6130_v14  ;;  %v8105_v14 = vand.u32 4294901760, %v8090_v5  ;;  %v8112_v5 = vand.u32 4294901760, %v8097_v16  ;;  %v8123_v16 = vand.u32 4294901760, %v5992_v37 }
  0x8a   : > { %4902 = vmatprep.mubr.f32.mxu1 %v6061_v11  ;;  %4781 = vmatprep.mubr.f32.mxu0 %v8102_v13  ;;  %v8106_v13 = vand.u32 4294901760, %v8091_v9  ;;  %v8119_v9 = vand.u32 4294901760, %v5972_v20 }
  0x8b   : > { %5047 = vmatprep.subr.bf16.mxu0 %v5595_v8 }
  0x8c   : > { %4782 = vmatmul.mubr.f32.gmra.mrb[2].mxu0 %v8103_v3  ;;  %v8127_v3 = vand.u32 4294901760, %v6019_v53 }
  0x8d   : > { %4903 = vmatmul.mubr.f32.gmra.mrb[8].mxu1 %v6065_v61  ;;  %4784 = vmatprep.mubr.f32.mxu0 %v8104_v48 }
  0x8e   : > { %4905 = vmatprep.mubr.f32.mxu1 %v6086_v63 }
  0x90   : > { %4785 = vmatmul.mubr.f32.gmra.mrb[4].mxu0 %v8105_v14 }
  0x91   : > { %4906 = vmatmul.mubr.f32.gmra.mrb[10].mxu1 %v6099_v2  ;;  %4787 = vmatprep.mubr.f32.mxu0 %v8106_v13 }
  0x92   : > { %4908 = vmatprep.mubr.f32.mxu1 %v6102_v38 }
  0x94   : > { %4788 = vmatmul.mubr.f32.gmra.mrb[6].mxu0 %v8107_v18 }
  0x95   : > { %4909 = vmatmul.mubr.f32.gmra.mrb[12].mxu1 %v6123_v27  ;;  %4790 = vmatprep.mubr.f32.mxu0 %v8108_v59 }
  0x96   : > { %4911 = vmatprep.mubr.f32.mxu1 %v6152_v41 }
  0x98   : > { %4791 = vmatmul.mubr.f32.gmra.mrb[8].mxu0 %v8109_v33  ;;  %v7990_v33 = vmov 683565275  }
  0x99   : > { %4912 = vmatmul.mubr.f32.gmra.mrb[14].mxu1 %v6163_v7  ;;  %4793 = vmatprep.mubr.f32.mxu0 %v8110_v24 }
  0x9a   : > { %4918 = vmatprep.mubr.f32.mxu1 %v5944_v50 }
  0x9c   : > { %4794 = vmatmul.mubr.f32.gmra.mrb[10].mxu0 %v8111_v1 }
  0x9d   : > { %4919 = vmatmul.mubr.f32.vlgmr.msra.gmra.mrb[0].mxu1 %v5947_v21  ;;  %4796 = vmatprep.mubr.f32.mxu0 %v8112_v5  ;;  %v8125_v21 = vld [vmem:[#allocation31_spill] sm:$0xff] }
  0x9e   : > { %4921 = vmatprep.mubr.f32.mxu1 %v5972_v20  ;;  %5065 = vmatpush3.bf16.msra.mxu1 %v8098_v10  ;;  %v8126_v20 = vand.u32 4294901760, %v6006_v60 }
  0x9f   : > { %5067 = vmatprep.subr.bf16.mxu1 %v6149_v36 }
  0xa0   : > { %4797 = vmatmul.mubr.f32.gmra.mrb[12].mxu0 %v8113_v45 }
  0xa1   : > { %4922 = vmatmul.mubr.f32.gmra.mrb[2].mxu1 %v5979_v54  ;;  %4799 = vmatprep.mubr.f32.mxu0 %v8114_v52  ;;  %v7994_v52 = vmov 2475754826  }
  0xa2   : > { %4924 = vmatprep.mubr.f32.mxu1 %v5992_v37  ;;  %v8130_v37 = vand.u32 4294901760, %v6069_v58 }
  0xa4   : > { %4800 = vmatmul.mubr.f32.gmra.mrb[14].mxu0 %v8115_v46 }
  0xa5   : > { %4925 = vmatmul.mubr.f32.gmra.mrb[4].mxu1 %v6006_v60  ;;  %4806 = vmatprep.mubr.f32.mxu0 %v5658_v30  ;;  %v8131_v60 = vand.u32 4294901760, %v6075_v29 }
  0xa6   : > { %4927 = vmatprep.mubr.f32.mxu1 %v6019_v53  ;;  %v8132_v53 = vand.u32 4294901760, %v6097_v42 }
  0xa8   : > { %4807 = vmatmul.mubr.f32.vlgmr.msra.gmra.mrb[0].mxu0 %v5664_v34 }
  0xa9   : > { %4928 = vmatmul.mubr.f32.gmra.mrb[6].mxu1 %v6036_v44  ;;  %5049 = vmatpush3.bf16.msra.mxu0 %v5595_v8  ;;  %v8116_v8 = vand.u32 4294901760, %v5944_v50  ;;  %v8122_v50 = vand.u32 4294901760, %v5979_v54  ;;  %v8129_v54 = vand.u32 4294901760, %v6036_v44  ;;  %v8134_v44 = vand.u32 4294901760, %v6112_v32 }
  0xaa   : > { %4930 = vmatprep.mubr.f32.mxu1 %v6069_v58  ;;  %4809 = vmatprep.mubr.f32.mxu0 %v5667_v35 }
  0xac   : > { %4810 = vmatmul.mubr.f32.gmra.mrb[2].mxu0 %v5678_v40 }
  0xad   : > { %4931 = vmatmul.mubr.f32.gmra.mrb[8].mxu1 %v6075_v29  ;;  %4812 = vmatprep.mubr.f32.mxu0 %v5696_v47 }
  0xae   : > { %4933 = vmatprep.mubr.f32.mxu1 %v6097_v42 }
  0xb0   : > { %4813 = vmatmul.mubr.f32.gmra.mrb[4].mxu0 %v5714_v55 }
  0xb1   : > { %4934 = vmatmul.mubr.f32.gmra.mrb[10].mxu1 %v6106_v62  ;;  %4815 = vmatprep.mubr.f32.mxu0 %v5740_v4 }
  0xb2   : > { %4936 = vmatprep.mubr.f32.mxu1 %v6112_v32 }
  0xb4   : > { %4816 = vmatmul.mubr.f32.gmra.mrb[6].mxu0 %v5750_v26 }
  0xb5   : > { %4937 = vmatmul.mubr.f32.gmra.mrb[12].mxu1 %v6136_v23  ;;  %4818 = vmatprep.mubr.f32.mxu0 %v5773_v57 }
  0xb6   : > { %4939 = vmatprep.mubr.f32.mxu1 %v6159_v17 }
  0xb8   : > { %4819 = vmatmul.mubr.f32.gmra.mrb[8].mxu0 %v5782_v39 }
  0xb9   : > { %4940 = vmatmul.mubr.f32.gmra.mrb[14].mxu1 %v6169_v28  ;;  %4821 = vmatprep.mubr.f32.mxu0 %v8117_v6 }
  0xba   : > { %4946 = vmatprep.mubr.f32.mxu1 %v8116_v8  ;;  %v7986_v8 = vmov 2131351028  }
  0xbc   : > { %4822 = vmatmul.mubr.f32.gmra.mrb[10].mxu0 %v8120_v51 }
  0xbd   : > { %4947 = vmatmul.mubr.f32.vlgmr.msra.gmra.mrb[0].mxu1 %v8118_v56  ;;  %4824 = vmatprep.mubr.f32.mxu0 %v8121_v31  ;;  %v7984_v56 = vmov 2102212464  }
  0xbe   : > { %4949 = vmatprep.mubr.f32.mxu1 %v8119_v9  ;;  %5069 = vmatpush3.bf16.msra.mxu1 %v6149_v36  ;;  %v8128_v36 = vld [vmem:[#allocation32_spill] sm:$0xff] }
  0xbf   : > { %5071 = vmatprep.subr.bf16.mxu1 %v8098_v10 }
  0xc0   : > { %4825 = vmatmul.mubr.f32.gmra.mrb[12].mxu0 %v8124_v0 }
  0xc1   : > { %4950 = vmatmul.mubr.f32.gmra.mrb[2].mxu1 %v8122_v50  ;;  %4827 = vmatprep.mubr.f32.mxu0 %v8125_v21 }
  0xc2   : > { %4952 = vmatprep.mubr.f32.mxu1 %v8123_v16 }
  0xc4   : > { %4828 = vmatmul.mubr.f32.gmra.mrb[14].mxu0 %v8128_v36 }
  0xc5   : > { %4953 = vmatmul.mubr.f32.gmra.mrb[4].mxu1 %v8126_v20  ;;  %4834 = vmatprep.mubr.f32.mxu0 %v5658_v30  ;;  %v8133_v30 = vand.u32 4294901760, %v6106_v62 }
  0xc6   : > { %4955 = vmatprep.mubr.f32.mxu1 %v8127_v3  ;;  %v7992_v3 = vmov 1326507024  }
  0xc8   : > { %4835 = vmatmul.mubr.f32.vlgmr.msra.gmra.mrb[0].mxu0 %v5664_v34  ;;  %v8135_v34 = vand.u32 4294901760, %v6136_v23 }
  0xc9   : > { %4956 = vmatmul.mubr.f32.gmra.mrb[6].mxu1 %v8129_v54  ;;  %4837 = vmatprep.mubr.f32.mxu0 %v5667_v35  ;;  %v8136_v35 = vand.u32 4294901760, %v6159_v17 }
  0xca   : > { %4958 = vmatprep.mubr.f32.mxu1 %v8130_v37 }
  0xcc   : > { %4838 = vmatmul.mubr.f32.gmra.mrb[2].mxu0 %v5678_v40  ;;  %v8137_v40 = vand.u32 4294901760, %v6169_v28 }
  0xcd   : > { %4959 = vmatmul.mubr.f32.gmra.mrb[8].mxu1 %v8131_v60  ;;  %4840 = vmatprep.mubr.f32.mxu0 %v5696_v47  ;;  %v8138_v47 = vld [vmem:[#allocation33_spill] sm:$0xff] }
  0xce   : > { %4961 = vmatprep.mubr.f32.mxu1 %v8132_v53 }
  0xd0   : > { %4841 = vmatmul.mubr.f32.gmra.mrb[4].mxu0 %v5714_v55 }
  0xd1   : > { %4962 = vmatmul.mubr.f32.gmra.mrb[10].mxu1 %v8133_v30  ;;  %4843 = vmatprep.mubr.f32.mxu0 %v5740_v4 }
  0xd2   : > { %4964 = vmatprep.mubr.f32.mxu1 %v8134_v44 }
  0xd4   : > { %4844 = vmatmul.mubr.f32.gmra.mrb[6].mxu0 %v5750_v26 }
  0xd5   : > { %4965 = vmatmul.mubr.f32.gmra.mrb[12].mxu1 %v8135_v34  ;;  %4846 = vmatprep.mubr.f32.mxu0 %v5773_v57 }
  0xd6   : > { %4967 = vmatprep.mubr.f32.mxu1 %v8136_v35 }
  0xd8   : > { %4847 = vmatmul.mubr.f32.gmra.mrb[8].mxu0 %v5782_v39 }
  0xd9   : > { %4968 = vmatmul.mubr.f32.gmra.mrb[14].mxu1 %v8137_v40  ;;  %4849 = vmatprep.mubr.f32.mxu0 %v8117_v6 }
  0xda   : > { %4974 = vmatprep.mubr.f32.mxu1 %v5937_v49 }
  0xdc   : > { %4850 = vmatmul.mubr.f32.gmra.mrb[10].mxu0 %v8120_v51  ;;  %v8013_v51 = vmov 920167782  }
  0xdd   : > { %4975 = vmatmul.mubr.f32.vlgmr.msra.gmra.mrb[0].mxu1 %v5939_v22  ;;  %4852 = vmatprep.mubr.f32.mxu0 %v8121_v31 }
  0xde   : > { %4977 = vmatprep.mubr.f32.mxu1 %v5965_v12  ;;  %5073 = vmatpush3.bf16.msra.mxu1 %v8098_v10 }
  0xe0   : > { %4853 = vmatmul.mubr.f32.gmra.mrb[12].mxu0 %v8124_v0 }
  0xe1   : > { %4978 = vmatmul.mubr.f32.gmra.mrb[2].mxu1 %v5968_v15  ;;  %4855 = vmatprep.mubr.f32.mxu0 %v8125_v21 }
  0xe2   : > { %4980 = vmatprep.mubr.f32.mxu1 %v8138_v47 }
  0xe4   : > { %4856 = vmatmul.mubr.f32.gmra.mrb[14].mxu0 %v8128_v36 }
  0xe5   : > { %4981 = vmatmul.mubr.f32.gmra.mrb[4].mxu1 %v5994_v25 }
  0xe6   : > { %4983 = vmatprep.mubr.f32.mxu1 %v6009_v19 }
  0xe9   : > { %4984 = vmatmul.mubr.f32.gmra.mrb[6].mxu1 %v6029_v43 }
  0xea   : > { %4986 = vmatprep.mubr.f32.mxu1 %v6061_v11 }
  0xed   : > { %4987 = vmatmul.mubr.f32.gmra.mrb[8].mxu1 %v6065_v61 }
  0xee   : > { %4989 = vmatprep.mubr.f32.mxu1 %v6086_v63 }
  0xf1   : > { %4990 = vmatmul.mubr.f32.gmra.mrb[10].mxu1 %v6099_v2 }
  0xf2   : > { %4992 = vmatprep.mubr.f32.mxu1 %v6102_v38 }
  0xf5   : > { %4993 = vmatmul.mubr.f32.gmra.mrb[12].mxu1 %v6123_v27 }
  0xf6   : > { %4995 = vmatprep.mubr.f32.mxu1 %v6152_v41 }
  0xf9   : > { %4996 = vmatmul.mubr.f32.gmra.mrb[14].mxu1 %v6163_v7 }
  0xfa   : > { %5002 = vmatprep.mubr.f32.mxu1 %v5937_v49 }
  0xfd   : > { %5003 = vmatmul.mubr.f32.vlgmr.msra.gmra.mrb[0].mxu1 %v5939_v22 }
  0xfe   : > { %5005 = vmatprep.mubr.f32.mxu1 %v5965_v12 }
 0x101   : > { %5006 = vmatmul.mubr.f32.gmra.mrb[2].mxu1 %v5968_v15 }
 0x102   : > { %5008 = vmatprep.mubr.f32.mxu1 %v8138_v47 }
 0x105   : > { %5009 = vmatmul.mubr.f32.gmra.mrb[4].mxu1 %v5994_v25 }
 0x106   : > { %5011 = vmatprep.mubr.f32.mxu1 %v6009_v19 }
 0x109   : > { %5012 = vmatmul.mubr.f32.gmra.mrb[6].mxu1 %v6029_v43 }
 0x10a   : > { %5014 = vmatprep.mubr.f32.mxu1 %v6061_v11 }
 0x10d   : > { %5015 = vmatmul.mubr.f32.gmra.mrb[8].mxu1 %v6065_v61 }
 0x10e   : > { %5017 = vmatprep.mubr.f32.mxu1 %v6086_v63 }
 0x111   : > { %5018 = vmatmul.mubr.f32.gmra.mrb[10].mxu1 %v6099_v2 }
 0x112   : > { %5020 = vmatprep.mubr.f32.mxu1 %v6102_v38 }
 0x115   : > { %5021 = vmatmul.mubr.f32.gmra.mrb[12].mxu1 %v6123_v27 }
 0x116   : > { %5023 = vmatprep.mubr.f32.mxu1 %v6152_v41 }
 0x119   : > { %5024 = vmatmul.mubr.f32.gmra.mrb[14].mxu1 %v6163_v7 }
 0x19b   : > { %v6359_v55 = vpop.f32.mrb[0].mxu0 }
 0x19c   : > { %v2729_v4 = vand.u32 2147483647, %v6359_v55  ;;  %v2732_v26 = vand.u32 2139095040, %v6359_v55  ;;  %v6363_v57 = vpop.f32.mrb[1].mxu0 }
 0x19d   : > { %8139 = vst [vmem:[#allocation29_spill] sm:$0xff] %v6363_v57  ;;  %v2625_v39 = vand.u32 2147483647, %v6363_v57  ;;  %v2628_v49 = vand.u32 2139095040, %v6363_v57 }
 0x19e   : > { %v2733_v22 = vshrl.u32 %v2732_v26, 23  ;;  %v2736_v12 = vand.u32 8388607, %v2729_v4 }
 0x19f   : > { %v2629_v15 = vshrl.u32 %v2628_v49, 23  ;;  %v2632_v25 = vand.u32 8388607, %v2625_v39  ;;  %v6371_v19 = vpop.f32.mrb[2].mxu0 }
 0x1a0   : > { %8140 = vst [vmem:[#allocation11_spill] sm:$0xff] %v6371_v19  ;;  %v4408_v43 = vadd.s32 4294967169, %v2733_v22  ;;  %v6373_v11 = vpop.f32.mrb[3].mxu0  ;;  %v2940_v58 = vand.u32 2139095040, %v6371_v19  ;;  %v2737_v29 = vor.u32 8388608, %v2736_v12 }
 0x1a1   : > { %8141 = vst [vmem:[#allocation9_spill] sm:$0xff] %v6373_v11  ;;  %v4404_v61 = vadd.s32 4294967169, %v2629_v15  ;;  %v2633_v38 = vor.u32 8388608, %v2632_v25  ;;  %v2937_v42 = vand.u32 2147483647, %v6371_v19 }
 0x1a2   : > { %v2739_v23 = vadd.s32 1, %v4408_v43  ;;  %v2941_v2 = vshrl.u32 %v2940_v58, 23  ;;  %v6381_v10 = vshll.u32 %v2737_v29, 8 }
 0x1a3   : > { %v2635_v63 = vadd.s32 1, %v4404_v61  ;;  %v6377_v62 = vpop.f32.mrb[4].mxu0  ;;  %v6385_v14 = vshll.u32 %v2633_v38, 8  ;;  %v6389_v13 = vand.u32 8388607, %v2937_v42 }
 0x1a4   : > { %8142 = vst [vmem:[#allocation12_spill] sm:$0xff] %v6377_v62  ;;  %vm2740_vm1 = vcmp.gt.s32.totalorder %v2739_v23, 0  ;;  %v6379_v32 = vpop.f32.mrb[5].mxu0  ;;  %v4416_v27 = vadd.s32 4294967169, %v2941_v2 }
 0x1a5   : > { %8143 = vst [vmem:[#allocation5_spill] sm:$0xff] %v6379_v32  ;;  %v2741_v41 = vsel %vm2740_vm1, %v2739_v23, 0  ;;  %vm2636_vm2 = vcmp.gt.s32.totalorder %v2635_v63, 0 }
 0x1a6   : > { %v2742_v17 = vshrl.u32 %v2741_v41, 5  ;;  %v2743_v7 = vand.u32 31, %v2741_v41  ;;  %v2637_v28 = vsel %vm2636_vm2, %v2635_v63, 0  ;;  %v6394_v5 = vadd.s32 1, %v4416_v27 }
 0x1a7   : > { %v6383_v48 = vshrl.u32 %v2637_v28, 5  ;;  %v6391_v18 = vpop.f32.mrb[6].mxu0  ;;  %v2639_v1 = vand.u32 31, %v2637_v28 }
 0x1a8   : > { %8144 = vst [vmem:[#allocation6_spill] sm:$0xff] %v6391_v18  ;;  %v2744_v59 = vsub.s32 32, %v2743_v7  ;;  %v2746_v24 = vshll.u32 %v7990_v33, %v2743_v7  ;;  %v6396_v45 = vpop.f32.mrb[7].mxu0  ;;  %v2749_v46 = vshll.u32 %v7994_v52, %v2743_v7  ;;  %v2752_v6 = vshll.u32 %v7986_v8, %v2743_v7 }
 0x1a9   : > { %8145 = vst [vmem:[#allocation13_spill] sm:$0xff] %v6396_v45  ;;  %v2755_v9 = vshll.u32 %v7984_v56, %v2743_v7  ;;  %v2758_v31 = vshll.u32 %v8013_v51, %v2743_v7  ;;  %vm2761_vm3 = vcmp.lt.s32.totalorder %v2742_v17, 1  ;;  %vm2762_vm4 = vcmp.lt.s32.totalorder %v2742_v17, 2 }
 0x1aa   : > { %v2747_v50 = vshrl.u32 %v7994_v52, %v2744_v59  ;;  %v2750_v16 = vshrl.u32 %v7986_v8, %v2744_v59  ;;  %v2753_v0 = vshrl.u32 %v7984_v56, %v2744_v59  ;;  %v2745_v21 = vshrl.u32 %v7990_v33, %v2744_v59 }
 0x1ab   : > { %v2756_v20 = vshrl.u32 %v8013_v51, %v2744_v59  ;;  %v2759_v36 = vshrl.u32 %v7992_v3, %v2744_v59  ;;  %v2640_v53 = vsub.s32 32, %v2639_v1  ;;  %v6408_v30 = vpop.f32.mrb[8].mxu0  ;;  %vm2763_vm5 = vcmp.lt.s32.totalorder %v2742_v17, 3 }
 0x1ac   : > { %v2748_v54 = vor.u32 %v2747_v50, %v2746_v24  ;;  %v2751_v37 = vor.u32 %v2750_v16, %v2749_v46  ;;  %v2754_v60 = vor.u32 %v2753_v0, %v2752_v6  ;;  %8146 = vst [vmem:[#allocation14_spill] sm:$0xff] %v6408_v30  ;;  %vm2764_vm6 = vcmp.lt.s32.totalorder %v2742_v17, 4 }
 0x1ad   : > { %v2757_v44 = vor.u32 %v2756_v20, %v2755_v9  ;;  %v2760_v34 = vor.u32 %v2759_v36, %v2758_v31  ;;  %v2642_v15 = vshll.u32 %v7990_v33, %v2639_v1  ;;  %v2643_v61 = vshrl.u32 %v7994_v52, %v2640_v53 }
 0x1ae   : > { %v2765_v35 = vsel %vm2761_vm3, %v2745_v21, %v2748_v54  ;;  %v2766_v40 = vsel %vm2764_vm6, %v2754_v60, 2102212464  ;;  %v2769_v47 = vsel %vm2761_vm3, %v2748_v54, %v2751_v37  ;;  %v2773_v26 = vsel %vm2761_vm3, %v2751_v37, %v2754_v60 }
 0x1af   : > { %v2767_v49 = vsel %vm2763_vm5, %v2751_v37, %v2766_v40  ;;  %v2770_v22 = vsel %vm2764_vm6, %v2757_v44, 920167782  ;;  %v2774_v12 = vsel %vm2764_vm6, %v2760_v34, 1326507024  ;;  %v2645_v58 = vshll.u32 %v7994_v52, %v2639_v1 }
 0x1b0   : > { %v2771_v25 = vsel %vm2763_vm5, %v2754_v60, %v2770_v22  ;;  %v2775_v43 = vsel %vm2763_vm5, %v2757_v44, %v2774_v12  ;;  %v2768_v29 = vsel %vm2762_vm4, %v2765_v35, %v2767_v49  ;;  %v2646_v63 = vshrl.u32 %v7986_v8, %v2640_v53 }
 0x1b1   : > { %v2772_v23 = vsel %vm2762_vm4, %v2769_v47, %v2771_v25  ;;  %v2776_v38 = vsel %vm2762_vm4, %v2773_v26, %v2775_v43  ;;  %v2644_v28 = vor.u32 %v2643_v61, %v2642_v15  ;;  %v2648_v24 = vshll.u32 %v7986_v8, %v2639_v1 }
 0x1b2   : > { %v6421_v2 = vmul.u32.u64.low %v6381_v10, %v2776_v38  ;;  %v6422_v41 = vmul.u32.u64.high %v6381_v10, %v2776_v38, %v6421_v2  ;;  %v6425_v27 = vmul.u32.u64.low %v6381_v10, %v2772_v23  ;;  %v6426_v7 = vmul.u32.u64.high %v6381_v10, %v2772_v23, %v6425_v27 }
 0x1b3   : > { %v2647_v59 = vor.u32 %v2646_v63, %v2645_v58  ;;  %v2649_v46 = vshrl.u32 %v7984_v56, %v2640_v53  ;;  %v2641_v17 = vshrl.u32 %v7990_v33, %v2640_v53  ;;  %v2651_v6 = vshll.u32 %v7984_v56, %v2639_v1  ;;  %v6465_v63 = vpop.f32.mrb[9].mxu0 }
 0x1b4   : > { %v2652_v9 = vshrl.u32 %v8013_v51, %v2640_v53  ;;  %v2655_v31 = vshrl.u32 %v7992_v3, %v2640_v53  ;;  %v2784_v50 = vmul.u32 %v6381_v10, %v2768_v29  ;;  %v2654_v0 = vshll.u32 %v8013_v51, %v2639_v1  ;;  %8147 = vst [vmem:[#allocation7_spill] sm:$0xff] %v6465_v63 }
 0x1b5   : > { %v2650_v16 = vor.u32 %v2649_v46, %v2648_v24  ;;  %vm2657_vm7 = vcmp.lt.s32.totalorder %v6383_v48, 1  ;;  %vm2786_vm8 = vc.u32 %v6422_v41, %v6425_v27  ;;  %v2787_v21 = vadd.s32 1, %v6426_v7 }
 0x1b6   : > { %v2653_v20 = vor.u32 %v2652_v9, %v2651_v6  ;;  %vm2658_vm9 = vcmp.lt.s32.totalorder %v6383_v48, 2  ;;  %v2656_v36 = vor.u32 %v2655_v31, %v2654_v0  ;;  %vm2659_vm10 = vcmp.lt.s32.totalorder %v6383_v48, 3 }
 0x1b7   : > { %vm2660_vm11 = vcmp.lt.s32.totalorder %v6383_v48, 4  ;;  %v2665_v54 = vsel %vm2657_vm7, %v2644_v28, %v2647_v59  ;;  %v2788_v10 = vsel %vm2786_vm8, %v2787_v21, %v6426_v7  ;;  %v2669_v60 = vsel %vm2657_vm7, %v2647_v59, %v2650_v16 }
 0x1b8   : > { %v2662_v37 = vsel %vm2660_vm11, %v2650_v16, 2102212464  ;;  %v2666_v1 = vsel %vm2660_vm11, %v2653_v20, 920167782  ;;  %v2789_v53 = vadd.s32 %v2788_v10, %v2784_v50  ;;  %v2661_v44 = vsel %vm2657_vm7, %v2641_v17, %v2644_v28 }
 0x1b9   : > { %v2667_v34 = vsel %vm2659_vm10, %v2650_v16, %v2666_v1  ;;  %v2670_v35 = vsel %vm2660_vm11, %v2656_v36, 1326507024  ;;  %v2663_v40 = vsel %vm2659_vm10, %v2647_v59, %v2662_v37  ;;  %vm2948_vm12 = vcmp.gt.s32.totalorder %v6394_v5, 0 }
 0x1ba   : > { %v2668_v47 = vsel %vm2658_vm9, %v2665_v54, %v2667_v34  ;;  %v2671_v26 = vsel %vm2659_vm10, %v2653_v20, %v2670_v35  ;;  %v2790_v49 = vadd.s32 536870912, %v2789_v53  ;;  %v2949_v61 = vsel %vm2948_vm12, %v6394_v5, 0 }
 0x1bb   : > { %v2672_v22 = vsel %vm2658_vm9, %v2669_v60, %v2671_v26  ;;  %v6451_v12 = vmul.u32.u64.low %v6385_v14, %v2668_v47  ;;  %v6452_v15 = vmul.u32.u64.high %v6385_v14, %v2668_v47, %v6451_v12  ;;  %v2836_v58 = vand.u32 2139095040, %v6373_v11 }
 0x1bc   : > { %v6456_v25 = vmul.u32.u64.low %v6385_v14, %v2672_v22  ;;  %v6457_v43 = vmul.u32.u64.high %v6385_v14, %v2672_v22, %v6456_v25  ;;  %v6461_v29 = vshrl.u32 %v2790_v49, 30  ;;  %v2664_v23 = vsel %vm2658_vm9, %v2661_v44, %v2663_v40 }
 0x1bd   : > { %v2951_v38 = vand.u32 31, %v2949_v61  ;;  %v2683_v7 = vadd.s32 1, %v6452_v15  ;;  %v2680_v59 = vmul.u32 %v6385_v14, %v2664_v23  ;;  %v2945_v5 = vor.u32 8388608, %v6389_v13 }
 0x1be   : > { %v2792_v2 = vshll.u32 %v6461_v29, 30  ;;  %vm2682_vm13 = vc.u32 %v6457_v43, %v6451_v12  ;;  %v2837_v24 = vshrl.u32 %v2836_v58, 23  ;;  %v2950_v17 = vshrl.u32 %v2949_v61, 5 }
 0x1bf   : > { %v2952_v28 = vsub.s32 32, %v2951_v38  ;;  %v2684_v48 = vsel %vm2682_vm13, %v2683_v7, %v6452_v15  ;;  %v2954_v6 = vshll.u32 %v7990_v33, %v2951_v38  ;;  %v2957_v50 = vshll.u32 %v7994_v52, %v2951_v38 }
 0x1c0   : > { %v6473_v46 = vsub.s32 %v2789_v53, %v2792_v2  ;;  %v2685_v9 = vadd.s32 %v2684_v48, %v2680_v59  ;;  %v2963_v13 = vshll.u32 %v7984_v56, %v2951_v38  ;;  %v2960_v10 = vshll.u32 %v7986_v8, %v2951_v38 }
 0x1c1   : > { %v2955_v31 = vshrl.u32 %v7994_v52, %v2952_v28  ;;  %v2958_v14 = vshrl.u32 %v7986_v8, %v2952_v28  ;;  %v2961_v0 = vshrl.u32 %v7984_v56, %v2952_v28  ;;  %v2964_v21 = vshrl.u32 %v8013_v51, %v2952_v28 }
 0x1c2   : > { %v2795_v16 = vsub.s32 0, %v6473_v46  ;;  %v2686_v20 = vadd.s32 536870912, %v2685_v9  ;;  %v2966_v60 = vshll.u32 %v8013_v51, %v2951_v38  ;;  %v2967_v53 = vshrl.u32 %v7992_v3, %v2952_v28 }
 0x1c3   : > { %v2956_v36 = vor.u32 %v2955_v31, %v2954_v6  ;;  %v2959_v54 = vor.u32 %v2958_v14, %v2957_v50  ;;  %v2965_v1 = vor.u32 %v2964_v21, %v2963_v13  ;;  %v2962_v34 = vor.u32 %v2961_v0, %v2960_v10 }
 0x1c4   : > { %v4409_v37 = vmin.u32 %v2795_v16, %v6473_v46  ;;  %v6488_v44 = vshrl.u32 %v2686_v20, 30  ;;  %v7982_v35 = vand.u32 2147483647, %v6373_v11  ;;  %v2968_v47 = vor.u32 %v2967_v53, %v2966_v60 }
 0x1c5   : > { %vm2969_vm14 = vcmp.lt.s32.totalorder %v2950_v17, 1  ;;  %v2985_v26 = vshll.u32 %v2945_v5, 8  ;;  %vm2972_vm15 = vcmp.lt.s32.totalorder %v2950_v17, 4  ;;  %v4412_v15 = vadd.s32 4294967169, %v2837_v24 }
 0x1c6   : > { %v2797_v40 = vclz %v4409_v37  ;;  %v2688_v49 = vshll.u32 %v6488_v44, 30  ;;  %v2977_v22 = vsel %vm2969_vm14, %v2956_v36, %v2959_v54  ;;  %vm2970_vm0 = vcmp.lt.s32.totalorder %v2950_v17, 2 }
 0x1c7   : > { %vm2971_vm1 = vcmp.lt.s32.totalorder %v2950_v17, 3  ;;  %v2978_v61 = vsel %vm2972_vm15, %v2965_v1, 920167782  ;;  %v2974_v23 = vsel %vm2972_vm15, %v2962_v34, 2102212464  ;;  %v2981_v2 = vsel %vm2969_vm14, %v2959_v54, %v2962_v34 }
 0x1c8   : > { %v4410_v25 = vadd.s32 4294967294, %v2797_v40  ;;  %v6493_v58 = vsub.s32 %v2685_v9, %v2688_v49  ;;  %v2979_v38 = vsel %vm2971_vm1, %v2962_v34, %v2978_v61  ;;  %v2953_v7 = vshrl.u32 %v7990_v33, %v2952_v28  ;;  %v6520_v61 = vpop.f32.mrb[10].mxu0 }
 0x1c9   : > { %v2980_v59 = vsel %vm2970_vm0, %v2977_v22, %v2979_v38  ;;  %v2982_v5 = vsel %vm2972_vm15, %v2968_v47, 1326507024  ;;  %v2843_v31 = vadd.s32 1, %v4412_v15  ;;  %v2975_v14 = vsel %vm2971_vm1, %v2959_v54, %v2974_v23 }
 0x1ca   : > { %vm4411_vm2 = vcmp.lt.s32.totalorder %v4410_v25, 0  ;;  %v2691_v24 = vsub.s32 0, %v6493_v58  ;;  %v2983_v6 = vsel %vm2971_vm1, %v2965_v1, %v2982_v5  ;;  %v2973_v9 = vsel %vm2969_vm14, %v2953_v7, %v2956_v36 }
 0x1cb   : > { %v2800_v48 = vsel %vm4411_vm2, 0, %v4410_v25  ;;  %v2984_v16 = vsel %vm2970_vm0, %v2981_v2, %v2983_v6  ;;  %vm2844_vm3 = vcmp.gt.s32.totalorder %v2843_v31, 0  ;;  %v2785_v36 = vadd.s32 %v6425_v27, %v6422_v41 }
 0x1cc   : > { %v2805_v50 = vsub.s32 4294967266, %v2800_v48  ;;  %v4405_v0 = vmin.u32 %v2691_v24, %v6493_v58  ;;  %v6505_v13 = vmul.u32.u64.low %v2985_v26, %v2984_v16  ;;  %v6506_v28 = vmul.u32.u64.high %v2985_v26, %v2984_v16, %v6505_v13 }
 0x1cd   : > { %v2801_v21 = vsub.s32 32, %v2800_v48  ;;  %v6508_v10 = vmul.u32.u64.low %v2985_v26, %v2980_v59  ;;  %v6509_v37 = vmul.u32.u64.high %v2985_v26, %v2980_v59, %v6508_v10  ;;  %v2845_v60 = vsel %vm2844_vm3, %v2843_v31, 0 }
 0x1ce   : > { %v2806_v20 = vadd.s32 127, %v2805_v50  ;;  %v2693_v1 = vclz %v4405_v0  ;;  %v2976_v54 = vsel %vm2970_vm0, %v2973_v9, %v2975_v14  ;;  %v2847_v53 = vand.u32 31, %v2845_v60 }
 0x1cf   : > { %vm2994_vm4 = vc.u32 %v6506_v28, %v6508_v10  ;;  %v2803_v47 = vshrl.u32 %v2785_v36, %v2801_v21  ;;  %v2995_v49 = vadd.s32 1, %v6509_v37  ;;  %v2840_v22 = vand.u32 8388607, %v7982_v35 }
 0x1d0   : > { %v2807_v34 = vshll.u32 %v2806_v20, 23  ;;  %v4406_v40 = vadd.s32 4294967294, %v2693_v1  ;;  %v2992_v15 = vmul.u32 %v2985_v26, %v2976_v54  ;;  %v2848_v25 = vsub.s32 32, %v2847_v53 }
 0x1d1   : > { %v2802_v41 = vshll.u32 %v6473_v46, %v2800_v48  ;;  %v2996_v17 = vsel %vm2994_vm4, %v2995_v49, %v6509_v37  ;;  %v2681_v59 = vadd.s32 %v6451_v12, %v6457_v43  ;;  %v2841_v5 = vor.u32 8388608, %v2840_v22 }
 0x1d2   : > { %vm4407_vm5 = vcmp.lt.s32.totalorder %v4406_v40, 0  ;;  %v2808_v23 = vor.u32 4788187, %v2807_v34  ;;  %v2997_v2 = vadd.s32 %v2996_v17, %v2992_v15  ;;  %v3148_v24 = vand.u32 2139095040, %v6377_v62 }
 0x1d3   : > { %v2696_v27 = vsel %vm4407_vm5, 0, %v4406_v40  ;;  %v2804_v7 = vor.u32 %v2803_v47, %v2802_v41  ;;  %v2851_v31 = vshrl.u32 %v7994_v52, %v2848_v25  ;;  %v2854_v50 = vshrl.u32 %v7986_v8, %v2848_v25 }
 0x1d4   : > { %v2701_v38 = vsub.s32 4294967266, %v2696_v27  ;;  %v2998_v26 = vadd.s32 536870912, %v2997_v2  ;;  %v2846_v46 = vshrl.u32 %v2845_v60, 5  ;;  %v2850_v48 = vshll.u32 %v7990_v33, %v2847_v53 }
 0x1d5   : > { %v2853_v9 = vshll.u32 %v7994_v52, %v2847_v53  ;;  %v2857_v14 = vshrl.u32 %v7984_v56, %v2848_v25  ;;  %v2809_v16 = vand.u32 2147483647, %v2808_v23  ;;  %v2856_v12 = vshll.u32 %v7986_v8, %v2847_v53 }
 0x1d6   : > { %v2702_v6 = vadd.s32 127, %v2701_v38  ;;  %v6532_v0 = vshrl.u32 %v2998_v26, 30  ;;  %v2860_v43 = vshrl.u32 %v8013_v51, %v2848_v25  ;;  %v2697_v13 = vsub.s32 32, %v2696_v27 }
 0x1d7   : > { %v2859_v21 = vshll.u32 %v7984_v56, %v2847_v53  ;;  %v2862_v20 = vshll.u32 %v8013_v51, %v2847_v53  ;;  %v2863_v37 = vshrl.u32 %v7992_v3, %v2848_v25  ;;  %v2852_v36 = vor.u32 %v2851_v31, %v2850_v48 }
 0x1d8   : > { %v2703_v1 = vshll.u32 %v2702_v6, 23  ;;  %v3000_v60 = vshll.u32 %v6532_v0, 30  ;;  %v2855_v54 = vor.u32 %v2854_v50, %v2853_v9  ;;  %v2811_v34 = vcvt.s32.f32 %v2804_v7 }
 0x1d9   : > { %v2858_v40 = vor.u32 %v2857_v14, %v2856_v12  ;;  %v2861_v47 = vor.u32 %v2860_v43, %v2859_v21  ;;  %v2864_v49 = vor.u32 %v2863_v37, %v2862_v20  ;;  %v2849_v15 = vshrl.u32 %v7990_v33, %v2848_v25 }
 0x1da   : > { %v6540_v22 = vsub.s32 %v2997_v2, %v3000_v60  ;;  %v2881_v41 = vshll.u32 %v2841_v5, 8  ;;  %v3149_v17 = vshrl.u32 %v3148_v24, 23  ;;  %v2812_v23 = vmul.f32 %v2811_v34, %v2809_v16 }
 0x1db   : > { %v2698_v53 = vshll.u32 %v6493_v58, %v2696_v27  ;;  %v2699_v38 = vshrl.u32 %v2681_v59, %v2697_v13  ;;  %vm2865_vm6 = vcmp.lt.s32.totalorder %v2846_v46, 1  ;;  %v2704_v6 = vor.u32 4788187, %v2703_v1 }
 0x1dc   : > { %v3003_v26 = vsub.s32 0, %v6540_v22  ;;  %vm2868_vm7 = vcmp.lt.s32.totalorder %v2846_v46, 4  ;;  %v2873_v7 = vsel %vm2865_vm6, %v2852_v36, %v2855_v54  ;;  %vm2867_vm8 = vcmp.lt.s32.totalorder %v2846_v46, 3 }
 0x1dd   : > { %v2874_v31 = vsel %vm2868_vm7, %v2861_v47, 920167782  ;;  %v2877_v2 = vsel %vm2865_vm6, %v2855_v54, %v2858_v40  ;;  %v2878_v50 = vsel %vm2868_vm7, %v2864_v49, 1326507024  ;;  %vm2866_vm9 = vcmp.lt.s32.totalorder %v2846_v46, 2 }
 0x1de   : > { %v4417_v25 = vmin.u32 %v3003_v26, %v6540_v22  ;;  %v2870_v5 = vsel %vm2868_vm7, %v2858_v40, 2102212464  ;;  %v2875_v24 = vsel %vm2867_vm8, %v2858_v40, %v2874_v31  ;;  %v2700_v58 = vor.u32 %v2699_v38, %v2698_v53  ;;  %v6569_v53 = vpop.f32.mrb[11].mxu0 }
 0x1df   : > { %v2876_v27 = vsel %vm2866_vm9, %v2873_v7, %v2875_v24  ;;  %v2879_v59 = vsel %vm2867_vm8, %v2861_v47, %v2878_v50  ;;  %v4424_v48 = vadd.s32 4294967169, %v3149_v17  ;;  %v2705_v9 = vand.u32 2147483647, %v2704_v6  ;;  %8148 = vst [vmem:[#allocation15_spill] sm:$0xff] %v6569_v53 }
 0x1e0   : > { %v3005_v14 = vclz %v4417_v25  ;;  %v2869_v16 = vsel %vm2865_vm6, %v2849_v15, %v2852_v36  ;;  %v2880_v12 = vsel %vm2866_vm9, %v2877_v2, %v2879_v59  ;;  %v2871_v43 = vsel %vm2867_vm8, %v2855_v54, %v2870_v5 }
 0x1e1   : > { %v6554_v13 = vmul.u32.u64.low %v2881_v41, %v2880_v12  ;;  %v6555_v21 = vmul.u32.u64.high %v2881_v41, %v2880_v12, %v6554_v13  ;;  %v3155_v20 = vadd.s32 1, %v4424_v48  ;;  %v2707_v60 = vcvt.s32.f32 %v2700_v58 }
 0x1e2   : > { %v6557_v37 = vmul.u32.u64.low %v2881_v41, %v2876_v27  ;;  %v6558_v1 = vmul.u32.u64.high %v2881_v41, %v2876_v27, %v6557_v37  ;;  %v4418_v34 = vadd.s32 4294967294, %v3005_v14  ;;  %v2815_v40 = vsub.s32 4, %v6461_v29 }
 0x1e3   : > { %vm3156_vm10 = vcmp.gt.s32.totalorder %v3155_v20, 0  ;;  %v2872_v47 = vsel %vm2866_vm9, %v2869_v16, %v2871_v43  ;;  %v2813_v49 = vxor.u32 2147483648, %v2812_v23  ;;  %v6563_v15 = vmul.f32 %v2707_v60, %v2705_v9 }
 0x1e4   : > { %v3157_v36 = vsel %vm3156_vm10, %v3155_v20, 0  ;;  %vm2890_vm11 = vc.u32 %v6555_v21, %v6557_v37  ;;  %v2891_v54 = vadd.s32 1, %v6558_v1  ;;  %v7981_v17 = vand.u32 2147483647, %v6377_v62 }
 0x1e5   : > { %vm2731_vm12 = vcmp.lt.s32.totalorder %v6359_v55, 0  ;;  %vm4419_vm13 = vcmp.lt.s32.totalorder %v4418_v34, 0  ;;  %v2888_v38 = vmul.u32 %v2881_v41, %v2872_v47  ;;  %v3159_v6 = vand.u32 31, %v3157_v36 }
 0x1e6   : > { %v6573_v46 = vsel %vm2731_vm12, %v2815_v40, %v6461_v29  ;;  %v2711_v26 = vsub.s32 4, %v6488_v44  ;;  %v2993_v7 = vadd.s32 %v6508_v10, %v6506_v28  ;;  %v2892_v31 = vsel %vm2890_vm11, %v2891_v54, %v6558_v1 }
 0x1e7   : > { %v2814_v2 = vsel %vm2731_vm12, %v2813_v49, %v2812_v23  ;;  %v2709_v50 = vxor.u32 2147483648, %v6563_v15  ;;  %v2893_v25 = vadd.s32 %v2892_v31, %v2888_v38  ;;  %v3160_v5 = vsub.s32 32, %v3159_v6 }
 0x1e8   : > { %v3008_v24 = vsel %vm4419_vm13, 0, %v4418_v34  ;;  %v3152_v41 = vand.u32 8388607, %v7981_v17  ;;  %v6582_v58 = vshrl.u32 %v3157_v36, 5  ;;  %v3162_v29 = vshll.u32 %v7990_v33, %v3159_v6 }
 0x1e9   : > { %v2894_v27 = vadd.s32 536870912, %v2893_v25  ;;  %v3163_v59 = vshrl.u32 %v7994_v52, %v3160_v5  ;;  %v3165_v28 = vshll.u32 %v7994_v52, %v3159_v6  ;;  %v3166_v10 = vshrl.u32 %v7986_v8, %v3160_v5 }
 0x1ea   : > { %v3168_v23 = vshll.u32 %v7986_v8, %v3159_v6  ;;  %v3169_v48 = vshrl.u32 %v7984_v56, %v3160_v5  ;;  %v3171_v9 = vshll.u32 %v7984_v56, %v3159_v6  ;;  %v3172_v14 = vshrl.u32 %v8013_v51, %v3160_v5 }
 0x1eb   : > { %v3013_v16 = vsub.s32 4294967266, %v3008_v24  ;;  %v6592_v12 = vshrl.u32 %v2894_v27, 30  ;;  %v3164_v43 = vor.u32 %v3163_v59, %v3162_v29  ;;  %v3167_v13 = vor.u32 %v3166_v10, %v3165_v28 }
 0x1ec   : > { %v3170_v20 = vor.u32 %v3169_v48, %v3168_v23  ;;  %v3173_v1 = vor.u32 %v3172_v14, %v3171_v9  ;;  %v3174_v60 = vshll.u32 %v8013_v51, %v3159_v6  ;;  %v3175_v34 = vshrl.u32 %v7992_v3, %v3160_v5 }
 0x1ed   : > { %vm6598_vm14 = vcmp.le.f32.partialorder %v2729_v4, 0.7853982  ;;  %vm2627_vm15 = vcmp.lt.s32.totalorder %v6363_v57, 0  ;;  %v2896_v47 = vshll.u32 %v6592_v12, 30  ;;  %v3153_v36 = vor.u32 8388608, %v3152_v41 }
 0x1ee   : > { %vm3180_vm0 = vcmp.lt.s32.totalorder %v6582_v58, 4  ;;  %v3044_v49 = vand.u32 2139095040, %v6379_v32  ;;  %v3176_v54 = vor.u32 %v3175_v34, %v3174_v60  ;;  %vm3177_vm1 = vcmp.lt.s32.totalorder %v6582_v58, 1 }
 0x1ef   : > { %vm3179_vm2 = vcmp.lt.s32.totalorder %v6582_v58, 3  ;;  %v3186_v4 = vsel %vm3180_vm0, %v3173_v1, 920167782  ;;  %v3009_v38 = vsub.s32 32, %v3008_v24  ;;  %v6610_v6 = vsub.s32 %v2893_v25, %v2896_v47 }
 0x1f0   : > { %v3185_v31 = vsel %vm3177_vm1, %v3164_v43, %v3167_v13  ;;  %v3187_v41 = vsel %vm3179_vm2, %v3170_v20, %v3186_v4  ;;  %v3014_v29 = vadd.s32 127, %v3013_v16  ;;  %vm3178_vm3 = vcmp.lt.s32.totalorder %v6582_v58, 2 }
 0x1f1   : > { %v3189_v27 = vsel %vm3177_vm1, %v3167_v13, %v3170_v20  ;;  %v7980_v59 = vand.u32 2147483647, %v6379_v32  ;;  %v2899_v28 = vsub.s32 0, %v6610_v6  ;;  %v3161_v10 = vshrl.u32 %v7990_v33, %v3160_v5 }
 0x1f2   : > { %v3182_v25 = vsel %vm3180_vm0, %v3170_v20, 2102212464  ;;  %v3190_v23 = vsel %vm3180_vm0, %v3176_v54, 1326507024  ;;  %v3188_v48 = vsel %vm3178_vm3, %v3185_v31, %v3187_v41  ;;  %v3193_v14 = vshll.u32 %v3153_v36, 8 }
 0x1f3   : > { %v3191_v9 = vsel %vm3179_vm2, %v3173_v1, %v3190_v23  ;;  %v3045_v16 = vshrl.u32 %v3044_v49, 23  ;;  %v3011_v60 = vshrl.u32 %v2993_v7, %v3009_v38  ;;  %v4413_v34 = vmin.u32 %v2899_v28, %v6610_v6 }
 0x1f4   : > { %v3181_v5 = vsel %vm3177_vm1, %v3161_v10, %v3164_v43  ;;  %v3192_v20 = vsel %vm3178_vm3, %v3189_v27, %v3191_v9  ;;  %v3183_v47 = vsel %vm3179_vm2, %v3167_v13, %v3182_v25  ;;  %v3010_v1 = vshll.u32 %v6540_v22, %v3008_v24 }
 0x1f5   : > { %v6637_v54 = vmul.u32.u64.low %v3193_v14, %v3192_v20  ;;  %v6638_v4 = vmul.u32.u64.high %v3193_v14, %v3192_v20, %v6637_v54  ;;  %v4420_v31 = vadd.s32 4294967169, %v3045_v16  ;;  %v2901_v36 = vclz %v4413_v34 }
 0x1f6   : > { %v6641_v49 = vmul.u32.u64.low %v3193_v14, %v3188_v48  ;;  %v6642_v7 = vmul.u32.u64.high %v3193_v14, %v3188_v48, %v6641_v49  ;;  %v6648_v43 = vsel %vm6598_vm14, %v6359_v55, %v2814_v2  ;;  %v6655_v13 = vsel %vm2627_vm15, %v2711_v26, %v6488_v44  ;;  %v6673_v26 = vpop.f32.mrb[12].mxu0 }
 0x1f7   : > { %v3015_v38 = vshll.u32 %v3014_v29, 23  ;;  %v3051_v41 = vadd.s32 1, %v4420_v31  ;;  %v6657_v22 = vor.u32 %v3011_v60, %v3010_v1  ;;  %v3023_v24 = vsub.s32 4, %v6532_v0 }
 0x1f8   : > { %v4414_v27 = vadd.s32 4294967294, %v2901_v36  ;;  %v3184_v28 = vsel %vm3178_vm3, %v3181_v5, %v3183_v47  ;;  %v6667_v2 = vsel %vm2627_vm15, %v2709_v50, %v6563_v15  ;;  %vm3202_vm4 = vc.u32 %v6638_v4, %v6641_v49 }
 0x1f9   : > { %v3048_v44 = vand.u32 8388607, %v7980_v59  ;;  %vm3052_vm5 = vcmp.gt.s32.totalorder %v3051_v41, 0  ;;  %v2889_v58 = vadd.s32 %v6557_v37, %v6555_v21  ;;  %v3203_v29 = vadd.s32 1, %v6642_v7 }
 0x1fa   : > { %vm4415_vm6 = vcmp.lt.s32.totalorder %v4414_v27, 0  ;;  %v3053_v10 = vsel %vm3052_vm5, %v3051_v41, 0  ;;  %v3016_v25 = vor.u32 4788187, %v3015_v38  ;;  %v3200_v15 = vmul.u32 %v3193_v14, %v3184_v28 }
 0x1fb   : > { %v2904_v23 = vsel %vm4415_vm6, 0, %v4414_v27  ;;  %v3055_v50 = vand.u32 31, %v3053_v10  ;;  %v3019_v48 = vcvt.s32.f32 %v6657_v22  ;;  %v3204_v60 = vsel %vm3202_vm4, %v3203_v29, %v6642_v7 }
 0x1fc   : > { %v2905_v9 = vsub.s32 32, %v2904_v23  ;;  %v2909_v16 = vsub.s32 4294967266, %v2904_v23  ;;  %v3205_v34 = vadd.s32 %v3204_v60, %v3200_v15  ;;  %v3049_v5 = vor.u32 8388608, %v3048_v44 }
 0x1fd   : > { %v3056_v20 = vsub.s32 32, %v3055_v50  ;;  %v3356_v47 = vand.u32 2139095040, %v6391_v18  ;;  %v3058_v54 = vshll.u32 %v7990_v33, %v3055_v50  ;;  %v3061_v31 = vshll.u32 %v7994_v52, %v3055_v50 }
 0x1fe   : > { %v2907_v21 = vshrl.u32 %v2889_v58, %v2905_v9  ;;  %v2910_v37 = vadd.s32 127, %v2909_v16  ;;  %v3206_v1 = vadd.s32 536870912, %v3205_v34  ;;  %v3064_v38 = vshll.u32 %v7986_v8, %v3055_v50 }
 0x1ff   : > { %v3059_v14 = vshrl.u32 %v7994_v52, %v3056_v20  ;;  %v3062_v36 = vshrl.u32 %v7986_v8, %v3056_v20  ;;  %v3065_v7 = vshrl.u32 %v7984_v56, %v3056_v20  ;;  %v3067_v22 = vshll.u32 %v7984_v56, %v3055_v50 }
 0x200   : > { %v2911_v41 = vshll.u32 %v2910_v37, 23  ;;  %v3068_v27 = vshrl.u32 %v8013_v51, %v3056_v20  ;;  %v3017_v28 = vand.u32 2147483647, %v3016_v25  ;;  %v2906_v44 = vshll.u32 %v6610_v6, %v2904_v23 }
 0x201   : > { %v6690_v58 = vshrl.u32 %v3206_v1, 30  ;;  %v3054_v29 = vshrl.u32 %v3053_v10, 5  ;;  %v3060_v15 = vor.u32 %v3059_v14, %v3058_v54  ;;  %v3063_v9 = vor.u32 %v3062_v36, %v3061_v31 }
 0x202   : > { %v3066_v16 = vor.u32 %v3065_v7, %v3064_v38  ;;  %v3069_v60 = vor.u32 %v3068_v27, %v3067_v22  ;;  %v3070_v37 = vshll.u32 %v8013_v51, %v3055_v50  ;;  %v3071_v17 = vshrl.u32 %v7992_v3, %v3056_v20 }
 0x203   : > { %v3208_v59 = vshll.u32 %v6690_v58, 30  ;;  %v3089_v35 = vshll.u32 %v3049_v5, 8  ;;  %vm6697_vm7 = vcmp.le.f32.partialorder %v2625_v39, 0.7853982  ;;  %vm2939_vm8 = vcmp.lt.s32.totalorder %v6371_v19, 0 }
 0x204   : > { %v2908_v6 = vor.u32 %v2907_v21, %v2906_v44  ;;  %v2912_v10 = vor.u32 4788187, %v2911_v41  ;;  %v3057_v23 = vshrl.u32 %v7990_v33, %v3056_v20  ;;  %v3357_v54 = vshrl.u32 %v3356_v47, 23 }
 0x205   : > { %v6703_v31 = vsub.s32 %v3205_v34, %v3208_v59  ;;  %v3072_v1 = vor.u32 %v3071_v17, %v3070_v37  ;;  %vm3073_vm9 = vcmp.lt.s32.totalorder %v3054_v29, 1  ;;  %vm3076_vm10 = vcmp.lt.s32.totalorder %v3054_v29, 4 }
 0x206   : > { %vm3075_vm11 = vcmp.lt.s32.totalorder %v3054_v29, 3  ;;  %v3078_v50 = vsel %vm3076_vm10, %v3066_v16, 2102212464  ;;  %v3081_v5 = vsel %vm3073_vm9, %v3060_v15, %v3063_v9  ;;  %v3082_v14 = vsel %vm3076_vm10, %v3069_v60, 920167782 }
 0x207   : > { %v3211_v39 = vsub.s32 0, %v6703_v31  ;;  %vm3074_vm12 = vcmp.lt.s32.totalorder %v3054_v29, 2  ;;  %v3083_v36 = vsel %vm3075_vm11, %v3066_v16, %v3082_v14  ;;  %v3085_v38 = vsel %vm3073_vm9, %v3063_v9, %v3066_v16 }
 0x208   : > { %v3077_v7 = vsel %vm3073_vm9, %v3057_v23, %v3060_v15  ;;  %v3079_v21 = vsel %vm3075_vm11, %v3063_v9, %v3078_v50  ;;  %v3084_v41 = vsel %vm3074_vm12, %v3081_v5, %v3083_v36  ;;  %v3086_v20 = vsel %vm3076_vm10, %v3072_v1, 1326507024  ;;  %v6738_v5 = vpop.f32.mrb[13].mxu0 }
 0x209   : > { %v4425_v59 = vmin.u32 %v3211_v39, %v6703_v31  ;;  %v3087_v34 = vsel %vm3075_vm11, %v3069_v60, %v3086_v20  ;;  %v6708_v17 = vmul.u32.u64.low %v3089_v35, %v3084_v41  ;;  %v6709_v47 = vmul.u32.u64.high %v3089_v35, %v3084_v41, %v6708_v17 }
 0x20a   : > { %v3020_v22 = vmul.f32 %v3019_v48, %v3017_v28  ;;  %v2913_v27 = vand.u32 2147483647, %v2912_v10  ;;  %v3088_v44 = vsel %vm3074_vm12, %v3085_v38, %v3087_v34  ;;  %v4432_v37 = vadd.s32 4294967169, %v3357_v54 }
 0x20b   : > { %5377 = vcosq.f32 %v6648_v43  ;;  %v3213_v16 = vclz %v4425_v59  ;;  %v6714_v15 = vmul.u32.u64.low %v3089_v35, %v3088_v44  ;;  %v6715_v9 = vmul.u32.u64.high %v3089_v35, %v3088_v44, %v6714_v15 }
 0x20c   : > { %5379 = vsinq.f32 %v6648_v43  ;;  %v2915_v23 = vcvt.s32.f32 %v2908_v6  ;;  %v3080_v60 = vsel %vm3074_vm12, %v3077_v7, %v3079_v21  ;;  %v3363_v1 = vadd.s32 1, %v4432_v37 }
 0x20d   : > { %v6723_v48 = vsel %vm6697_vm7, %v6363_v57, %v6667_v2  ;;  %v6730_v28 = vsel %vm2939_vm8, %v3023_v24, %v6532_v0  ;;  %v4426_v10 = vadd.s32 4294967294, %v3213_v16  ;;  %v3099_v43 = vadd.s32 1, %v6709_v47 }
 0x20e   : > { %8153 = vst [vmem:[#allocation16_spill] sm:$0xff] %v6730_v28  ;;  %v3021_v6 = vxor.u32 2147483648, %v3020_v22  ;;  %v6733_v29 = vmul.f32 %v2915_v23, %v2913_v27  ;;  %v7983_v54 = vand.u32 2147483647, %v6391_v18  ;;  %vm3364_vm13 = vcmp.gt.s32.totalorder %v3363_v1, 0 }
 0x20f   : > { %vm4427_vm15 = vcmp.lt.s32.totalorder %v4426_v10, 0  ;;  %v3096_v50 = vmul.u32 %v3089_v35, %v3080_v60  ;;  %vm3098_vm0 = vc.u32 %v6715_v9, %v6708_v17  ;;  %v3365_v2 = vsel %vm3364_vm13, %v3363_v1, 0 }
 0x210   : > { %5381 = vcosq.f32 %v6723_v48  ;;  %v3216_v0 = vsel %vm4427_vm15, 0, %v4426_v10  ;;  %v3100_v24 = vsel %vm3098_vm0, %v3099_v43, %v6709_v47  ;;  %v3367_v14 = vand.u32 31, %v3365_v2 }
 0x211   : > { %v3201_v39 = vadd.s32 %v6641_v49, %v6638_v4  ;;  %v3217_v36 = vsub.s32 32, %v3216_v0  ;;  %v3221_v38 = vsub.s32 4294967266, %v3216_v0  ;;  %v3101_v7 = vadd.s32 %v3100_v24, %v3096_v50 }
 0x212   : > { %v3022_v35 = vsel %vm2939_vm8, %v3021_v6, %v3020_v22  ;;  %v2917_v21 = vxor.u32 2147483648, %v6733_v29  ;;  %v3360_v41 = vand.u32 8388607, %v7983_v54  ;;  %v3368_v20 = vsub.s32 32, %v3367_v14 }
 0x213   : > { %v3218_v59 = vshll.u32 %v6703_v31, %v3216_v0  ;;  %v3219_v34 = vshrl.u32 %v3201_v39, %v3217_v36  ;;  %v3222_v47 = vadd.s32 127, %v3221_v38  ;;  %v3102_v27 = vadd.s32 536870912, %v3101_v7 }
 0x214   : > { %v3370_v44 = vshll.u32 %v7990_v33, %v3367_v14  ;;  %v3371_v4 = vshrl.u32 %v7994_v52, %v3368_v20  ;;  %v3374_v49 = vshrl.u32 %v7986_v8, %v3368_v20  ;;  %v3377_v37 = vshrl.u32 %v7984_v56, %v3368_v20 }
 0x215   : > { %v6754_v22 = vpop.eup %5377  ;;  %v3223_v16 = vshll.u32 %v3222_v47, 23  ;;  %v6756_v15 = vshrl.u32 %v3102_v27, 30  ;;  %v3373_v23 = vshll.u32 %v7994_v52, %v3367_v14  ;;  %v3380_v31 = vshrl.u32 %v8013_v51, %v3368_v20 }
 0x216   : > { %v6760_v60 = vpop.eup %5379  ;;  %vm6764_vm1 = vcmp.le.f32.partialorder %v2937_v42, 0.7853982  ;;  %v8154_v1 = vmov 0  ;;  %v3220_v10 = vor.u32 %v3219_v34, %v3218_v59  ;;  %v3366_v43 = vshrl.u32 %v3365_v2, 5 }
 0x217   : > { %v8155_v1 = vsel %vm6764_vm1, 4294967295, %v8154_v1  ;;  %v3376_v6 = vshll.u32 %v7986_v8, %v3367_v14  ;;  %v3379_v50 = vshll.u32 %v7984_v56, %v3367_v14  ;;  %v3224_v0 = vor.u32 4788187, %v3223_v16 }
 0x218   : > { %8156 = vst [vmem:[#allocation10_spill] sm:$0xff] %v8155_v1  ;;  %v3104_v24 = vshll.u32 %v6756_v15, 30  ;;  %v3372_v39 = vor.u32 %v3371_v4, %v3370_v44  ;;  %v3375_v36 = vor.u32 %v3374_v49, %v3373_v23  ;;  %v3382_v27 = vshll.u32 %v8013_v51, %v3367_v14 }
 0x219   : > { %v3378_v38 = vor.u32 %v3377_v37, %v3376_v6  ;;  %v3381_v47 = vor.u32 %v3380_v31, %v3379_v50  ;;  %v3383_v42 = vshrl.u32 %v7992_v3, %v3368_v20  ;;  %vm2835_vm2 = vcmp.lt.s32.totalorder %v6373_v11, 0 }
 0x21a   : > { %v3225_v54 = vand.u32 2147483647, %v3224_v0  ;;  %v6774_v59 = vsub.s32 %v3101_v7, %v3104_v24  ;;  %v3361_v2 = vor.u32 8388608, %v3360_v41  ;;  %v3252_v34 = vand.u32 2139095040, %v6396_v45  ;;  %v6777_v56 = vpop.eup %5381 }
 0x21b   : > { %8157 = vst [vmem:[#allocation17_spill] sm:$0xff] %v6777_v56  ;;  %v3227_v16 = vcvt.s32.f32 %v3220_v10  ;;  %v3384_v8 = vor.u32 %v3383_v42, %v3382_v27  ;;  %vm3385_vm3 = vcmp.lt.s32.totalorder %v3366_v43, 1  ;;  %vm3388_vm4 = vcmp.lt.s32.totalorder %v3366_v43, 4 }
 0x21c   : > { %v3107_v44 = vsub.s32 0, %v6774_v59  ;;  %vm3387_vm5 = vcmp.lt.s32.totalorder %v3366_v43, 3  ;;  %v3393_v14 = vsel %vm3385_vm3, %v3372_v39, %v3375_v36  ;;  %v3394_v4 = vsel %vm3388_vm4, %v3381_v47, 920167782 }
 0x21d   : > { %v8158_v49 = vand.u32 2147483647, %v6373_v11  ;;  %v8159_v7 = vmov 0  ;;  %v3369_v41 = vshrl.u32 %v7990_v33, %v3368_v20  ;;  %v3395_v37 = vsel %vm3387_vm5, %v3378_v38, %v3394_v4 }
 0x21e   : > { %v3397_v23 = vsel %vm3385_vm3, %v3375_v36, %v3378_v38  ;;  %v3398_v31 = vsel %vm3388_vm4, %v3384_v8, 1326507024  ;;  %vm3147_vm8 = vcmp.lt.s32.totalorder %v6377_v62, 0  ;;  %v3228_v10 = vmul.f32 %v3227_v16, %v3225_v54 }
 0x21f   : > { %vm6783_vm6 = vcmp.le.f32.partialorder %v8158_v49, 0.7853982  ;;  %v4421_v6 = vmin.u32 %v3107_v44, %v6774_v59  ;;  %vm3386_vm9 = vcmp.lt.s32.totalorder %v3366_v43, 2  ;;  %v3390_v50 = vsel %vm3388_vm4, %v3378_v38, 2102212464 }
 0x220   : > { %v8160_v7 = vsel %vm6783_vm6, 4294967295, %v8159_v7  ;;  %v3396_v0 = vsel %vm3386_vm9, %v3393_v14, %v3395_v37  ;;  %v3399_v24 = vsel %vm3387_vm5, %v3381_v47, %v3398_v31  ;;  %v3401_v27 = vshll.u32 %v3361_v2, 8 }
 0x221   : > { %8161 = vst [vmem:[#allocation18_spill] sm:$0xff] %v8160_v7  ;;  %v3253_v42 = vshrl.u32 %v3252_v34, 23  ;;  %v3025_v20 = vsel %vm6764_vm1, %v6371_v19, %v3022_v35  ;;  %v2919_v4 = vsub.s32 4, %v6592_v12  ;;  %v3109_v8 = vclz %v4421_v6 }
 0x222   : > { %v3400_v49 = vsel %vm3386_vm9, %v3397_v23, %v3399_v24  ;;  %v3389_v54 = vsel %vm3385_vm3, %v3369_v41, %v3372_v39  ;;  %v3391_v16 = vsel %vm3387_vm5, %v3375_v36, %v3390_v50  ;;  %v8162_v47 = vand.u32 2147483647, %v6377_v62  ;;  %v6815_v23 = vpop.f32.mrb[0].mxu1 }
 0x223   : > { %v6801_v38 = vmul.u32.u64.low %v3401_v27, %v3400_v49  ;;  %v6802_v44 = vmul.u32.u64.high %v3401_v27, %v3400_v49, %v6801_v38  ;;  %v8163_v2 = vmov 0  ;;  %v4422_v34 = vadd.s32 4294967294, %v3109_v8  ;;  %8166 = vst [vmem:[#allocation20_spill] sm:$0xff] %v6815_v23 }
 0x224   : > { %vm6806_vm10 = vcmp.le.f32.partialorder %v8162_v47, 0.7853982  ;;  %v6810_v35 = vmul.u32.u64.low %v3401_v27, %v3396_v0  ;;  %v6811_v14 = vmul.u32.u64.high %v3401_v27, %v3396_v0, %v6810_v35  ;;  %v7989_v37 = vand.u32 2147483647, %v6396_v45  ;;  %v6843_v47 = vpop.f32.mrb[1].mxu1 }
 0x225   : > { %v8164_v2 = vsel %vm6806_vm10, 4294967295, %v8163_v2  ;;  %5383 = vsinq.f32 %v6723_v48  ;;  %v2918_v39 = vsel %vm2835_vm2, %v2917_v21, %v6733_v29  ;;  %v3229_v36 = vxor.u32 2147483648, %v3228_v10  ;;  %8168 = vst [vmem:[#allocation23_spill] sm:$0xff] %v6843_v47 }
 0x226   : > { %8165 = vst [vmem:[#allocation19_spill] sm:$0xff] %v8164_v2  ;;  %v4428_v41 = vadd.s32 4294967169, %v3253_v42  ;;  %5385 = vcosq.f32 %v3025_v20  ;;  %v6826_v31 = vsel %vm2835_vm2, %v2919_v4, %v6592_v12  ;;  %vm4423_vm11 = vcmp.lt.s32.totalorder %v4422_v34, 0 }
 0x227   : > { %8167 = vst [vmem:[#allocation21_spill] sm:$0xff] %v6826_v31  ;;  %v3392_v6 = vsel %vm3386_vm9, %v3389_v54, %v3391_v16  ;;  %5387 = vsinq.f32 %v3025_v20  ;;  %v3112_v50 = vsel %vm4423_vm11, 0, %v4422_v34  ;;  %vm3410_vm12 = vc.u32 %v6802_v44, %v6810_v35 }
 0x228   : > { %v3259_v48 = vadd.s32 1, %v4428_v41  ;;  %v2921_v29 = vsel %vm6783_vm6, %v6373_v11, %v2918_v39  ;;  %v3117_v21 = vsub.s32 4294967266, %v3112_v50  ;;  %v3411_v0 = vadd.s32 1, %v6811_v14 }
 0x229   : > { %v3256_v12 = vand.u32 8388607, %v7989_v37  ;;  %v3230_v43 = vsel %vm3147_vm8, %v3229_v36, %v3228_v10  ;;  %v3408_v24 = vmul.u32 %v3401_v27, %v3392_v6  ;;  %v7988_v42 = vand.u32 2147483647, %v6408_v30 }
 0x22a   : > { %vm3260_vm13 = vcmp.gt.s32.totalorder %v3259_v48, 0  ;;  %v3113_v20 = vsub.s32 32, %v3112_v50  ;;  %v3412_v4 = vsel %vm3410_vm12, %v3411_v0, %v6811_v14  ;;  %v3564_v49 = vand.u32 2139095040, %v6408_v30 }
 0x22b   : > { %v3261_v8 = vsel %vm3260_vm13, %v3259_v48, 0  ;;  %5389 = vcosq.f32 %v2921_v29  ;;  %v3413_v16 = vadd.s32 %v3412_v4, %v3408_v24  ;;  %v3097_v10 = vadd.s32 %v6708_v17, %v6715_v9 }
 0x22c   : > { %v3263_v38 = vand.u32 31, %v3261_v8  ;;  %5391 = vsinq.f32 %v2921_v29  ;;  %v3118_v27 = vadd.s32 127, %v3117_v21  ;;  %v3257_v34 = vor.u32 8388608, %v3256_v12 }
 0x22d   : > { %v6850_v14 = vsel %vm6806_vm10, %v6377_v62, %v3230_v43  ;;  %v3414_v39 = vadd.s32 536870912, %v3413_v16  ;;  %v6854_v41 = vand.u32 8388607, %v7988_v42  ;;  %v3115_v6 = vshrl.u32 %v3097_v10, %v3113_v20 }
 0x22e   : > { %v3264_v36 = vsub.s32 32, %v3263_v38  ;;  %v6856_v48 = vshrl.u32 %v3261_v8, 5  ;;  %v3266_v29 = vshll.u32 %v7990_v33, %v3263_v38  ;;  %v3565_v0 = vshrl.u32 %v3564_v49, 23 }
 0x22f   : > { %v6859_v17 = vpop.eup %5383  ;;  %v6861_v9 = vshrl.u32 %v3414_v39, 30  ;;  %v3269_v12 = vshll.u32 %v7994_v52, %v3263_v38  ;;  %v8170_v43 = vmov 2131351028   ;;  %v3119_v42 = vshll.u32 %v3118_v27, 23 }
 0x230   : > { %8169 = vst [vmem:[#allocation25_spill] sm:$0xff] %v6859_v17  ;;  %v3267_v21 = vshrl.u32 %v7994_v52, %v3264_v36  ;;  %v3270_v24 = vshrl.u32 %v8170_v43, %v3264_v36  ;;  %v6866_v4 = vpop.eup %5385  ;;  %v8172_v37 = vmov 2102212464   ;;  %v3276_v10 = vshrl.u32 %v8013_v51, %v3264_v36 }
 0x231   : > { %8171 = vst [vmem:[#allocation27_spill] sm:$0xff] %v6866_v4  ;;  %v3273_v20 = vshrl.u32 %v8172_v37, %v3264_v36  ;;  %v3275_v8 = vshll.u32 %v8172_v37, %v3263_v38  ;;  %v6871_v49 = vpop.eup %5387  ;;  %v3416_v39 = vshll.u32 %v6861_v9, 30  ;;  %v3272_v3 = vshll.u32 %v8170_v43, %v3263_v38 }
 0x232   : > { %8173 = vst [vmem:[#allocation8_spill] sm:$0xff] %v6871_v49  ;;  %v3268_v54 = vor.u32 %v3267_v21, %v3266_v29  ;;  %v3271_v33 = vor.u32 %v3270_v24, %v3269_v12  ;;  %v3114_v52 = vshll.u32 %v6774_v59, %v3112_v50  ;;  %v3278_v11 = vshll.u32 %v8013_v51, %v3263_v38 }
 0x233   : > { %v3277_v2 = vor.u32 %v3276_v10, %v3275_v8  ;;  %v8174_v27 = vmov 1326507024   ;;  %v6878_v31 = vsub.s32 %v3413_v16, %v3416_v39  ;;  %v3274_v19 = vor.u32 %v3273_v20, %v3272_v3 }
 0x234   : > { %v3279_v7 = vshrl.u32 %v8174_v27, %v3264_v36  ;;  %v3297_v4 = vshll.u32 %v3257_v34, 8  ;;  %v3569_v1 = vor.u32 8388608, %v6854_v41  ;;  %v3116_v49 = vor.u32 %v3115_v6, %v3114_v52 }
 0x235   : > { %v3120_v28 = vor.u32 4788187, %v3119_v42  ;;  %vm3281_vm15 = vcmp.lt.s32.totalorder %v6856_v48, 1  ;;  %v6882_v29 = vpop.eup %5389  ;;  %v3419_v59 = vsub.s32 0, %v6878_v31  ;;  %vm3284_vm0 = vcmp.lt.s32.totalorder %v6856_v48, 4 }
 0x236   : > { %v3280_v47 = vor.u32 %v3279_v7, %v3278_v11  ;;  %8175 = vst [vmem:[#allocation30_spill] sm:$0xff] %v6882_v29  ;;  %v3289_v50 = vsel %vm3281_vm15, %v3268_v54, %v3271_v33  ;;  %v4440_v16 = vadd.s32 4294967169, %v3565_v0  ;;  %v6888_v38 = vpop.eup %5391  ;;  %v8177_v3 = vmov 683565275  }
 0x237   : > { %8176 = vst [vmem:[#allocation22_spill] sm:$0xff] %v6888_v38  ;;  %v3265_v34 = vshrl.u32 %v8177_v3, %v3264_v36  ;;  %vm3282_vm2 = vcmp.lt.s32.totalorder %v6856_v48, 2  ;;  %vm3283_vm3 = vcmp.lt.s32.totalorder %v6856_v48, 3  ;;  %v3290_v11 = vsel %vm3284_vm0, %v3277_v2, 920167782 }
 0x238   : > { %v4433_v52 = vmin.u32 %v3419_v59, %v6878_v31  ;;  %v3286_v7 = vsel %vm3284_vm0, %v3274_v19, 2102212464  ;;  %v3291_v42 = vsel %vm3283_vm3, %v3274_v19, %v3290_v11  ;;  %v3293_v41 = vsel %vm3281_vm15, %v3271_v33, %v3274_v19 }
 0x239   : > { %v3121_v6 = vand.u32 2147483647, %v3120_v28  ;;  %v3123_v21 = vcvt.s32.f32 %v3116_v49  ;;  %v3292_v0 = vsel %vm3282_vm2, %v3289_v50, %v3291_v42  ;;  %v3294_v12 = vsel %vm3284_vm0, %v3280_v47, 1326507024 }
 0x23a   : > { %v3421_v24 = vclz %v4433_v52  ;;  %v3285_v36 = vsel %vm3281_vm15, %v3265_v34, %v3268_v54  ;;  %v3295_v20 = vsel %vm3283_vm3, %v3277_v2, %v3294_v12  ;;  %v3571_v8 = vadd.s32 1, %v4440_v16 }
 0x23b   : > { %v3287_v10 = vsel %vm3283_vm3, %v3271_v33, %v3286_v7  ;;  %v3296_v39 = vsel %vm3282_vm2, %v3293_v41, %v3295_v20  ;;  %v6902_v59 = vmul.u32.u64.low %v3297_v4, %v3292_v0  ;;  %v6903_v11 = vmul.u32.u64.high %v3297_v4, %v3292_v0, %v6902_v59 }
 0x23c   : > { %v4434_v19 = vadd.s32 4294967294, %v3421_v24  ;;  %v6906_v28 = vmul.u32.u64.low %v3297_v4, %v3296_v39  ;;  %v6907_v49 = vmul.u32.u64.high %v3297_v4, %v3296_v39, %v6906_v28  ;;  %vm3572_vm4 = vcmp.gt.s32.totalorder %v3571_v8, 0 }
 0x23d   : > { %5393 = vcosq.f32 %v6850_v14  ;;  %v3124_v47 = vmul.f32 %v3123_v21, %v3121_v6  ;;  %v3573_v2 = vsel %vm3572_vm4, %v3571_v8, 0  ;;  %v3288_v33 = vsel %vm3282_vm2, %v3285_v36, %v3287_v10 }
 0x23e   : > { %vm4435_vm5 = vcmp.lt.s32.totalorder %v4434_v19, 0  ;;  %v3575_v50 = vand.u32 31, %v3573_v2  ;;  %v3460_v16 = vand.u32 2139095040, %v6465_v63  ;;  %vm3043_vm9 = vcmp.lt.s32.totalorder %v6379_v32, 0 }
 0x23f   : > { %v3409_v34 = vadd.s32 %v6810_v35, %v6802_v44  ;;  %v3424_v52 = vsel %vm4435_vm5, 0, %v4434_v19  ;;  %v3307_v7 = vadd.s32 1, %v6903_v11  ;;  %v6920_v0 = vshll.u32 %v3569_v1, 8 }
 0x240   : > { %v3425_v41 = vsub.s32 32, %v3424_v52  ;;  %v3429_v6 = vsub.s32 4294967266, %v3424_v52  ;;  %v3125_v48 = vxor.u32 2147483648, %v3124_v47  ;;  %v3304_v12 = vmul.u32 %v3297_v4, %v3288_v33 }
 0x241   : > { %vm3306_vm11 = vc.u32 %v6907_v49, %v6902_v59  ;;  %v3576_v24 = vsub.s32 32, %v3575_v50  ;;  %v3578_v35 = vshll.u32 %v8177_v3, %v3575_v50  ;;  %v3461_v20 = vshrl.u32 %v3460_v16, 23 }
 0x242   : > { %v3430_v36 = vadd.s32 127, %v3429_v6  ;;  %v3308_v44 = vsel %vm3306_vm11, %v3307_v7, %v6903_v11  ;;  %v8178_v10 = vmov 2475754826   ;;  %v3427_v28 = vshrl.u32 %v3409_v34, %v3425_v41 }
 0x243   : > { %v3309_v8 = vadd.s32 %v3308_v44, %v3304_v12  ;;  %v3579_v39 = vshrl.u32 %v8178_v10, %v3576_v24  ;;  %v3581_v19 = vshll.u32 %v8178_v10, %v3575_v50  ;;  %v3582_v1 = vshrl.u32 %v8170_v43, %v3576_v24 }
 0x244   : > { %v3431_v21 = vshll.u32 %v3430_v36, 23  ;;  %v3584_v4 = vshll.u32 %v8170_v43, %v3575_v50  ;;  %v3585_v33 = vshrl.u32 %v8172_v37, %v3576_v24  ;;  %v3574_v6 = vshrl.u32 %v3573_v2, 5 }
 0x245   : > { %v3310_v54 = vadd.s32 536870912, %v3309_v8  ;;  %v3587_v11 = vshll.u32 %v8172_v37, %v3575_v50  ;;  %v3588_v7 = vshrl.u32 %v8013_v51, %v3576_v24  ;;  %v8179_v16 = vand.u32 2147483647, %v6379_v32 }
 0x246   : > { %v3426_v44 = vshll.u32 %v6878_v31, %v3424_v52  ;;  %v3580_v34 = vor.u32 %v3579_v39, %v3578_v35  ;;  %v3583_v41 = vor.u32 %v3582_v1, %v3581_v19  ;;  %v3586_v36 = vor.u32 %v3585_v33, %v3584_v4 }
 0x247   : > { %vm6935_vm12 = vcmp.le.f32.partialorder %v8179_v16, 0.7853982  ;;  %v6940_v42 = vpop.eup %5393  ;;  %v6942_v29 = vshrl.u32 %v3310_v54, 30  ;;  %v3589_v2 = vor.u32 %v3588_v7, %v3587_v11  ;;  %v3590_v38 = vshll.u32 %v8013_v51, %v3575_v50 }
 0x248   : > { %v3591_v57 = vshrl.u32 %v8174_v27, %v3576_v24  ;;  %v3126_v16 = vsel %vm3043_vm9, %v3125_v48, %v3124_v47  ;;  %v3428_v23 = vor.u32 %v3427_v28, %v3426_v44  ;;  %v3432_v56 = vor.u32 4788187, %v3431_v21 }
 0x249   : > { %v4436_v17 = vadd.s32 4294967169, %v3461_v20  ;;  %v3312_v31 = vshll.u32 %v6942_v29, 30  ;;  %vm3593_vm13 = vcmp.lt.s32.totalorder %v3574_v6, 1  ;;  %vm3596_vm15 = vcmp.lt.s32.totalorder %v3574_v6, 4 }
 0x24a   : > { %v3592_v52 = vor.u32 %v3591_v57, %v3590_v38  ;;  %v3577_v35 = vshrl.u32 %v8177_v3, %v3576_v24  ;;  %vm3595_vm0 = vcmp.lt.s32.totalorder %v3574_v6, 3  ;;  %v3601_v54 = vsel %vm3593_vm13, %v3580_v34, %v3583_v41 }
 0x24b   : > { %v3602_v39 = vsel %vm3596_vm15, %v3589_v2, 920167782  ;;  %v6951_v50 = vsub.s32 %v3309_v8, %v3312_v31  ;;  %vm3594_vm2 = vcmp.lt.s32.totalorder %v3574_v6, 2  ;;  %v3598_v19 = vsel %vm3596_vm15, %v3586_v36, 2102212464 }
 0x24c   : > { %v3603_v47 = vsel %vm3595_vm0, %v3586_v36, %v3602_v39  ;;  %v3433_v48 = vand.u32 2147483647, %v3432_v56  ;;  %v3435_v21 = vcvt.s32.f32 %v3428_v23  ;;  %v3605_v57 = vsel %vm3593_vm13, %v3583_v41, %v3586_v36 }
 0x24d   : > { %v3604_v20 = vsel %vm3594_vm2, %v3601_v54, %v3603_v47  ;;  %v3315_v38 = vsub.s32 0, %v6951_v50  ;;  %v3606_v1 = vsel %vm3596_vm15, %v3592_v52, 1326507024  ;;  %v3597_v8 = vsel %vm3593_vm13, %v3577_v35, %v3580_v34 }
 0x24e   : > { %v6958_v24 = vmul.u32.u64.low %v6920_v0, %v3604_v20  ;;  %v6959_v28 = vmul.u32.u64.high %v6920_v0, %v3604_v20, %v6958_v24  ;;  %v3599_v4 = vsel %vm3595_vm0, %v3583_v41, %v3598_v19  ;;  %v3607_v33 = vsel %vm3595_vm0, %v3589_v2, %v3606_v1  ;;  %v7013_v1 = vpop.f32.mrb[14].mxu0 }
 0x24f   : > { %v3467_v56 = vadd.s32 1, %v4436_v17  ;;  %v6968_v23 = vsel %vm6935_vm12, %v6379_v32, %v3126_v16  ;;  %v4429_v11 = vmin.u32 %v3315_v38, %v6951_v50  ;;  %v3608_v7 = vsel %vm3594_vm2, %v3605_v57, %v3607_v33  ;;  %v7018_v33 = vpop.f32.mrb[15].mxu0 }
 0x250   : > { %v8182_v44 = vand.u32 2147483647, %v6465_v63  ;;  %v6974_v31 = vmul.f32 %v3435_v21, %v3433_v48  ;;  %v6977_v34 = vmul.u32.u64.low %v6920_v0, %v3608_v7  ;;  %v6978_v41 = vmul.u32.u64.high %v6920_v0, %v3608_v7, %v6977_v34 }
 0x251   : > { %vm3468_vm3 = vcmp.gt.s32.totalorder %v3467_v56, 0  ;;  %v3317_v17 = vclz %v4429_v11  ;;  %v3600_v2 = vsel %vm3594_vm2, %v3597_v8, %v3599_v4  ;;  %v3619_v16 = vadd.s32 1, %v6959_v28  ;;  %v7025_v34 = vpop.f32.mrb[2].mxu1 }
 0x252   : > { %v3464_v36 = vand.u32 8388607, %v8182_v44  ;;  %v3469_v52 = vsel %vm3468_vm3, %v3467_v56, 0  ;;  %v8183_v35 = vsub.s32 4, %v6690_v58  ;;  %5395 = vsinq.f32 %v6850_v14 }
 0x253   : > { %vm3355_vm4 = vcmp.lt.s32.totalorder %v6391_v18, 0  ;;  %v3471_v39 = vand.u32 31, %v3469_v52  ;;  %v8184_v19 = vsub.s32 4, %v6756_v15  ;;  %5397 = vcosq.f32 %v6968_v23 }
 0x254   : > { %v6987_v54 = vsel %vm3147_vm8, %v8183_v35, %v6690_v58  ;;  %v8185_v47 = vsub.s32 4, %v6861_v9  ;;  %v4430_v14 = vadd.s32 4294967294, %v3317_v17  ;;  %v3616_v48 = vmul.u32 %v6920_v0, %v3600_v2 }
 0x255   : > { %v6996_v6 = vsel %vm3043_vm9, %v8184_v19, %v6756_v15  ;;  %vm3618_vm8 = vc.u32 %v6978_v41, %v6958_v24  ;;  %v3465_v21 = vor.u32 8388608, %v3464_v36  ;;  %v3472_v20 = vsub.s32 32, %v3471_v39 }
 0x256   : > { %v7004_v58 = vsel %vm3355_vm4, %v8185_v47, %v6861_v9  ;;  %v3305_v57 = vadd.s32 %v6902_v59, %v6907_v49  ;;  %vm4431_vm5 = vcmp.lt.s32.totalorder %v4430_v14, 0  ;;  %v3620_v38 = vsel %vm3618_vm8, %v3619_v16, %v6959_v28 }
 0x257   : > { %8186 = vst [vmem:[#allocation24_spill] sm:$0xff] %v7004_v58  ;;  %v3320_v9 = vsel %vm4431_vm5, 0, %v4430_v14  ;;  %v3621_v8 = vadd.s32 %v3620_v38, %v3616_v48  ;;  %v7015_v4 = vshrl.u32 %v3469_v52, 5  ;;  %v3475_v0 = vshrl.u32 %v8178_v10, %v3472_v20 }
 0x258   : > { %v3321_v56 = vsub.s32 32, %v3320_v9  ;;  %v3325_v11 = vsub.s32 4294967266, %v3320_v9  ;;  %v3474_v7 = vshll.u32 %v8177_v3, %v3471_v39  ;;  %v3478_v44 = vshrl.u32 %v8170_v43, %v3472_v20 }
 0x259   : > { %v3622_v59 = vadd.s32 536870912, %v3621_v8  ;;  %v3477_v49 = vshll.u32 %v8178_v10, %v3471_v39  ;;  %v3480_v28 = vshll.u32 %v8170_v43, %v3471_v39  ;;  %v3481_v36 = vshrl.u32 %v8172_v37, %v3472_v20 }
 0x25a   : > { %v3326_v17 = vadd.s32 127, %v3325_v11  ;;  %v3476_v2 = vor.u32 %v3475_v0, %v3474_v7  ;;  %v3483_v16 = vshll.u32 %v8172_v37, %v3471_v39  ;;  %v3484_v52 = vshrl.u32 %v8013_v51, %v3472_v20 }
 0x25b   : > { %v3323_v35 = vshrl.u32 %v3305_v57, %v3321_v56  ;;  %v7029_v19 = vshrl.u32 %v3622_v59, 30  ;;  %v3482_v47 = vor.u32 %v3481_v36, %v3480_v28  ;;  %v3487_v14 = vshrl.u32 %v8174_v27, %v3472_v20 }
 0x25c   : > { %v3327_v48 = vshll.u32 %v3326_v17, 23  ;;  %v3479_v38 = vor.u32 %v3478_v44, %v3477_v49  ;;  %v3485_v15 = vor.u32 %v3484_v52, %v3483_v16  ;;  %v3486_v58 = vshll.u32 %v8013_v51, %v3471_v39  ;;  %v7033_v32 = vpop.eup %5395 }
 0x25d   : > { %v3322_v11 = vshll.u32 %v6951_v50, %v3320_v9  ;;  %v3624_v0 = vshll.u32 %v7029_v19, 30  ;;  %v3505_v7 = vshll.u32 %v3465_v21, 8  ;;  %v3772_v62 = vand.u32 2139095040, %v6520_v61  ;;  %v7038_v57 = vpop.eup %5397 }
 0x25e   : > { %8187 = vst [vmem:[#allocation26_spill] sm:$0xff] %v7038_v57  ;;  %v3328_v56 = vor.u32 4788187, %v3327_v48  ;;  %v3473_v59 = vshrl.u32 %v8177_v3, %v3472_v20  ;;  %v3488_v28 = vor.u32 %v3487_v14, %v3486_v58  ;;  %vm3492_vm9 = vcmp.lt.s32.totalorder %v7015_v4, 4 }
 0x25f   : > { %vm3251_vm11 = vcmp.lt.s32.totalorder %v6396_v45, 0  ;;  %v3324_v39 = vor.u32 %v3323_v35, %v3322_v11  ;;  %v7043_v44 = vsub.s32 %v3621_v8, %v3624_v0  ;;  %vm3489_vm13 = vcmp.lt.s32.totalorder %v7015_v4, 1 }
 0x260   : > { %v3494_v50 = vsel %vm3492_vm9, %v3482_v47, 2102212464  ;;  %v8188_v21 = vand.u32 2147483647, %v6391_v18  ;;  %v8189_v9 = vmov 0  ;;  %vm3490_vm0 = vcmp.lt.s32.totalorder %v7015_v4, 2 }
 0x261   : > { %vm3491_vm2 = vcmp.lt.s32.totalorder %v7015_v4, 3  ;;  %v3497_v58 = vsel %vm3489_vm13, %v3476_v2, %v3479_v38  ;;  %v3498_v20 = vsel %vm3492_vm9, %v3485_v15, 920167782  ;;  %v3627_v8 = vsub.s32 0, %v7043_v44 }
 0x262   : > { %vm7050_vm15 = vcmp.le.f32.partialorder %v8188_v21, 0.7853982  ;;  %v3493_v49 = vsel %vm3489_vm13, %v3473_v59, %v3476_v2  ;;  %v3499_v36 = vsel %vm3491_vm2, %v3482_v47, %v3498_v20  ;;  %v3501_v17 = vsel %vm3489_vm13, %v3479_v38, %v3482_v47 }
 0x263   : > { %v8190_v9 = vsel %vm7050_vm15, 4294967295, %v8189_v9  ;;  %v3329_v16 = vand.u32 2147483647, %v3328_v56  ;;  %v3495_v52 = vsel %vm3491_vm2, %v3479_v38, %v3494_v50  ;;  %v3500_v35 = vsel %vm3490_vm0, %v3497_v58, %v3499_v36  ;;  %v7072_v56 = vpop.f32.mrb[3].mxu1 }
 0x264   : > { %8191 = vst [vmem:[#allocation28_spill] sm:$0xff] %v8190_v9  ;;  %v3502_v14 = vsel %vm3492_vm9, %v3488_v28, 1326507024  ;;  %v4441_v48 = vmin.u32 %v3627_v8, %v7043_v44  ;;  %v7064_v0 = vmul.u32.u64.low %v3505_v7, %v3500_v35  ;;  %v7065_v21 = vmul.u32.u64.high %v3505_v7, %v3500_v35, %v7064_v0  ;;  %8192 = vst [vmem:[#allocation31_spill] sm:$0xff] %v7072_v56 }
 0x265   : > { %v3503_v11 = vsel %vm3491_vm2, %v3485_v15, %v3502_v14  ;;  %v3335_v51 = vsub.s32 4, %v6942_v29  ;;  %v8015_v47 = vand.u32 2147483647, %v6520_v61  ;;  %v3773_v38 = vshrl.u32 %v3772_v62, 23 }
 0x266   : > { %v3504_v2 = vsel %vm3490_vm0, %v3501_v17, %v3503_v11  ;;  %v3331_v59 = vcvt.s32.f32 %v3324_v39  ;;  %v3629_v50 = vclz %v4441_v48  ;;  %v8193_v15 = vxor.u32 2147483648, %v6974_v31 }
 0x267   : > { %v7074_v28 = vmul.u32.u64.low %v3505_v7, %v3504_v2  ;;  %v7075_v58 = vmul.u32.u64.high %v3505_v7, %v3504_v2, %v7074_v28  ;;  %v3496_v8 = vsel %vm3490_vm0, %v3493_v49, %v3495_v52  ;;  %v4448_v36 = vadd.s32 4294967169, %v3773_v38 }
 0x268   : > { %v3438_v20 = vsel %vm3355_vm4, %v8193_v15, %v6974_v31  ;;  %v3668_v17 = vand.u32 2139095040, %v6569_v53  ;;  %5399 = vsinq.f32 %v6968_v23  ;;  %v3332_v62 = vmul.f32 %v3331_v59, %v3329_v16 }
 0x269   : > { %v4442_v39 = vadd.s32 4294967294, %v3629_v50  ;;  %v3515_v35 = vadd.s32 1, %v7065_v21  ;;  %v7090_v14 = vsel %vm3251_vm11, %v3335_v51, %v6942_v29  ;;  %v3776_v31 = vand.u32 8388607, %v8015_v47 }
 0x26a   : > { %8194 = vst [vmem:[#allocation32_spill] sm:$0xff] %v7090_v14  ;;  %v3779_v48 = vadd.s32 1, %v4448_v36  ;;  %v3669_v4 = vshrl.u32 %v3668_v17, 23  ;;  %v3441_v49 = vsel %vm7050_vm15, %v6391_v18, %v3438_v20  ;;  %v3512_v23 = vmul.u32 %v3505_v7, %v3496_v8 }
 0x26b   : > { %vm4443_vm3 = vcmp.lt.s32.totalorder %v4442_v39, 0  ;;  %vm3514_vm4 = vc.u32 %v7075_v58, %v7064_v0  ;;  %v3617_v16 = vadd.s32 %v6958_v24, %v6978_v41  ;;  %v3333_v29 = vxor.u32 2147483648, %v3332_v62 }
 0x26c   : > { %v3632_v52 = vsel %vm4443_vm3, 0, %v4442_v39  ;;  %v3516_v51 = vsel %vm3514_vm4, %v3515_v35, %v7065_v21  ;;  %vm3780_vm8 = vcmp.gt.s32.totalorder %v3779_v48, 0  ;;  %5401 = vcosq.f32 %v3441_v49 }
 0x26d   : > { %v3633_v11 = vsub.s32 32, %v3632_v52  ;;  %v3637_v2 = vsub.s32 4294967266, %v3632_v52  ;;  %v3517_v38 = vadd.s32 %v3516_v51, %v3512_v23  ;;  %v3777_v59 = vor.u32 8388608, %v3776_v31 }
 0x26e   : > { %v3781_v50 = vsel %vm3780_vm8, %v3779_v48, 0  ;;  %v4444_v28 = vadd.s32 4294967169, %v3669_v4  ;;  %v3634_v7 = vshll.u32 %v7043_v44, %v3632_v52  ;;  %5403 = vsinq.f32 %v3441_v49 }
 0x26f   : > { %v3635_v15 = vshrl.u32 %v3617_v16, %v3633_v11  ;;  %v3638_v20 = vadd.s32 127, %v3637_v2  ;;  %v3518_v8 = vadd.s32 536870912, %v3517_v38  ;;  %v3783_v41 = vand.u32 31, %v3781_v50 }
 0x270   : > { %v3334_v36 = vsel %vm3251_vm11, %v3333_v29, %v3332_v62  ;;  %v3782_v31 = vshrl.u32 %v3781_v50, 5  ;;  %v7109_v4 = vshll.u32 %v3777_v59, 8  ;;  %v3675_v44 = vadd.s32 1, %v4444_v28 }
 0x271   : > { %v3636_v17 = vor.u32 %v3635_v15, %v3634_v7  ;;  %v3639_v39 = vshll.u32 %v3638_v20, 23  ;;  %v7107_v35 = vshrl.u32 %v3518_v8, 30  ;;  %v3784_v48 = vsub.s32 32, %v3783_v41 }
 0x272   : > { %v7111_v23 = vpop.eup %5399  ;;  %v8196_v49 = vand.u32 2147483647, %v6396_v45  ;;  %v8197_v16 = vmov 0  ;;  %v3786_v51 = vshll.u32 %v8177_v3, %v3783_v41  ;;  %v3789_v29 = vshll.u32 %v8178_v10, %v3783_v41 }
 0x273   : > { %8195 = vst [vmem:[#allocation33_spill] sm:$0xff] %v7111_v23  ;;  %v3640_v52 = vor.u32 4788187, %v3639_v39  ;;  %v3520_v62 = vshll.u32 %v7107_v35, 30  ;;  %v3787_v11 = vshrl.u32 %v8178_v10, %v3784_v48  ;;  %v3790_v2 = vshrl.u32 %v8170_v43, %v3784_v48 }
 0x274   : > { %vm7115_vm5 = vcmp.le.f32.partialorder %v8196_v49, 0.7853982  ;;  %v3792_v59 = vshll.u32 %v8170_v43, %v3783_v41  ;;  %v3793_v50 = vshrl.u32 %v8172_v37, %v3784_v48  ;;  %v3643_v7 = vcvt.s32.f32 %v3636_v17 }
 0x275   : > { %v8198_v16 = vsel %vm7115_vm5, 4294967295, %v8197_v16  ;;  %v3641_v28 = vand.u32 2147483647, %v3640_v52  ;;  %v7126_v15 = vsub.s32 %v3517_v38, %v3520_v62  ;;  %v3795_v20 = vshll.u32 %v8172_v37, %v3783_v41 }
 0x276   : > { %8199 = vst [vmem:[#allocation34_spill] sm:$0xff] %v8198_v16  ;;  %v3788_v8 = vor.u32 %v3787_v11, %v3786_v51  ;;  %v3791_v39 = vor.u32 %v3790_v2, %v3789_v29  ;;  %v3794_v49 = vor.u32 %v3793_v50, %v3792_v59  ;;  %v8200_v47 = vmov 920167782   ;;  %v7133_v9 = vpop.eup %5401 }
 0x277   : > { %v3796_v24 = vshrl.u32 %v8200_v47, %v3784_v48  ;;  %v3523_v21 = vsub.s32 0, %v7126_v15  ;;  %v3798_v18 = vshll.u32 %v8200_v47, %v3783_v41  ;;  %v3799_v14 = vshrl.u32 %v8174_v27, %v3784_v48  ;;  %8201 = vst [vmem:[#allocation35_spill] sm:$0xff] %v7133_v9 }
 0x278   : > { %vm3801_vm9 = vcmp.lt.s32.totalorder %v3782_v31, 1  ;;  %v3644_v52 = vmul.f32 %v3643_v7, %v3641_v28  ;;  %v3785_v38 = vshrl.u32 %v8177_v3, %v3784_v48  ;;  %vm3802_vm11 = vcmp.lt.s32.totalorder %v3782_v31, 2  ;;  %v7138_v29 = vpop.eup %5403 }
 0x279   : > { %v3797_v17 = vor.u32 %v3796_v24, %v3795_v20  ;;  %vm3563_vm13 = vcmp.lt.s32.totalorder %v6408_v30, 0  ;;  %v4437_v62 = vmin.u32 %v3523_v21, %v7126_v15  ;;  %v3800_v51 = vor.u32 %v3799_v14, %v3798_v18  ;;  %8202 = vst [vmem:[#allocation36_spill] sm:$0xff] %v7138_v29 }
 0x27a   : > { %vm3803_vm0 = vcmp.lt.s32.totalorder %v3782_v31, 3  ;;  %vm3804_vm2 = vcmp.lt.s32.totalorder %v3782_v31, 4  ;;  %v3805_v41 = vsel %vm3801_vm9, %v3785_v38, %v3788_v8  ;;  %v3809_v2 = vsel %vm3801_vm9, %v3788_v8, %v3791_v39 }
 0x27b   : > { %v3806_v11 = vsel %vm3804_vm2, %v3794_v49, 2102212464  ;;  %v3810_v59 = vsel %vm3804_vm2, %v3797_v17, 920167782  ;;  %v3525_v50 = vclz %v4437_v62  ;;  %v3813_v28 = vsel %vm3801_vm9, %v3791_v39, %v3794_v49 }
 0x27c   : > { %v3807_v48 = vsel %vm3803_vm0, %v3791_v39, %v3806_v11  ;;  %v3811_v24 = vsel %vm3803_vm0, %v3794_v49, %v3810_v59  ;;  %v7148_v18 = vsel %vm7115_vm5, %v6396_v45, %v3334_v36  ;;  %v3814_v21 = vsel %vm3804_vm2, %v3800_v51, 1326507024 }
 0x27d   : > { %v3812_v14 = vsel %vm3802_vm11, %v3809_v2, %v3811_v24  ;;  %vm3676_vm3 = vcmp.gt.s32.totalorder %v3675_v44, 0  ;;  %v3645_v7 = vxor.u32 2147483648, %v3644_v52  ;;  %v4438_v20 = vadd.s32 4294967294, %v3525_v50 }
 0x27e   : > { %v3815_v8 = vsel %vm3803_vm0, %v3797_v17, %v3814_v21  ;;  %v8203_v38 = vand.u32 2147483647, %v6569_v53  ;;  %v3808_v11 = vsel %vm3802_vm11, %v3805_v41, %v3807_v48  ;;  %v3677_v2 = vsel %vm3676_vm3, %v3675_v44, 0 }
 0x27f   : > { %v3816_v39 = vsel %vm3802_vm11, %v3813_v28, %v3815_v8  ;;  %v7157_v49 = vmul.u32.u64.low %v7109_v4, %v3812_v14  ;;  %v7158_v59 = vmul.u32.u64.high %v7109_v4, %v3812_v14, %v7157_v49  ;;  %vm4439_vm4 = vcmp.lt.s32.totalorder %v4438_v20, 0 }
 0x280   : > { %v3672_v62 = vand.u32 8388607, %v8203_v38  ;;  %v7162_v36 = vmul.u32.u64.low %v7109_v4, %v3816_v39  ;;  %v7163_v51 = vmul.u32.u64.high %v7109_v4, %v3816_v39, %v7162_v36  ;;  %5405 = vcosq.f32 %v7148_v18 }
 0x281   : > { %v3528_v17 = vsel %vm4439_vm4, 0, %v4438_v20  ;;  %v3679_v50 = vand.u32 31, %v3677_v2  ;;  %v8204_v31 = vand.u32 2147483647, %v6408_v30  ;;  %v8205_v41 = vmov 0 }
 0x282   : > { %v3513_v48 = vadd.s32 %v7064_v0, %v7075_v58  ;;  %v3529_v28 = vsub.s32 32, %v3528_v17  ;;  %v3533_v14 = vsub.s32 4294967266, %v3528_v17  ;;  %v3673_v21 = vor.u32 8388608, %v3672_v62 }
 0x283   : > { %vm7169_vm8 = vcmp.le.f32.partialorder %v8204_v31, 0.7853982  ;;  %v3646_v44 = vsel %vm3563_vm13, %v3645_v7, %v3644_v52  ;;  %v3824_v20 = vmul.u32 %v7109_v4, %v3808_v11  ;;  %v3827_v8 = vadd.s32 1, %v7158_v59 }
 0x284   : > { %v8206_v41 = vsel %vm7169_vm8, 4294967295, %v8205_v41  ;;  %v3680_v38 = vsub.s32 32, %v3679_v50  ;;  %v3530_v39 = vshll.u32 %v7126_v15, %v3528_v17  ;;  %v3531_v36 = vshrl.u32 %v3513_v48, %v3529_v28 }
 0x285   : > { %8207 = vst [vmem:[#allocation37_spill] sm:$0xff] %v8206_v41  ;;  %v3534_v31 = vadd.s32 127, %v3533_v14  ;;  %vm3826_vm9 = vc.u32 %v7163_v51, %v7157_v49  ;;  %v3682_v58 = vshll.u32 %v8177_v3, %v3679_v50  ;;  %v3678_v11 = vshrl.u32 %v3677_v2, 5 }
 0x286   : > { %v3828_v0 = vsel %vm3826_vm9, %v3827_v8, %v7158_v59  ;;  %v3683_v62 = vshrl.u32 %v8178_v10, %v3680_v38  ;;  %v3686_v52 = vshrl.u32 %v8170_v43, %v3680_v38  ;;  %v3685_v24 = vshll.u32 %v8178_v10, %v3679_v50 }
 0x287   : > { %v3535_v7 = vshll.u32 %v3534_v31, 23  ;;  %v3829_v4 = vadd.s32 %v3828_v0, %v3824_v20  ;;  %v3532_v45 = vor.u32 %v3531_v36, %v3530_v39  ;;  %v3688_v17 = vshll.u32 %v8170_v43, %v3679_v50 }
 0x288   : > { %v3684_v15 = vor.u32 %v3683_v62, %v3682_v58  ;;  %v3689_v48 = vshrl.u32 %v8172_v37, %v3680_v38  ;;  %v3691_v59 = vshll.u32 %v8172_v37, %v3679_v50  ;;  %v3692_v8 = vshrl.u32 %v8200_v47, %v3680_v38 }
 0x289   : > { %v3536_v28 = vor.u32 4788187, %v3535_v7  ;;  %v3830_v14 = vadd.s32 536870912, %v3829_v4  ;;  %v3687_v16 = vor.u32 %v3686_v52, %v3685_v24  ;;  %v3694_v31 = vshll.u32 %v8200_v47, %v3679_v50 }
 0x28a   : > { %v3690_v9 = vor.u32 %v3689_v48, %v3688_v17  ;;  %v3695_v2 = vshrl.u32 %v8174_v27, %v3680_v38  ;;  %v3543_v20 = vsub.s32 4, %v7107_v35  ;;  %v3693_v36 = vor.u32 %v3692_v8, %v3691_v59  ;;  %v7196_v58 = vpop.eup %5405  ;;  %v7205_v48 = vpop.f32.mrb[4].mxu1 }
 0x28b   : > { %v7194_v39 = vshrl.u32 %v3830_v14, 30  ;;  %v3713_v0 = vshll.u32 %v3673_v21, 8  ;;  %8208 = vst [vmem:[#allocation38_spill] sm:$0xff] %v7196_v58  ;;  %v3649_v62 = vsel %vm7169_vm8, %v6408_v30, %v3646_v44  ;;  %vm3459_vm11 = vcmp.lt.s32.totalorder %v6465_v63, 0  ;;  %8209 = vst [vmem:[#allocation39_spill] sm:$0xff] %v7205_v48  ;;  %v7207_v41 = vpop.f32.mrb[5].mxu1 }
 0x28c   : > { %v3681_v24 = vshrl.u32 %v8177_v3, %v3680_v38  ;;  %v3696_v52 = vor.u32 %v3695_v2, %v3694_v31  ;;  %v3980_v50 = vand.u32 2139095040, %v6673_v26  ;;  %v3537_v7 = vand.u32 2147483647, %v3536_v28  ;;  %8210 = vst [vmem:[#allocation40_spill] sm:$0xff] %v7207_v41  ;;  %v7214_v56 = vpop.f32.mrb[6].mxu1 }
 0x28d   : > { %v3832_v17 = vshll.u32 %v7194_v39, 30  ;;  %vm3697_vm0 = vcmp.lt.s32.totalorder %v3678_v11, 1  ;;  %vm3700_vm2 = vcmp.lt.s32.totalorder %v3678_v11, 4  ;;  %v3539_v21 = vcvt.s32.f32 %v3532_v45 }
 0x28e   : > { %v3702_v14 = vsel %vm3700_vm2, %v3690_v9, 2102212464  ;;  %v3705_v59 = vsel %vm3697_vm0, %v3684_v15, %v3687_v16  ;;  %v3706_v8 = vsel %vm3700_vm2, %v3693_v36, 920167782  ;;  %vm3698_vm3 = vcmp.lt.s32.totalorder %v3678_v11, 2 }
 0x28f   : > { %v7209_v44 = vsub.s32 %v3829_v4, %v3832_v17  ;;  %vm3699_vm4 = vcmp.lt.s32.totalorder %v3678_v11, 3  ;;  %v3709_v38 = vsel %vm3697_vm0, %v3687_v16, %v3690_v9  ;;  %vm3771_vm9 = vcmp.lt.s32.totalorder %v6520_v61, 0 }
 0x290   : > { %v3701_v28 = vsel %vm3697_vm0, %v3681_v24, %v3684_v15  ;;  %v3707_v31 = vsel %vm3699_vm4, %v3690_v9, %v3706_v8  ;;  %v3710_v2 = vsel %vm3700_vm2, %v3696_v52, 1326507024  ;;  %v3981_v58 = vshrl.u32 %v3980_v50, 23 }
 0x291   : > { %v3835_v29 = vsub.s32 0, %v7209_v44  ;;  %v3703_v48 = vsel %vm3699_vm4, %v3687_v16, %v3702_v14  ;;  %v3708_v45 = vsel %vm3698_vm3, %v3705_v59, %v3707_v31  ;;  %v3711_v57 = vsel %vm3699_vm4, %v3693_v36, %v3710_v2 }
 0x292   : > { %v3540_v41 = vmul.f32 %v3539_v21, %v3537_v7  ;;  %v3712_v4 = vsel %vm3698_vm3, %v3709_v38, %v3711_v57  ;;  %v7217_v17 = vmul.u32.u64.low %v3713_v0, %v3708_v45  ;;  %v7218_v23 = vmul.u32.u64.high %v3713_v0, %v3708_v45, %v7217_v17 }
 0x293   : > { %v4449_v15 = vmin.u32 %v3835_v29, %v7209_v44  ;;  %v7222_v9 = vmul.u32.u64.low %v3713_v0, %v3712_v4  ;;  %v7223_v24 = vmul.u32.u64.high %v3713_v0, %v3712_v4, %v7222_v9  ;;  %v8211_v52 = vand.u32 2147483647, %v6673_v26 }
 0x294   : > { %5407 = vsinq.f32 %v7148_v18  ;;  %v8212_v36 = vsub.s32 4, %v7029_v19  ;;  %v3704_v50 = vsel %vm3698_vm3, %v3701_v28, %v3703_v48  ;;  %v4456_v7 = vadd.s32 4294967169, %v3981_v58 }
 0x295   : > { %v3984_v16 = vand.u32 8388607, %v8211_v52  ;;  %5409 = vcosq.f32 %v3649_v62  ;;  %v7239_v29 = vsel %vm3459_vm11, %v3543_v20, %v7107_v35  ;;  %v3837_v21 = vclz %v4449_v15  ;;  %v7261_v15 = vpop.f32.mrb[7].mxu1 }
 0x296   : > { %v7233_v57 = vsel %vm3563_vm13, %v8212_v36, %v7029_v19  ;;  %8213 = vst [vmem:[#allocation41_spill] sm:$0xff] %v7239_v29  ;;  %v3855_v14 = vsub.s32 4, %v7194_v39  ;;  %5411 = vsinq.f32 %v3649_v62  ;;  %v3541_v18 = vxor.u32 2147483648, %v3540_v41  ;;  %8215 = vst [vmem:[#allocation43_spill] sm:$0xff] %v7261_v15  ;;  %v7266_v36 = vpop.f32.mrb[8].mxu1 }
 0x297   : > { %v3723_v59 = vadd.s32 1, %v7218_v23  ;;  %v3987_v8 = vadd.s32 1, %v4456_v7  ;;  %v4450_v38 = vadd.s32 4294967294, %v3837_v21  ;;  %v3720_v19 = vmul.u32 %v3713_v0, %v3704_v50  ;;  %8216 = vst [vmem:[#allocation44_spill] sm:$0xff] %v7266_v36 }
 0x298   : > { %vm3722_vm13 = vc.u32 %v7223_v24, %v7217_v17  ;;  %v3985_v11 = vor.u32 8388608, %v3984_v16  ;;  %v3825_v58 = vadd.s32 %v7157_v49, %v7163_v51  ;;  %v3876_v20 = vand.u32 2139095040, %v6738_v5 }
 0x299   : > { %v3724_v35 = vsel %vm3722_vm13, %v3723_v59, %v7218_v23  ;;  %vm3988_vm0 = vcmp.gt.s32.totalorder %v3987_v8, 0  ;;  %vm4451_vm2 = vcmp.lt.s32.totalorder %v4450_v38, 0  ;;  %v7252_v62 = vsel %vm3771_vm9, %v3855_v14, %v7194_v39  ;;  %v7271_v14 = vpop.f32.mrb[9].mxu1 }
 0x29a   : > { %8214 = vst [vmem:[#allocation42_spill] sm:$0xff] %v7252_v62  ;;  %v3725_v48 = vadd.s32 %v3724_v35, %v3720_v19  ;;  %v3989_v0 = vsel %vm3988_vm0, %v3987_v8, 0  ;;  %v7256_v28 = vsel %vm3459_vm11, %v3541_v18, %v3540_v41  ;;  %v3840_v31 = vsel %vm4451_vm2, 0, %v4450_v38  ;;  %8217 = vst [vmem:[#allocation45_spill] sm:$0xff] %v7271_v14 }
 0x29b   : > { %v3991_v2 = vand.u32 31, %v3989_v0  ;;  %v3841_v23 = vsub.s32 32, %v3840_v31  ;;  %v3845_v51 = vsub.s32 4294967266, %v3840_v31  ;;  %v7259_v4 = vshll.u32 %v3985_v11, 8 }
 0x29c   : > { %v3726_v45 = vadd.s32 536870912, %v3725_v48  ;;  %v3842_v39 = vshll.u32 %v7209_v44, %v3840_v31  ;;  %v7264_v9 = vshrl.u32 %v3989_v0, 5  ;;  %v3877_v16 = vshrl.u32 %v3876_v20, 23 }
 0x29d   : > { %v3992_v52 = vsub.s32 32, %v3991_v2  ;;  %v3843_v41 = vshrl.u32 %v3825_v58, %v3841_v23  ;;  %v3846_v50 = vadd.s32 127, %v3845_v51  ;;  %v3994_v21 = vshll.u32 %v8177_v3, %v3991_v2  ;;  %v7285_v58 = vpop.f32.mrb[10].mxu1 }
 0x29e   : > { %v7268_v7 = vshrl.u32 %v3726_v45, 30  ;;  %v7273_v18 = vpop.eup %5407  ;;  %v8218_v59 = vand.u32 2147483647, %v6465_v63  ;;  %v3997_v38 = vshll.u32 %v8178_v10, %v3991_v2  ;;  %8221 = vst [vmem:[#allocation46_spill] sm:$0xff] %v7285_v58  ;;  %v4000_v23 = vshll.u32 %v8170_v43, %v3991_v2  ;;  %v7297_v15 = vpop.f32.mrb[11].mxu1 }
 0x29f   : > { %v3995_v8 = vshrl.u32 %v8178_v10, %v3992_v52  ;;  %v3998_v19 = vshrl.u32 %v8170_v43, %v3992_v52  ;;  %v4001_v11 = vshrl.u32 %v8172_v37, %v3992_v52  ;;  %v7287_v35 = vpop.eup %5409  ;;  %v3844_v20 = vor.u32 %v3843_v41, %v3842_v39  ;;  %8222 = vst [vmem:[#allocation47_spill] sm:$0xff] %v7297_v15 }
 0x2a0   : > { %vm7277_vm11 = vcmp.le.f32.partialorder %v8218_v59, 0.7853982  ;;  %v3847_v0 = vshll.u32 %v3846_v50, 23  ;;  %v3728_v31 = vshll.u32 %v7268_v7, 30  ;;  %v7291_v51 = vpop.eup %5411  ;;  %v4003_v49 = vshll.u32 %v8172_v37, %v3991_v2 }
 0x2a1   : > { %v3996_v45 = vor.u32 %v3995_v8, %v3994_v21  ;;  %v3999_v59 = vor.u32 %v3998_v19, %v3997_v38  ;;  %v4004_v14 = vshrl.u32 %v8200_v47, %v3992_v52  ;;  %v4002_v58 = vor.u32 %v4001_v11, %v4000_v23  ;;  %v7304_v19 = vpop.f32.mrb[12].mxu1 }
 0x2a2   : > { %v3848_v36 = vor.u32 4788187, %v3847_v0  ;;  %v7295_v62 = vsub.s32 %v3725_v48, %v3728_v31  ;;  %v4452_v30 = vadd.s32 4294967169, %v3877_v16  ;;  %v3993_v39 = vshrl.u32 %v8177_v3, %v3992_v52  ;;  %8223 = vst [vmem:[#allocation48_spill] sm:$0xff] %v7304_v19 }
 0x2a3   : > { %v4005_v41 = vor.u32 %v4004_v14, %v4003_v49  ;;  %v4006_v50 = vshll.u32 %v8200_v47, %v3991_v2  ;;  %v4007_v29 = vshrl.u32 %v8174_v27, %v3992_v52  ;;  %v3851_v8 = vcvt.s32.f32 %v3844_v20 }
 0x2a4   : > { %v3849_v21 = vand.u32 2147483647, %v3848_v36  ;;  %v3731_v38 = vsub.s32 0, %v7295_v62  ;;  %vm4009_vm3 = vcmp.lt.s32.totalorder %v7264_v9, 1  ;;  %vm4010_vm4 = vcmp.lt.s32.totalorder %v7264_v9, 2 }
 0x2a5   : > { %v4008_v48 = vor.u32 %v4007_v29, %v4006_v50  ;;  %vm4012_vm13 = vcmp.lt.s32.totalorder %v7264_v9, 4  ;;  %v4017_v49 = vsel %vm4009_vm3, %v3996_v45, %v3999_v59  ;;  %vm4011_vm0 = vcmp.lt.s32.totalorder %v7264_v9, 3 }
 0x2a6   : > { %v4445_v2 = vmin.u32 %v3731_v38, %v7295_v62  ;;  %v4014_v52 = vsel %vm4012_vm13, %v4002_v58, 2102212464  ;;  %v4018_v16 = vsel %vm4012_vm13, %v4005_v41, 920167782  ;;  %v3852_v36 = vmul.f32 %v3851_v8, %v3849_v21 }
 0x2a7   : > { %v4019_v14 = vsel %vm4011_vm0, %v4002_v58, %v4018_v16  ;;  %v4021_v11 = vsel %vm4009_vm3, %v3999_v59, %v4002_v58  ;;  %v4022_v20 = vsel %vm4012_vm13, %v4008_v48, 1326507024  ;;  %v3545_v29 = vsel %vm7277_vm11, %v6465_v63, %v7256_v28 }
 0x2a8   : > { %v3733_v0 = vclz %v4445_v2  ;;  %v4013_v31 = vsel %vm4009_vm3, %v3993_v39, %v3996_v45  ;;  %v4020_v23 = vsel %vm4010_vm4, %v4017_v49, %v4019_v14  ;;  %v4015_v50 = vsel %vm4011_vm0, %v3999_v59, %v4014_v52  ;;  %v7333_v45 = vpop.f32.mrb[13].mxu1 }
 0x2a9   : > { %v4023_v38 = vsel %vm4011_vm0, %v4005_v41, %v4022_v20  ;;  %v7323_v21 = vmul.u32.u64.low %v7259_v4, %v4020_v23  ;;  %v7324_v8 = vmul.u32.u64.high %v7259_v4, %v4020_v23, %v7323_v21  ;;  %v8224_v28 = vand.u32 2147483647, %v6738_v5  ;;  %8225 = vst [vmem:[#allocation49_spill] sm:$0xff] %v7333_v45  ;;  %v7341_v52 = vpop.f32.mrb[14].mxu1 }
 0x2aa   : > { %v4446_v58 = vadd.s32 4294967294, %v3733_v0  ;;  %v4024_v48 = vsel %vm4010_vm4, %v4021_v11, %v4023_v38  ;;  %v3883_v16 = vadd.s32 1, %v4452_v30  ;;  %5413 = vcosq.f32 %v3545_v29  ;;  %8226 = vst [vmem:[#allocation50_spill] sm:$0xff] %v7341_v52 }
 0x2ab   : > { %v7331_v2 = vand.u32 8388607, %v8224_v28  ;;  %v3853_v39 = vxor.u32 2147483648, %v3852_v36  ;;  %v7336_v59 = vmul.u32.u64.low %v7259_v4, %v4024_v48  ;;  %v7337_v41 = vmul.u32.u64.high %v7259_v4, %v4024_v48, %v7336_v59 }
 0x2ac   : > { %5415 = vsinq.f32 %v3545_v29  ;;  %vm4447_vm2 = vcmp.lt.s32.totalorder %v4446_v58, 0  ;;  %v4016_v49 = vsel %vm4010_vm4, %v4013_v31, %v4015_v50  ;;  %vm3884_vm3 = vcmp.gt.s32.totalorder %v3883_v16, 0 }
 0x2ad   : > { %v3736_v14 = vsel %vm4447_vm2, 0, %v4446_v58  ;;  %v4035_v11 = vadd.s32 1, %v7324_v8  ;;  %v3885_v30 = vsel %vm3884_vm3, %v3883_v16, 0  ;;  %v2818_v20 = vsel %vm6598_vm14, 0, %v6573_v46  ;;  %v7357_v58 = vpop.f32.mrb[15].mxu1 }
 0x2ae   : > { %v3721_v0 = vadd.s32 %v7217_v17, %v7223_v24  ;;  %v3737_v23 = vsub.s32 32, %v3736_v14  ;;  %v3741_v29 = vsub.s32 4294967266, %v3736_v14  ;;  %v3881_v38 = vor.u32 8388608, %v7331_v2  ;;  %8227 = vst [vmem:[#allocation51_spill] sm:$0xff] %v7357_v58 }
 0x2af   : > { %v7352_v9 = vsel %vm3771_vm9, %v3853_v39, %v3852_v36  ;;  %v4032_v31 = vmul.u32 %v7259_v4, %v4016_v49  ;;  %vm4034_vm4 = vc.u32 %v7337_v41, %v7323_v21  ;;  %v3887_v50 = vand.u32 31, %v3885_v30 }
 0x2b0   : > { %v3738_v46 = vshll.u32 %v7295_v62, %v3736_v14  ;;  %v3739_v40 = vshrl.u32 %v3721_v0, %v3737_v23  ;;  %v3742_v17 = vadd.s32 127, %v3741_v29  ;;  %v4036_v24 = vsel %vm4034_vm4, %v4035_v11, %v7324_v8 }
 0x2b1   : > { %v4037_v48 = vadd.s32 %v4036_v24, %v4032_v31  ;;  %v3886_v28 = vshrl.u32 %v3885_v30, 5  ;;  %v3888_v2 = vsub.s32 32, %v3887_v50  ;;  %v3890_v36 = vshll.u32 %v8177_v3, %v3887_v50 }
 0x2b2   : > { %v3740_v16 = vor.u32 %v3739_v40, %v3738_v46  ;;  %v3743_v39 = vshll.u32 %v3742_v17, 23  ;;  %v3893_v4 = vshll.u32 %v8178_v10, %v3887_v50  ;;  %v3896_v59 = vshll.u32 %v8170_v43, %v3887_v50 }
 0x2b3   : > { %v4038_v49 = vadd.s32 536870912, %v4037_v48  ;;  %v3891_v58 = vshrl.u32 %v8178_v10, %v3888_v2  ;;  %v3894_v62 = vshrl.u32 %v8170_v43, %v3888_v2  ;;  %v3899_v14 = vshll.u32 %v8172_v37, %v3887_v50 }
 0x2b4   : > { %v8228_v8 = vand.u32 2147483647, %v6520_v61  ;;  %v3744_v30 = vor.u32 4788187, %v3743_v39  ;;  %v3747_v0 = vcvt.s32.f32 %v3740_v16  ;;  %v3897_v23 = vshrl.u32 %v8172_v37, %v3888_v2  ;;  %v7375_v31 = vpop.eup %5413 }
 0x2b5   : > { %v3900_v29 = vshrl.u32 %v8200_v47, %v3888_v2  ;;  %8231 = vst [vmem:[#allocation52_spill] sm:$0xff] %v7375_v31  ;;  %v7377_v46 = vshrl.u32 %v4038_v49, 30  ;;  %v3892_v40 = vor.u32 %v3891_v58, %v3890_v36  ;;  %v3895_v17 = vor.u32 %v3894_v62, %v3893_v4 }
 0x2b6   : > { %vm7369_vm14 = vcmp.le.f32.partialorder %v8228_v8, 0.7853982  ;;  %v3902_v24 = vshll.u32 %v8200_v47, %v3887_v50  ;;  %v7380_v52 = vpop.eup %5415  ;;  %vm8032_vm9 = vcmp.lt.s32.totalorder %v6569_v53, 0  ;;  %v3745_v8 = vand.u32 2147483647, %v3744_v30 }
 0x2b7   : > { %v3898_v45 = vor.u32 %v3897_v23, %v3896_v59  ;;  %v3901_v39 = vor.u32 %v3900_v29, %v3899_v14  ;;  %v3903_v16 = vshrl.u32 %v8174_v27, %v3888_v2  ;;  %v4040_v19 = vshll.u32 %v7377_v46, 30 }
 0x2b8   : > { %v3889_v15 = vshrl.u32 %v8177_v3, %v3888_v2  ;;  %vm3905_vm13 = vcmp.lt.s32.totalorder %v3886_v28, 1  ;;  %v2822_v49 = vadd.s32 3, %v2818_v20  ;;  %v3748_v63 = vmul.f32 %v3747_v0, %v3745_v8 }
 0x2b9   : > { %v3904_v58 = vor.u32 %v3903_v16, %v3902_v24  ;;  %vm3906_vm0 = vcmp.lt.s32.totalorder %v3886_v28, 2  ;;  %vm3908_vm2 = vcmp.lt.s32.totalorder %v3886_v28, 4  ;;  %v7386_v50 = vsub.s32 %v4037_v48, %v4040_v19 }
 0x2ba   : > { %vm3907_vm3 = vcmp.lt.s32.totalorder %v3886_v28, 3  ;;  %v3910_v36 = vsel %vm3908_vm2, %v3898_v45, 2102212464  ;;  %v3913_v4 = vsel %vm3905_vm13, %v3892_v40, %v3895_v17  ;;  %v3749_v62 = vxor.u32 2147483648, %v3748_v63 }
 0x2bb   : > { %v3909_v59 = vsel %vm3905_vm13, %v3889_v15, %v3892_v40  ;;  %v3914_v14 = vsel %vm3908_vm2, %v3901_v39, 920167782  ;;  %v3917_v30 = vsel %vm3905_vm13, %v3895_v17, %v3898_v45  ;;  %v4043_v23 = vsub.s32 0, %v7386_v50 }
 0x2bc   : > { %v3911_v29 = vsel %vm3907_vm3, %v3895_v17, %v3910_v36  ;;  %v3915_v31 = vsel %vm3907_vm3, %v3898_v45, %v3914_v14  ;;  %v3918_v2 = vsel %vm3908_vm2, %v3904_v58, 1326507024  ;;  %vm2821_vm4 = vweird.f32 %v6359_v55 }
 0x2bd   : > { %v3916_v20 = vsel %vm3906_vm0, %v3913_v4, %v3915_v31  ;;  %v3919_v0 = vsel %vm3907_vm3, %v3901_v39, %v3918_v2  ;;  %v3921_v19 = vshll.u32 %v3881_v38, 8  ;;  %v2823_v48 = vand.u32 3, %v2822_v49 }
 0x2be   : > { %v7395_v15 = vsel %vm7369_vm14, %v6520_v61, %v7352_v9  ;;  %v3751_v40 = vsub.s32 4, %v7268_v7  ;;  %v4457_v17 = vmin.u32 %v4043_v23, %v7386_v50  ;;  %v3920_v45 = vsel %vm3906_vm0, %v3917_v30, %v3919_v0 }
 0x2bf   : > { %v4033_v24 = vadd.s32 %v7323_v21, %v7337_v41  ;;  %v3912_v31 = vsel %vm3906_vm0, %v3909_v59, %v3911_v29  ;;  %v7403_v38 = vmul.u32.u64.low %v3921_v19, %v3920_v45  ;;  %v7404_v8 = vmul.u32.u64.high %v3921_v19, %v3920_v45, %v7403_v38 }
 0x2c0   : > { %v3750_v39 = vsel %vm8032_vm9, %v3749_v62, %v3748_v63  ;;  %v4045_v9 = vclz %v4457_v17  ;;  %v7408_v16 = vmul.u32.u64.low %v3921_v19, %v3916_v20  ;;  %v7409_v49 = vmul.u32.u64.high %v3921_v19, %v3916_v20, %v7408_v16  ;;  %v8232_v62 = vld [vmem:[#allocation25_spill] sm:$0xff] }
 0x2c1   : > { %vm2824_vm13 = vcmp.lt.s32.totalorder %v2823_v48, 2  ;;  %v2826_v58 = vxor.u32 2147483648, %v6760_v60  ;;  %v2829_v21 = vxor.u32 2147483648, %v6754_v22  ;;  %v2714_v41 = vsel %vm6697_vm7, 0, %v6655_v13 }
 0x2c2   : > { %v4458_v28 = vadd.s32 4294967294, %v4045_v9  ;;  %vm2825_vm0 = vcmp.eq.s32.totalorder %v2823_v48, 0  ;;  %vm2828_vm2 = vcmp.eq.s32.totalorder %v2823_v48, 2  ;;  %v2718_v36 = vadd.s32 3, %v2714_v41 }
 0x2c3   : > { %vm3930_vm3 = vc.u32 %v7404_v8, %v7408_v16  ;;  %v2827_v63 = vsel %vm2825_vm0, %v6754_v22, %v2826_v58  ;;  %v2830_v4 = vsel %vm2828_vm2, %v2829_v21, %v6760_v60  ;;  %v2722_v59 = vxor.u32 2147483648, %v8232_v62  ;;  %v8236_v60 = vld [vmem:[#allocation17_spill] sm:$0xff]  ;;  %v8237_v58 = vld [vmem:[#allocation20_spill] sm:$0xff] }
 0x2c4   : > { %v8233_v14 = vand.u32 2147483647, %v6569_v53  ;;  %vm4459_vm7 = vcmp.lt.s32.totalorder %v4458_v28, 0  ;;  %v3931_v13 = vadd.s32 1, %v7409_v49  ;;  %v2831_v30 = vsel %vm2824_vm13, %v2827_v63, %v2830_v4 }
 0x2c5   : > { %v2719_v23 = vand.u32 3, %v2718_v36  ;;  %v4048_v29 = vsel %vm4459_vm7, 0, %v4458_v28  ;;  %v3928_v2 = vmul.u32 %v3921_v19, %v3912_v31  ;;  %v2832_v22 = vsel %vm2821_vm4, nan, %v2831_v30 }
 0x2c6   : > { %vm7427_vm9 = vcmp.le.f32.partialorder %v8233_v14, 0.7853982  ;;  %v2725_v20 = vxor.u32 2147483648, %v8236_v60  ;;  %v4049_v0 = vsub.s32 32, %v4048_v29  ;;  %v4053_v17 = vsub.s32 4294967266, %v4048_v29 }
 0x2c7   : > { %v3932_v45 = vsel %vm3930_vm3, %v3931_v13, %v7409_v49  ;;  %v8033_v38 = vand.u32 2147483647, %v7013_v1  ;;  %v4050_v48 = vshll.u32 %v7386_v50, %v4048_v29  ;;  %v4290_v21 = vmul.f32 %v8237_v58, %v2832_v22  ;;  %v8238_v49 = vld [vmem:[#allocation29_spill] sm:$0xff] }
 0x2c8   : > { %v3933_v9 = vadd.s32 %v3932_v45, %v3928_v2  ;;  %vm2721_vm13 = vcmp.eq.s32.totalorder %v2719_v23, 0  ;;  %vm3979_vm0 = vcmp.lt.s32.totalorder %v6673_v26, 0  ;;  %v4051_v55 = vshrl.u32 %v4033_v24, %v4049_v0 }
 0x2c9   : > { %v4054_v19 = vadd.s32 127, %v4053_v17  ;;  %v2723_v31 = vsel %vm2721_vm13, %v8236_v60, %v2722_v59  ;;  %vm2724_vm4 = vcmp.eq.s32.totalorder %v2719_v23, 2  ;;  %4306 = vst [vmem:[%s7445_s17 + $0x8] sm:$0xff] %v4290_v21  ;;  %vm2717_vm2 = vweird.f32 %v8238_v49 }
 0x2ca   : > { %v3934_v41 = vadd.s32 536870912, %v3933_v9  ;;  %vm2720_vm3 = vcmp.lt.s32.totalorder %v2719_v23, 2  ;;  %v2726_v50 = vsel %vm2724_vm4, %v2725_v20, %v8232_v62  ;;  %v4052_v28 = vor.u32 %v4051_v55, %v4050_v48  ;;  %v8240_v23 = vld [vmem:[#allocation23_spill] sm:$0xff] }
 0x2cb   : > { %v4055_v36 = vshll.u32 %v4054_v19, 23  ;;  %v2727_v63 = vsel %vm2720_vm3, %v2723_v31, %v2726_v50  ;;  %v4188_v4 = vand.u32 2139095040, %v7013_v1  ;;  %vm8036_vm7 = vcmp.lt.s32.totalorder %v6738_v5, 0  ;;  %v8241_v31 = vld [vmem:[#allocation16_spill] sm:$0xff] }
 0x2cc   : > { %v3935_v24 = vshrl.u32 %v3934_v41, 30  ;;  %v2728_v59 = vsel %vm2717_vm2, nan, %v2727_v63  ;;  %v4192_v14 = vand.u32 8388607, %v8033_v38  ;;  %v8034_v13 = vand.u32 2147483647, %v7018_v33 }
 0x2cd   : > { %vm8239_vm13 = vcmp.lt.s32.totalorder %v6569_v53, 0  ;;  %v4056_v30 = vor.u32 4788187, %v4055_v36  ;;  %v4289_v29 = vmul.f32 %v2728_v59, %v8240_v23  ;;  %v4189_v2 = vshrl.u32 %v4188_v4, 23 }
 0x2ce   : > { %v7460_v62 = vsel %vm8239_vm13, %v3751_v40, %v7268_v7  ;;  %5417 = vcosq.f32 %v7395_v15  ;;  %v3753_v22 = vsel %vm7427_vm9, %v6569_v53, %v3750_v39  ;;  %v4063_v60 = vsub.s32 4, %v7377_v46 }
 0x2cf   : > { %v3936_v20 = vshll.u32 %v3935_v24, 30  ;;  %v4057_v0 = vand.u32 2147483647, %v4056_v30  ;;  %v4059_v17 = vcvt.s32.f32 %v4052_v28  ;;  %4305 = vst [vmem:[%s7445_s17] sm:$0xff] %v4289_v29  ;;  %v4464_v45 = vadd.s32 4294967169, %v4189_v2 }
 0x2d0   : > { %v4084_v7 = vand.u32 2139095040, %v7018_v33  ;;  %v3959_v48 = vsub.s32 4, %v3935_v24  ;;  %v4193_v58 = vor.u32 8388608, %v4192_v14  ;;  %v7474_v21 = vand.u32 8388607, %v8034_v13 }
 0x2d1   : > { %v7470_v40 = vsub.s32 %v3933_v9, %v3936_v20  ;;  %v4060_v55 = vmul.f32 %v4059_v17, %v4057_v0  ;;  %v4195_v19 = vadd.s32 1, %v4464_v45  ;;  %v3026_v49 = vsel %vm6764_vm1, 0, %v8241_v31 }
 0x2d2   : > { %v4085_v39 = vshrl.u32 %v4084_v7, 23  ;;  %5419 = vsinq.f32 %v7395_v15  ;;  %v7483_v9 = vsel %vm3979_vm0, %v4063_v60, %v7377_v46  ;;  %v3030_v28 = vadd.s32 3, %v3026_v49  ;;  %v8244_v60 = vld [vmem:[#allocation8_spill] sm:$0xff] }
 0x2d3   : > { %v3939_v50 = vsub.s32 0, %v7470_v40  ;;  %5421 = vcosq.f32 %v3753_v22  ;;  %v4061_v36 = vxor.u32 2147483648, %v4060_v55  ;;  %vm4196_vm4 = vcmp.gt.s32.totalorder %v4195_v19, 0 }
 0x2d4   : > { %v4460_v63 = vadd.s32 4294967169, %v4085_v39  ;;  %5423 = vsinq.f32 %v3753_v22  ;;  %v3929_v4 = vadd.s32 %v7408_v16, %v7404_v8  ;;  %v4197_v14 = vsel %vm4196_vm4, %v4195_v19, 0 }
 0x2d5   : > { %v4453_v59 = vmin.u32 %v3939_v50, %v7470_v40  ;;  %v7491_v15 = vsel %vm8036_vm7, %v3959_v48, %v3935_v24  ;;  %v4199_v46 = vand.u32 31, %v4197_v14  ;;  %v7493_v30 = vshll.u32 %v4193_v58, 8 }
 0x2d6   : > { %8243 = vst [vmem:[#allocation25_spill] sm:$0xff] %v7491_v15  ;;  %v4062_v29 = vsel %vm3979_vm0, %v4061_v36, %v4060_v55  ;;  %v7498_v22 = vand.u32 3, %v3030_v28  ;;  %v4198_v16 = vshrl.u32 %v4197_v14, 5  ;;  %v4091_v17 = vadd.s32 1, %v4460_v63 }
 0x2d7   : > { %v3941_v2 = vclz %v4453_v59  ;;  %v4200_v20 = vsub.s32 32, %v4199_v46  ;;  %v4202_v0 = vshll.u32 %v8177_v3, %v4199_v46  ;;  %v8245_v45 = vand.u32 2147483647, %v6673_v26 }
 0x2d8   : > { %v7502_v24 = vpop.eup %5417  ;;  %v8246_v7 = vmov 0  ;;  %v4205_v58 = vshll.u32 %v8178_v10, %v4199_v46  ;;  %v4208_v55 = vshll.u32 %v8170_v43, %v4199_v46  ;;  %v4211_v19 = vshll.u32 %v8172_v37, %v4199_v46 }
 0x2d9   : > { %vm7506_vm1 = vcmp.le.f32.partialorder %v8245_v45, 0.7853982  ;;  %v4454_v48 = vadd.s32 4294967294, %v3941_v2  ;;  %v4201_v39 = vshrl.u32 %v8177_v3, %v4200_v20  ;;  %v4203_v31 = vshrl.u32 %v8178_v10, %v4200_v20 }
 0x2da   : > { %v8247_v7 = vsel %vm7506_vm1, 4294967295, %v8246_v7  ;;  %v4206_v41 = vshrl.u32 %v8170_v43, %v4200_v20  ;;  %v4209_v49 = vshrl.u32 %v8172_v37, %v4200_v20  ;;  %v4212_v50 = vshrl.u32 %v8200_v47, %v4200_v20 }
 0x2db   : > { %vm4455_vm0 = vcmp.lt.s32.totalorder %v4454_v48, 0  ;;  %v4214_v28 = vshll.u32 %v8200_v47, %v4199_v46  ;;  %v4215_v36 = vshrl.u32 %v8174_v27, %v4200_v20  ;;  %v4204_v59 = vor.u32 %v4203_v31, %v4202_v0 }
 0x2dc   : > { %v3944_v63 = vsel %vm4455_vm0, 0, %v4454_v48  ;;  %v4207_v14 = vor.u32 %v4206_v41, %v4205_v58  ;;  %v4210_v2 = vor.u32 %v4209_v49, %v4208_v55  ;;  %v7520_v45 = vpop.eup %5419  ;;  %v4213_v23 = vor.u32 %v4212_v50, %v4211_v19 }
 0x2dd   : > { %v3945_v38 = vsub.s32 32, %v3944_v63  ;;  %v3946_v13 = vshll.u32 %v7470_v40, %v3944_v63  ;;  %v3949_v8 = vsub.s32 4294967266, %v3944_v63  ;;  %v7523_v15 = vpop.eup %5421  ;;  %v4216_v53 = vor.u32 %v4215_v36, %v4214_v28 }
 0x2de   : > { %vm4217_vm2 = vcmp.lt.s32.totalorder %v4198_v16, 1  ;;  %vm4218_vm3 = vcmp.lt.s32.totalorder %v4198_v16, 2  ;;  %vm4219_vm13 = vcmp.lt.s32.totalorder %v4198_v16, 3  ;;  %v7525_v46 = vpop.eup %5423  ;;  %vm4220_vm4 = vcmp.lt.s32.totalorder %v4198_v16, 4 }
 0x2df   : > { %v3947_v20 = vshrl.u32 %v3929_v4, %v3945_v38  ;;  %v3950_v48 = vadd.s32 127, %v3949_v8  ;;  %v4221_v0 = vsel %vm4217_vm2, %v4201_v39, %v4204_v59  ;;  %v4222_v58 = vsel %vm4220_vm4, %v4210_v2, 2102212464 }
 0x2e0   : > { %v4225_v55 = vsel %vm4217_vm2, %v4204_v59, %v4207_v14  ;;  %v4226_v31 = vsel %vm4220_vm4, %v4213_v23, 920167782  ;;  %v4229_v41 = vsel %vm4217_vm2, %v4207_v14, %v4210_v2  ;;  %v4223_v19 = vsel %vm4219_vm13, %v4207_v14, %v4222_v58 }
 0x2e1   : > { %v3948_v49 = vor.u32 %v3947_v20, %v3946_v13  ;;  %v3951_v40 = vshll.u32 %v3950_v48, 23  ;;  %v4227_v50 = vsel %vm4219_vm13, %v4210_v2, %v4226_v31  ;;  %v4065_v28 = vsel %vm7506_vm1, %v6673_v26, %v4062_v29 }
 0x2e2   : > { %v4228_v36 = vsel %vm4218_vm3, %v4225_v55, %v4227_v50  ;;  %v4230_v38 = vsel %vm4220_vm4, %v4216_v53, 1326507024  ;;  %vm4092_vm0 = vcmp.gt.s32.totalorder %v4091_v17, 0  ;;  %v4224_v39 = vsel %vm4218_vm3, %v4221_v0, %v4223_v19 }
 0x2e3   : > { %v3952_v4 = vor.u32 4788187, %v3951_v40  ;;  %v3955_v8 = vcvt.s32.f32 %v3948_v49  ;;  %v4231_v63 = vsel %vm4219_vm13, %v4213_v23, %v4230_v38  ;;  %v8248_v13 = vand.u32 2147483647, %v6738_v5  ;;  %v8253_v49 = vld [vmem:[#allocation27_spill] sm:$0xff] }
 0x2e4   : > { %v4232_v14 = vsel %vm4218_vm3, %v4229_v41, %v4231_v63  ;;  %v7543_v29 = vmul.u32.u64.low %v7493_v30, %v4228_v36  ;;  %v7544_v2 = vmul.u32.u64.high %v7493_v30, %v4228_v36, %v7543_v29  ;;  %v4093_v53 = vsel %vm4092_vm0, %v4091_v17, 0 }
 0x2e5   : > { %vm7537_vm2 = vcmp.le.f32.partialorder %v8248_v13, 0.7853982  ;;  %v3953_v20 = vand.u32 2147483647, %v3952_v4  ;;  %v7547_v48 = vmul.u32.u64.low %v7493_v30, %v4232_v14  ;;  %v7548_v58 = vmul.u32.u64.high %v7493_v30, %v4232_v14, %v7547_v48 }
 0x2e6   : > { %v7550_v0 = vshrl.u32 %v4093_v53, 5  ;;  %5425 = vcosq.f32 %v4065_v28  ;;  %v4095_v23 = vand.u32 31, %v4093_v53  ;;  %v8251_v55 = vor.u32 8388608, %v7474_v21  ;;  %v8255_v53 = vld [vmem:[#allocation11_spill] sm:$0xff] }
 0x2e7   : > { %vm3033_vm3 = vcmp.eq.s32.totalorder %v7498_v22, 0  ;;  %5427 = vsinq.f32 %v4065_v28  ;;  %v3956_v16 = vmul.f32 %v3955_v8, %v3953_v20  ;;  %v4240_v41 = vmul.u32 %v7493_v30, %v4224_v39 }
 0x2e8   : > { %v7554_v31 = vshll.u32 %v8251_v55, 8  ;;  %v8252_v17 = vxor.u32 2147483648, %v8244_v60  ;;  %v4243_v19 = vadd.s32 1, %v7544_v2  ;;  %v4096_v50 = vsub.s32 32, %v4095_v23 }
 0x2e9   : > { %v3037_v36 = vxor.u32 2147483648, %v8253_v49  ;;  %v3957_v21 = vxor.u32 2147483648, %v3956_v16  ;;  %vm4242_vm4 = vc.u32 %v7548_v58, %v7543_v29  ;;  %v4098_v38 = vshll.u32 %v8177_v3, %v4095_v23 }
 0x2ea   : > { %v3035_v40 = vsel %vm3033_vm3, %v8253_v49, %v8252_v17  ;;  %vm4114_vm0 = vcmp.lt.s32.totalorder %v7550_v0, 2  ;;  %vm4115_vm7 = vcmp.lt.s32.totalorder %v7550_v0, 3  ;;  %v4244_v30 = vsel %vm4242_vm4, %v4243_v19, %v7544_v2 }
 0x2eb   : > { %v4099_v28 = vshrl.u32 %v8178_v10, %v4096_v50  ;;  %v4101_v4 = vshll.u32 %v8178_v10, %v4095_v23  ;;  %v4102_v8 = vshrl.u32 %v8170_v43, %v4096_v50  ;;  %vm3032_vm3 = vcmp.lt.s32.totalorder %v7498_v22, 2 }
 0x2ec   : > { %vm8254_vm13 = vcmp.lt.s32.totalorder %v6738_v5, 0  ;;  %v4245_v63 = vadd.s32 %v4244_v30, %v4240_v41  ;;  %v4104_v13 = vshll.u32 %v8170_v43, %v4095_v23  ;;  %v4105_v14 = vshrl.u32 %v8172_v37, %v4096_v50 }
 0x2ed   : > { %v3958_v39 = vsel %vm8254_vm13, %v3957_v21, %v3956_v16  ;;  %v4100_v20 = vor.u32 %v4099_v28, %v4098_v38  ;;  %v4103_v2 = vor.u32 %v4102_v8, %v4101_v4  ;;  %v4107_v48 = vshll.u32 %v8172_v37, %v4095_v23 }
 0x2ee   : > { %v4108_v10 = vshrl.u32 %v8200_v47, %v4096_v50  ;;  %v3961_v55 = vsel %vm7537_vm2, %v6738_v5, %v3958_v39  ;;  %v4246_v16 = vadd.s32 536870912, %v4245_v63  ;;  %v4097_v41 = vshrl.u32 %v8177_v3, %v4096_v50 }
 0x2ef   : > { %v4106_v43 = vor.u32 %v4105_v14, %v4104_v13  ;;  %v4110_v49 = vshll.u32 %v8200_v47, %v4095_v23  ;;  %v4111_v19 = vshrl.u32 %v8174_v27, %v4096_v50  ;;  %vm4116_vm13 = vcmp.lt.s32.totalorder %v7550_v0, 4 }
 0x2f0   : > { %v4109_v17 = vor.u32 %v4108_v10, %v4107_v48  ;;  %v7590_v37 = vadd.s32 %v7543_v29, %v7548_v58  ;;  %v4247_v21 = vshrl.u32 %v4246_v16, 30  ;;  %vm8256_vm4 = vcmp.lt.s32.totalorder %v7550_v0, 1  ;;  %v7596_v28 = vpop.eup %5425 }
 0x2f1   : > { %v4118_v38 = vsel %vm4116_vm13, %v4106_v43, 2102212464  ;;  %v4121_v30 = vsel %vm8256_vm4, %v4100_v20, %v4103_v2  ;;  %v4112_v3 = vor.u32 %v4111_v19, %v4110_v49  ;;  %vm8257_vm1 = vmmov %vm8256_vm4  ;;  %v7604_v58 = vpop.eup %5427  ;;  %5429 = vcosq.f32 %v3961_v55 }
 0x2f2   : > { %v4117_v47 = vsel %vm8257_vm1, %v4097_v41, %v4100_v20  ;;  %v4119_v27 = vsel %vm4115_vm7, %v4103_v2, %v4118_v38  ;;  %v4122_v29 = vsel %vm4116_vm13, %v4109_v17, 920167782  ;;  %v4248_v23 = vshll.u32 %v4247_v21, 30  ;;  %vm8258_vm4 = vmmov %vm8257_vm1 }
 0x2f3   : > { %v4123_v50 = vsel %vm4115_vm7, %v4106_v43, %v4122_v29  ;;  %v4125_v4 = vsel %vm8258_vm4, %v4103_v2, %v4106_v43  ;;  %v4271_v8 = vsub.s32 4, %v4247_v21  ;;  %v4126_v13 = vsel %vm4116_vm13, %v4112_v3, 1326507024  ;;  %v8267_v29 = vld [vmem:[#allocation30_spill] sm:$0xff] }
 0x2f4   : > { %v4124_v39 = vsel %vm4114_vm0, %v4121_v30, %v4123_v50  ;;  %vm8259_vm1 = vcmp.eq.s32.totalorder %v7498_v22, 2  ;;  %v7617_v20 = vsub.s32 %v4245_v63, %v4248_v23  ;;  %v4120_v48 = vsel %vm4114_vm0, %v4117_v47, %v4119_v27  ;;  %v8264_v30 = vld [vmem:[#allocation9_spill] sm:$0xff] }
 0x2f5   : > { %v3038_v14 = vsel %vm8259_vm1, %v3037_v36, %v8244_v60  ;;  %v4127_v2 = vsel %vm4115_vm7, %v4109_v17, %v4126_v13  ;;  %v7628_v41 = vmul.u32.u64.low %v7554_v31, %v4124_v39  ;;  %v7629_v43 = vmul.u32.u64.high %v7554_v31, %v4124_v39, %v7628_v41 }
 0x2f6   : > { %v3039_v10 = vsel %vm3032_vm3, %v3035_v40, %v3038_v14  ;;  %v4128_v16 = vsel %vm4114_vm0, %v4125_v4, %v4127_v2  ;;  %vm8260_vm13 = vweird.f32 %v8255_v53  ;;  %v4251_v36 = vsub.s32 0, %v7617_v20  ;;  %v8262_v40 = vld [vmem:[#allocation21_spill] sm:$0xff] }
 0x2f7   : > { %v3040_v60 = vsel %vm8260_vm13, nan, %v3039_v10  ;;  %v7635_v63 = vmul.u32.u64.low %v7554_v31, %v4128_v16  ;;  %v7636_v49 = vmul.u32.u64.high %v7554_v31, %v4128_v16, %v7635_v63  ;;  %5431 = vsinq.f32 %v3961_v55 }
 0x2f8   : > { %v4292_v17 = vmul.f32 %v7025_v34, %v3040_v60  ;;  %vm8261_vm7 = vcmp.lt.s32.totalorder %v7013_v1, 0  ;;  %v4136_v0 = vmul.u32 %v7554_v31, %v4120_v48  ;;  %v2922_v53 = vsel %vm6783_vm6, 0, %v8262_v40 }
 0x2f9   : > { %v7641_v22 = vsel %vm8261_vm7, %v4271_v8, %v4247_v21  ;;  %v4465_v38 = vmin.u32 %v4251_v36, %v7617_v20  ;;  %vm2925_vm0 = vweird.f32 %v8264_v30  ;;  %v2926_v3 = vadd.s32 3, %v2922_v53  ;;  %v8266_v21 = vld [vmem:[#allocation22_spill] sm:$0xff] }
 0x2fa   : > { %4308 = vst [vmem:[%s7445_s17 + $0x18] sm:$0xff] %v4292_v17  ;;  %v3234_v34 = vsel %vm6806_vm10, 0, %v6987_v54  ;;  %v4139_v55 = vadd.s32 1, %v7629_v43  ;;  %v2930_v27 = vxor.u32 2147483648, %v8266_v21  ;;  %v2933_v31 = vxor.u32 2147483648, %v8267_v29 }
 0x2fb   : > { %v3238_v23 = vadd.s32 3, %v3234_v34  ;;  %v4253_v50 = vclz %v4465_v38  ;;  %vm4138_vm6 = vc.u32 %v7636_v49, %v7628_v41  ;;  %v2927_v4 = vand.u32 3, %v2926_v3  ;;  %v7664_v48 = vpop.eup %5429 }
 0x2fc   : > { %v3242_v8 = vxor.u32 2147483648, %v7033_v32  ;;  %v4140_v39 = vsel %vm4138_vm6, %v4139_v55, %v7629_v43  ;;  %v3245_v54 = vxor.u32 2147483648, %v6940_v42  ;;  %v3130_v14 = vsel %vm6935_vm12, 0, %v6996_v6 }
 0x2fd   : > { %v3239_v13 = vand.u32 3, %v3238_v23  ;;  %v4466_v2 = vadd.s32 4294967294, %v4253_v50  ;;  %v4141_v10 = vadd.s32 %v4140_v39, %v4136_v0  ;;  %vm2928_vm10 = vcmp.lt.s32.totalorder %v2927_v4, 2  ;;  %v8272_v50 = vld [vmem:[#allocation31_spill] sm:$0xff] }
 0x2fe   : > { %vm2929_vm4 = vcmp.eq.s32.totalorder %v2927_v4, 0  ;;  %v8268_v16 = vand.u32 2147483647, %v7018_v33  ;;  %vm2932_vm13 = vcmp.eq.s32.totalorder %v2927_v4, 2  ;;  %v3134_v0 = vadd.s32 3, %v3130_v14 }
 0x2ff   : > { %v2931_v43 = vsel %vm2929_vm4, %v8267_v29, %v2930_v27  ;;  %vm3240_vm7 = vcmp.lt.s32.totalorder %v3239_v13, 2  ;;  %vm3241_vm6 = vcmp.eq.s32.totalorder %v3239_v13, 0  ;;  %vm4467_vm3 = vcmp.lt.s32.totalorder %v4466_v2, 0 }
 0x300   : > { %vm7668_vm1 = vcmp.le.f32.partialorder %v8268_v16, 0.7853982  ;;  %v4142_v12 = vadd.s32 536870912, %v4141_v10  ;;  %v2934_v6 = vsel %vm2932_vm13, %v2933_v31, %v8266_v21  ;;  %v3243_v36 = vsel %vm3241_vm6, %v6940_v42, %v3242_v8  ;;  %v8271_v21 = vld [vmem:[#allocation33_spill] sm:$0xff]  ;;  %v8273_v8 = vld [vmem:[#allocation12_spill] sm:$0xff]  ;;  %v8276_v16 = vld [vmem:[#allocation26_spill] sm:$0xff] }
 0x301   : > { %v4256_v63 = vsel %vm4467_vm3, 0, %v4466_v2  ;;  %v2935_v17 = vsel %vm2928_vm10, %v2931_v43, %v2934_v6  ;;  %vm3244_vm12 = vcmp.eq.s32.totalorder %v3239_v13, 2  ;;  %v7676_v3 = vpop.eup %5431  ;;  %v3135_v55 = vand.u32 3, %v3134_v0  ;;  %v8275_v2 = vld [vmem:[#allocation5_spill] sm:$0xff]  ;;  %v8280_v6 = vld [vmem:[#allocation39_spill] sm:$0xff] }
 0x302   : > { %v4257_v40 = vsub.s32 32, %v4256_v63  ;;  %v4258_v19 = vshll.u32 %v7617_v20, %v4256_v63  ;;  %v4261_v53 = vsub.s32 4294967266, %v4256_v63  ;;  %v4143_v38 = vshrl.u32 %v4142_v12, 30 }
 0x303   : > { %v2936_v47 = vsel %vm2925_vm0, nan, %v2935_v17  ;;  %v3246_v34 = vsel %vm3244_vm12, %v3245_v54, %v7033_v32  ;;  %v3138_v42 = vxor.u32 2147483648, %v8271_v21  ;;  %v7684_v20 = vadd.s32 %v7628_v41, %v7636_v49  ;;  %v8281_v17 = vld [vmem:[#allocation24_spill] sm:$0xff] }
 0x304   : > { %v4259_v27 = vshrl.u32 %v7590_v37, %v4257_v40  ;;  %v4262_v29 = vadd.s32 127, %v4261_v53  ;;  %v4144_v31 = vshll.u32 %v4143_v38, 30  ;;  %v4167_v23 = vsub.s32 4, %v4143_v38 }
 0x305   : > { %v4291_v4 = vmul.f32 %v2936_v47, %v8272_v50  ;;  %vm3237_vm3 = vweird.f32 %v8273_v8  ;;  %v3247_v30 = vsel %vm3240_vm7, %v3243_v36, %v3246_v34  ;;  %vm8274_vm0 = vcmp.lt.s32.totalorder %v7018_v33, 0 }
 0x306   : > { %v4260_v39 = vor.u32 %v4259_v27, %v4258_v19  ;;  %v4263_v14 = vshll.u32 %v4262_v29, 23  ;;  %v7689_v32 = vsub.s32 %v4141_v10, %v4144_v31  ;;  %v4168_v54 = vsel %vm8274_vm0, %v4167_v23, %v4143_v38  ;;  %v8284_v29 = vld [vmem:[#allocation35_spill] sm:$0xff]  ;;  %v8285_v23 = vld [vmem:[#allocation32_spill] sm:$0xff] }
 0x307   : > { %4307 = vst [vmem:[%s7445_s17 + $0x10] sm:$0xff] %v4291_v4  ;;  %v3248_v37 = vsel %vm3237_vm3, nan, %v3247_v30  ;;  %vm3133_vm10 = vweird.f32 %v8275_v2  ;;  %vm3136_vm4 = vcmp.lt.s32.totalorder %v3135_v55, 2  ;;  %vm3137_vm13 = vcmp.eq.s32.totalorder %v3135_v55, 0 }
 0x308   : > { %v4264_v41 = vor.u32 4788187, %v4263_v14  ;;  %v4147_v49 = vsub.s32 0, %v7689_v32  ;;  %v4170_v13 = vsel %vm7668_vm1, 0, %v4168_v54  ;;  %v3139_v43 = vsel %vm3137_vm13, %v8276_v16, %v3138_v42  ;;  %v8283_v42 = vld [vmem:[#allocation36_spill] sm:$0xff] }
 0x309   : > { %v8277_v10 = vand.u32 2147483647, %v7013_v1  ;;  %v4294_v36 = vmul.f32 %v8280_v6, %v3248_v37  ;;  %vm3140_vm6 = vcmp.eq.s32.totalorder %v3135_v55, 2  ;;  %v3141_v63 = vxor.u32 2147483648, %v8276_v16 }
 0x30a   : > { %v3442_v40 = vsel %vm7050_vm15, 0, %v8281_v17  ;;  %v4265_v19 = vand.u32 2147483647, %v4264_v41  ;;  %v4267_v53 = vcvt.s32.f32 %v4260_v39  ;;  %v4461_v38 = vmin.u32 %v4147_v49, %v7689_v32 }
 0x30b   : > { %vm7701_vm7 = vcmp.le.f32.partialorder %v8277_v10, 0.7853982  ;;  %v3446_v47 = vadd.s32 3, %v3442_v40  ;;  %4310 = vst [vmem:[%s7445_s17 + $0x28] sm:$0xff] %v4294_v36  ;;  %v3142_v34 = vsel %vm3140_vm6, %v3141_v63, %v8271_v21  ;;  %v3450_v27 = vxor.u32 2147483648, %v8283_v42  ;;  %v8287_v21 = vld [vmem:[#allocation6_spill] sm:$0xff] }
 0x30c   : > { %v3453_v31 = vxor.u32 2147483648, %v8284_v29  ;;  %v3338_v4 = vsel %vm7115_vm5, 0, %v8285_v23  ;;  %v4268_v8 = vmul.f32 %v4267_v53, %v4265_v19  ;;  %v4149_v30 = vclz %v4461_v38  ;;  %v8288_v10 = vld [vmem:[#allocation40_spill] sm:$0xff]  ;;  %v8289_v36 = vld [vmem:[#allocation13_spill] sm:$0xff]  ;;  %v8291_v40 = vld [vmem:[#allocation38_spill] sm:$0xff] }
 0x30d   : > { %v3143_v14 = vsel %vm3136_vm4, %v3139_v43, %v3142_v34  ;;  %v3447_v54 = vand.u32 3, %v3446_v47  ;;  %v7719_v39 = vadd.s32 3, %v4170_v13  ;;  %vm3445_vm15 = vweird.f32 %v8287_v21  ;;  %v8293_v21 = vld [vmem:[#allocation41_spill] sm:$0xff] }
 0x30e   : > { %v3144_v37 = vsel %vm3133_vm10, nan, %v3143_v14  ;;  %v3342_v41 = vadd.s32 3, %v3338_v4  ;;  %v4269_v49 = vxor.u32 2147483648, %v4268_v8  ;;  %v4462_v16 = vadd.s32 4294967294, %v4149_v30 }
 0x30f   : > { %v4293_v6 = vmul.f32 %v3144_v37, %v8288_v10  ;;  %vm3341_vm5 = vweird.f32 %v8289_v36  ;;  %v3346_v63 = vxor.u32 2147483648, %v7273_v18  ;;  %vm3448_vm12 = vcmp.lt.s32.totalorder %v3447_v54, 2 }
 0x310   : > { %vm3449_vm3 = vcmp.eq.s32.totalorder %v3447_v54, 0  ;;  %vm3452_vm0 = vcmp.eq.s32.totalorder %v3447_v54, 2  ;;  %v3343_v55 = vand.u32 3, %v3342_v41  ;;  %vm8290_vm4 = vcmp.lt.s32.totalorder %v7013_v1, 0 }
 0x311   : > { %v4270_v13 = vsel %vm8290_vm4, %v4269_v49, %v4268_v8  ;;  %vm4463_vm13 = vcmp.lt.s32.totalorder %v4462_v16, 0  ;;  %4309 = vst [vmem:[%s7445_s17 + $0x20] sm:$0xff] %v4293_v6  ;;  %v3451_v2 = vsel %vm3449_vm3, %v8284_v29, %v3450_v27  ;;  %v3454_v43 = vsel %vm3452_vm0, %v3453_v31, %v8283_v42 }
 0x312   : > { %v4152_v17 = vsel %vm4463_vm13, 0, %v4462_v16  ;;  %v3455_v0 = vsel %vm3448_vm12, %v3451_v2, %v3454_v43  ;;  %v3349_v19 = vxor.u32 2147483648, %v8291_v40  ;;  %v3650_v38 = vsel %vm7169_vm8, 0, %v7233_v57  ;;  %v8294_v16 = vld [vmem:[#allocation43_spill] sm:$0xff]  ;;  %v8295_v43 = vld [vmem:[#allocation14_spill] sm:$0xff] }
 0x313   : > { %v4273_v47 = vsel %vm7701_vm7, %v7013_v1, %v4270_v13  ;;  %v4153_v34 = vsub.s32 32, %v4152_v17  ;;  %v4157_v23 = vsub.s32 4294967266, %v4152_v17  ;;  %vm3344_vm10 = vcmp.lt.s32.totalorder %v3343_v55, 2 }
 0x314   : > { %v4154_v27 = vshll.u32 %v7689_v32, %v4152_v17  ;;  %v3456_v42 = vsel %vm3445_vm15, nan, %v3455_v0  ;;  %vm3345_vm6 = vcmp.eq.s32.totalorder %v3343_v55, 0  ;;  %vm3348_vm12 = vcmp.eq.s32.totalorder %v3343_v55, 2  ;;  %v8296_v17 = vld [vmem:[#allocation52_spill] sm:$0xff] }
 0x315   : > { %v4155_v29 = vshrl.u32 %v7684_v20, %v4153_v34  ;;  %v4158_v31 = vadd.s32 127, %v4157_v23  ;;  %v4296_v57 = vmul.f32 %v7214_v56, %v3456_v42  ;;  %v3347_v50 = vsel %vm3345_vm6, %v8291_v40, %v3346_v63  ;;  %v8297_v40 = vld [vmem:[#allocation42_spill] sm:$0xff]  ;;  %v8299_v34 = vld [vmem:[#allocation44_spill] sm:$0xff] }
 0x316   : > { %5433 = vcosq.f32 %v4273_v47  ;;  %v3350_v4 = vsel %vm3348_vm12, %v3349_v19, %v7273_v18  ;;  %v3654_v8 = vadd.s32 3, %v3650_v38  ;;  %v3658_v30 = vxor.u32 2147483648, %v7291_v51 }
 0x317   : > { %v4156_v14 = vor.u32 %v4155_v29, %v4154_v27  ;;  %v4159_v32 = vshll.u32 %v4158_v31, 23  ;;  %4312 = vst [vmem:[%s7445_s17 + $0x38] sm:$0xff] %v4296_v57  ;;  %v3351_v54 = vsel %vm3344_vm10, %v3347_v50, %v3350_v4  ;;  %v3661_v37 = vxor.u32 2147483648, %v7287_v35 }
 0x318   : > { %5435 = vsinq.f32 %v4273_v47  ;;  %v3352_v56 = vsel %vm3341_vm5, nan, %v3351_v54  ;;  %v3655_v20 = vand.u32 3, %v3654_v8  ;;  %v3546_v18 = vsel %vm7277_vm11, 0, %v8293_v21  ;;  %v8298_v47 = vld [vmem:[#allocation7_spill] sm:$0xff]  ;;  %v8301_v54 = vld [vmem:[#allocation45_spill] sm:$0xff] }
 0x319   : > { %v4160_v41 = vor.u32 4788187, %v4159_v32  ;;  %v4163_v49 = vcvt.s32.f32 %v4156_v14  ;;  %v4295_v10 = vmul.f32 %v3352_v56, %v8294_v16  ;;  %v3550_v6 = vadd.s32 3, %v3546_v18 }
 0x31a   : > { %vm3656_vm8 = vcmp.lt.s32.totalorder %v3655_v20, 2  ;;  %vm3657_vm15 = vcmp.eq.s32.totalorder %v3655_v20, 0  ;;  %vm3660_vm3 = vcmp.eq.s32.totalorder %v3655_v20, 2  ;;  %v3554_v63 = vxor.u32 2147483648, %v7380_v52 }
 0x31b   : > { %v4161_v55 = vand.u32 2147483647, %v4160_v41  ;;  %4311 = vst [vmem:[%s7445_s17 + $0x30] sm:$0xff] %v4295_v10  ;;  %v3659_v36 = vsel %vm3657_vm15, %v7287_v35, %v3658_v30  ;;  %v3662_v13 = vsel %vm3660_vm3, %v3661_v37, %v7291_v51  ;;  %v3551_v2 = vand.u32 3, %v3550_v6  ;;  %v8304_v10 = vld [vmem:[#allocation15_spill] sm:$0xff] }
 0x31c   : > { %vm3653_vm5 = vweird.f32 %v8295_v43  ;;  %v3663_v44 = vsel %vm3656_vm8, %v3659_v36, %v3662_v13  ;;  %v3557_v0 = vxor.u32 2147483648, %v8296_v17  ;;  %v3858_v19 = vsel %vm7369_vm14, 0, %v8297_v40  ;;  %v8305_v36 = vld [vmem:[#allocation25_spill] sm:$0xff] }
 0x31d   : > { %v4164_v53 = vmul.f32 %v4163_v49, %v4161_v55  ;;  %v3664_v38 = vsel %vm3653_vm5, nan, %v3663_v44  ;;  %vm3549_vm11 = vweird.f32 %v8298_v47  ;;  %vm3553_vm0 = vcmp.eq.s32.totalorder %v3551_v2, 0 }
 0x31e   : > { %v4298_v35 = vmul.f32 %v8299_v34, %v3664_v38  ;;  %v3555_v51 = vsel %vm3553_vm0, %v8296_v17, %v3554_v63  ;;  %vm3556_vm4 = vcmp.eq.s32.totalorder %v3551_v2, 2  ;;  %v3862_v23 = vadd.s32 3, %v3858_v19 }
 0x31f   : > { %v4165_v27 = vxor.u32 2147483648, %v4164_v53  ;;  %vm3552_vm13 = vcmp.lt.s32.totalorder %v3551_v2, 2  ;;  %v3558_v42 = vsel %vm3556_vm4, %v3557_v0, %v7380_v52  ;;  %v3866_v29 = vxor.u32 2147483648, %v7520_v45 }
 0x320   : > { %v7770_v31 = vpop.eup %5433  ;;  %4314 = vst [vmem:[%s7445_s17 + $0x48] sm:$0xff] %v4298_v35  ;;  %v3559_v11 = vsel %vm3552_vm13, %v3555_v51, %v3558_v42  ;;  %v3863_v57 = vand.u32 3, %v3862_v23  ;;  %v3869_v50 = vxor.u32 2147483648, %v7502_v24  ;;  %v3754_v4 = vsel %vm7427_vm9, 0, %v7460_v62  ;;  %v8307_v23 = vld [vmem:[#allocation48_spill] sm:$0xff] }
 0x321   : > { %vm8300_vm14 = vcmp.lt.s32.totalorder %v7018_v33, 0  ;;  %v3560_v52 = vsel %vm3549_vm11, nan, %v3559_v11  ;;  %vm3861_vm10 = vweird.f32 %v6520_v61  ;;  %v3758_v30 = vadd.s32 3, %v3754_v4  ;;  %v8309_v4 = vld [vmem:[#allocation50_spill] sm:$0xff] }
 0x322   : > { %v4166_v8 = vsel %vm8300_vm14, %v4165_v27, %v4164_v53  ;;  %v7782_v14 = vpop.eup %5435  ;;  %v4297_v37 = vmul.f32 %v3560_v52, %v8301_v54  ;;  %vm3865_vm6 = vcmp.eq.s32.totalorder %v3863_v57, 0  ;;  %v3762_v25 = vxor.u32 2147483648, %v7525_v46 }
 0x323   : > { %v4169_v32 = vsel %vm7668_vm1, %v7018_v33, %v4166_v8  ;;  %vm3864_vm9 = vcmp.lt.s32.totalorder %v3863_v57, 2  ;;  %v3867_v62 = vsel %vm3865_vm6, %v7502_v24, %v3866_v29  ;;  %vm3868_vm12 = vcmp.eq.s32.totalorder %v3863_v57, 2 }
 0x324   : > { %v3759_v56 = vand.u32 3, %v3758_v30  ;;  %5437 = vcosq.f32 %v4169_v32  ;;  %4313 = vst [vmem:[%s7445_s17 + $0x40] sm:$0xff] %v4297_v37  ;;  %v3870_v20 = vsel %vm3868_vm12, %v3869_v50, %v7520_v45  ;;  %v3765_v21 = vxor.u32 2147483648, %v7523_v15  ;;  %v8303_v45 = vld [vmem:[#allocation46_spill] sm:$0xff] }
 0x325   : > { %vm8302_vm8 = vnez %v8247_v7  ;;  %5439 = vsinq.f32 %v4169_v32  ;;  %v3871_v18 = vsel %vm3864_vm9, %v3867_v62, %v3870_v20  ;;  %vm3757_vm5 = vweird.f32 %v8304_v10 }
 0x326   : > { %v4066_v60 = vsel %vm8302_vm8, 0, %v7483_v9  ;;  %vm3761_vm1 = vcmp.eq.s32.totalorder %v3759_v56, 0  ;;  %vm3764_vm15 = vcmp.eq.s32.totalorder %v3759_v56, 2  ;;  %v3872_v24 = vsel %vm3861_vm10, nan, %v3871_v18 }
 0x327   : > { %vm3760_vm3 = vcmp.lt.s32.totalorder %v3759_v56, 2  ;;  %v3763_v41 = vsel %vm3761_vm1, %v7523_v15, %v3762_v25  ;;  %v3766_v49 = vsel %vm3764_vm15, %v3765_v21, %v7525_v46  ;;  %v4300_v16 = vmul.f32 %v8303_v45, %v3872_v24  ;;  %v8306_v15 = vld [vmem:[#allocation47_spill] sm:$0xff] }
 0x328   : > { %v3767_v7 = vsel %vm3760_vm3, %v3763_v41, %v3766_v49  ;;  %v4070_v9 = vadd.s32 3, %v4066_v60  ;;  %v4074_v63 = vxor.u32 2147483648, %v7604_v58  ;;  %v4077_v55 = vxor.u32 2147483648, %v7596_v28 }
 0x329   : > { %v3768_v6 = vsel %vm3757_vm5, nan, %v3767_v7  ;;  %v3962_v61 = vsel %vm7537_vm2, 0, %v8305_v36  ;;  %4316 = vst [vmem:[%s7445_s17 + $0x58] sm:$0xff] %v4300_v16  ;;  %vm4069_vm11 = vweird.f32 %v6673_v26  ;;  %v3970_v43 = vxor.u32 2147483648, %v7676_v3  ;;  %v8308_v26 = vld [vmem:[#allocation49_spill] sm:$0xff] }
 0x32a   : > { %v4299_v13 = vmul.f32 %v3768_v6, %v8306_v15  ;;  %v4071_v46 = vand.u32 3, %v4070_v9  ;;  %v3966_v2 = vadd.s32 3, %v3962_v61  ;;  %v3973_v44 = vxor.u32 2147483648, %v7664_v48 }
 0x32b   : > { %v4274_v17 = vsel %vm7701_vm7, 0, %v7641_v22  ;;  %v4282_v0 = vxor.u32 2147483648, %v7782_v14  ;;  %v4285_v38 = vxor.u32 2147483648, %v7770_v31  ;;  %vm3965_vm7 = vweird.f32 %v6738_v5 }
 0x32c   : > { %4315 = vst [vmem:[%s7445_s17 + $0x50] sm:$0xff] %v4299_v13  ;;  %vm4072_vm0 = vcmp.lt.s32.totalorder %v4071_v46, 2  ;;  %vm4073_vm2 = vcmp.eq.s32.totalorder %v4071_v46, 0  ;;  %vm4076_vm4 = vcmp.eq.s32.totalorder %v4071_v46, 2  ;;  %v3967_v59 = vand.u32 3, %v3966_v2 }
 0x32d   : > { %v4075_v40 = vsel %vm4073_vm2, %v7596_v28, %v4074_v63  ;;  %v4078_v19 = vsel %vm4076_vm4, %v4077_v55, %v7604_v58  ;;  %v4278_v53 = vadd.s32 3, %v4274_v17  ;;  %v4175_v42 = vand.u32 3, %v7719_v39 }
 0x32e   : > { %v4079_v47 = vsel %vm4072_vm0, %v4075_v40, %v4078_v19  ;;  %vm3968_vm13 = vcmp.lt.s32.totalorder %v3967_v59, 2  ;;  %vm3969_vm14 = vcmp.eq.s32.totalorder %v3967_v59, 0  ;;  %vm3972_vm10 = vcmp.eq.s32.totalorder %v3967_v59, 2  ;;  %v5438_v22 = vpop.eup %5437 }
 0x32f   : > { %v4080_v12 = vsel %vm4069_vm11, nan, %v4079_v47  ;;  %v3971_v34 = vsel %vm3969_vm14, %v7664_v48, %v3970_v43  ;;  %v3974_v35 = vsel %vm3972_vm10, %v3973_v44, %v7676_v3  ;;  %v4279_v51 = vand.u32 3, %v4278_v53  ;;  %v5440_v28 = vpop.eup %5439 }
 0x330   : > { %v4302_v58 = vmul.f32 %v8307_v23, %v4080_v12  ;;  %v3975_v27 = vsel %vm3968_vm13, %v3971_v34, %v3974_v35  ;;  %vm4277_vm8 = vweird.f32 %v7013_v1  ;;  %v4178_v57 = vxor.u32 2147483648, %v5440_v28 }
 0x331   : > { %v3976_v29 = vsel %vm3965_vm7, nan, %v3975_v27  ;;  %vm4281_vm6 = vcmp.eq.s32.totalorder %v4279_v51, 0  ;;  %vm4284_vm9 = vcmp.eq.s32.totalorder %v4279_v51, 2  ;;  %vm4280_vm12 = vcmp.lt.s32.totalorder %v4279_v51, 2 }
 0x332   : > { %4318 = vst [vmem:[%s7445_s17 + $0x68] sm:$0xff] %v4302_v58  ;;  %v4301_v48 = vmul.f32 %v3976_v29, %v8308_v26  ;;  %v4283_v3 = vsel %vm4281_vm6, %v7770_v31, %v4282_v0  ;;  %v4286_v11 = vsel %vm4284_vm9, %v4285_v38, %v7782_v14  ;;  %vm4177_vm1 = vcmp.eq.s32.totalorder %v4175_v42, 0  ;;  %v8310_v14 = vld [vmem:[#allocation51_spill] sm:$0xff] }
 0x333   : > { %v4287_v5 = vsel %vm4280_vm12, %v4283_v3, %v4286_v11  ;;  %v4181_v50 = vxor.u32 2147483648, %v5438_v22  ;;  %v4179_v52 = vsel %vm4177_vm1, %v5438_v22, %v4178_v57  ;;  %vm4180_vm15 = vcmp.eq.s32.totalorder %v4175_v42, 2 }
 0x334   : > { %4317 = vst [vmem:[%s7445_s17 + $0x60] sm:$0xff] %v4301_v48  ;;  %v4288_v39 = vsel %vm4277_vm8, nan, %v4287_v5  ;;  %vm4176_vm3 = vcmp.lt.s32.totalorder %v4175_v42, 2  ;;  %vm4173_vm5 = vweird.f32 %v7018_v33 }
 0x335   : > { %v4304_v8 = vmul.f32 %v8309_v4, %v4288_v39  ;;  %v4182_v31 = vsel %vm4180_vm15, %v4181_v50, %v5440_v28 }
 0x336   : > { %v4183_v1 = vsel %vm4176_vm3, %v4179_v52, %v4182_v31 }
 0x337   : > { %4320 = vst [vmem:[%s7445_s17 + $0x78] sm:$0xff] %v4304_v8  ;;  %v4184_v30 = vsel %vm4173_vm5, nan, %v4183_v1 }
 0x338   : > { %v4303_v32 = vmul.f32 %v4184_v30, %v8310_v14 }
 0x33a   : > { %4319 = vst [vmem:[%s7445_s17 + $0x70] sm:$0xff] %v4303_v32 }
 0x33b   : > { %5454 = shalt.err (!%p5451_p3)
}
 0x33c   : > { %s5455_s4 = scalar_lea.hbm %s7841_s26, 2048  ;;  %s5459_s7 = scalar_lea.hbm %s7893_s3, 4096 }
 0x33d   : > { %p5456_p4 = scmp.ne.s32.totalorder %s7841_s26, %s5455_s4  ;;  %p5460_p9 = scmp.lt.u32.totalorder %s7841_s26, %s7893_s3 }
 0x33e   : > { %p5461_p10 = scmp.lt.u32.totalorder %s5459_s7, %s5455_s4  ;;  %p5463_p12 = scmp.lt.u32.totalorder %s5455_s4, %s7841_s26 }
 0x33f   : > { %p5457_p7 = pnand %p5456_p4, %p5572_p5 }
 0x340   : > { %p5462_p11 = por %p5461_p10, %p5460_p9 }
 0x341   : > { %p5458_p8 = pneg %p5457_p7 }
 0x342   : > { %p5464_p13 = por %p5463_p12, %p5462_p11 }
 0x344   : > { %p5465_p0 = pnand %p5464_p13, %p5458_p8 }
 0x346   : > { %5468 = shalt.err (!%p5465_p0)
}
 0x347   : > { %s5512_s10 = smov 128   ;;  %s5513_s11 = smov 8  }
 0x348   : > { %5298 = dma.vmem_to_hbm [thread:$0]  (%p5572_p5), %s7843_s20, 2048, %s7841_s26, %s7849_s16, %s5512_s10, %s5512_s10, %s5513_s11  }
 0x349 PF: > { %p5304_p1 = scmp.ge.s32.totalorder %s5503_s15, 2  ;;  %s4350_s17 = sand.u32 1, %s5491_s12  }
 0x34a   : > { %s4351_s19 = scalar_lea.sflag [#allocation3], %s4350_s17 }
 0x34b   : > { %p5301_p2 = pnand %p5304_p1, %p5576_p6 }
 0x34d   : > { %5486 = dma.done.wait (!%p5301_p2), %s4351_s19, 2048  }
 0x34e   : > { %5488 = vsyncadd (!%p5301_p2), %s4351_s19, 4294965248  ;;  %p13_p3 = scmp.ge.s32.totalorder %s5559_s18, 4   ;;  %s8311_s12 = smov %s5495_s13 }
 0x34f   : > { %s8312_s13 = smov %s5499_s14  ;;  %s8313_s14 = smov %s5570_s21 }
 0x350   : > { %s8314_s15 = smov %s5559_s18  ;;  %15 = sbr.rel (!%p13_p3) target bundleno = 3 (0x3), region = 67 }
 0x357   :  { %4356 = vsyncpa [#allocation3], 1 }
 0x358   :  { %4358 = vsyncpa [#allocation3 + $0x1], 1 }

</bundles_post_ra>
